<compile_context>
chip_gen: v7x
topology: tpu7x:2x2x1
jax: 0.10.0
libtpu: 0.0.40
codegen_flags: <defaults>
</compile_context>

<pallas_src>
import functools

import jax
import jax.numpy as jnp
from jax.experimental import pallas as pl
from jax.experimental.pallas import tpu as pltpu

EPS = 1e-5

# (pre_relu, post_relu) per SeparableConv stage for the module defaults
# (reps=3, stride=1, dilation=1, start_with_relu=False, grow_first=True);
# back-to-back ReLUs between stages collapse into one.
_STAGE_RELUS = ((False, False), (True, True), (True, True))


# ------------------------- pltpu.roll direction probe ----------------------- #

@functools.lru_cache(maxsize=None)
def _roll_matches_jnp_roll() -> bool:
  """One tiny cached launch pinning down pltpu.roll's rotation direction.

  Every 3x3 halo read below is a lane rotation; a flipped rotation convention would
  silently mirror the conv taps.  The documented convention (and the interpret-mode
  impl) matches jnp.roll (out[i] == in[i - shift]); if the probe cannot run (AOT /
  mock compile, no device) we fall back to that documented convention.
  """
  def probe(x_ref, o_ref):
    o_ref[...] = pltpu.roll(x_ref[...], 1, 1)

  try:
    x = jnp.tile(jnp.arange(128, dtype=jnp.float32)[None, :], (8, 1))
    y = pl.pallas_call(probe,
                       out_shape=jax.ShapeDtypeStruct((8, 128), jnp.float32))(x)
    return bool(y[0, 0] == 127.0)
  except Exception:          # no device at trace time: use the documented convention
    return True


# ------------------------------ Pallas kernel ------------------------------- #

def _block_kernel(*refs, Wp, relus, roll_fwd, has_skip):
  """Whole Block for a lane-folded group of images in a (C, L) layout.

  L = Nb * P, P = ceil((H+2)*(W+2)/128)*128.  Pixel (h, w) of group slot b lives at
  lane b*P + (h+1)*Wp + (w+1); every other lane is halo/padding and is forced back to
  zero (mask) before the next 3x3 depthwise conv may read it.
  """
  if has_skip:
    x_ref, mask_ref, *stage_refs, skw_ref, skb_ref, out_ref = refs
  else:
    x_ref, mask_ref, *stage_refs, out_ref = refs

  L = x_ref.shape[-1]
  xpad = x_ref[0]                      # (Cin, L)  zero-padded input, lane-flattened
  mask = mask_ref[...]                 # (1, L)    1.0 on interior pixels, else 0.0

  def shift(a, delta):
    # b[:, q] = a[:, (q + delta) % L]; wrapped-in values never reach interior outputs.
    if delta == 0:
      return a
    amount = (-delta) % L if roll_fwd else delta % L
    return pltpu.roll(a, amount, 1)    # XLU lane rotation

  def sepconv(a, dw_ref, pwT_ref, b_ref, pre_relu, post_relu):
    """[ReLU] -> depthwise 3x3 -> (folded BNs) pointwise 1x1 + bias -> [ReLU]."""
    if pre_relu:
      a = jnp.maximum(a, 0.0)          # relu(pad(x)) == pad(relu(x)) for zero padding
    # Depthwise 3x3 factored into horizontal-then-vertical rolls: the per-channel tap
    # weights are constant along lanes, so rolls commute with them -> 4 rotations
    # (2 horizontal on `a`, 2 vertical on the row combinations) instead of 8.
    a_w = shift(a, -1)                 # a[:, q-1]  (west taps, dx=0)
    a_e = shift(a, +1)                 # a[:, q+1]  (east taps, dx=2)
    rows = []
    for dy in range(3):                # per-row FMA combination (VPU)
      t = dy * 3
      rows.append(dw_ref[:, t:t + 1] * a_w
                  + dw_ref[:, t + 1:t + 2] * a
                  + dw_ref[:, t + 2:t + 3] * a_e)
    acc = shift(rows[0], -Wp) + rows[1] + shift(rows[2], +Wp)
    # Pointwise 1x1 conv with both BatchNorms folded in: (Co,Ci)@(Ci,L) on the MXU.
    y = jnp.dot(pwT_ref[...], acc.astype(pwT_ref.dtype),
                preferred_element_type=jnp.float32) + b_ref[...]
    if post_relu:
      y = jnp.maximum(y, 0.0)
    return y

  (pre0, post0), (pre1, post1), (pre2, post2) = relus
  d0, p0, b0, d1, p1, b1, d2, p2, b2 = stage_refs
  a0 = sepconv(xpad, d0, p0, b0, pre0, post0) * mask    # re-zero halo for the next 3x3
  a1 = sepconv(a0,   d1, p1, b1, pre1, post1) * mask
  a2 = sepconv(a1,   d2, p2, b2, pre2, post2)
  if has_skip:                          # skip branch: 1x1 conv + folded BN
    skip = jnp.dot(skw_ref[...], xpad.astype(skw_ref.dtype),
                   preferred_element_type=jnp.float32) + skb_ref[...]
  else:                                 # identity skip: no MXU matmul at all
    skip = xpad
  out_ref[0] = a2 + skip


# ----------------------------- pallas_call glue ----------------------------- #

def _pick_group_size(n, cin, cout, p, act_budget_bytes=8 << 20):
  """Largest divisor of the batch whose lane-folded live activations fit the budget."""
  per_image = 4 * p * (3 * cin + 9 * cout)   # rough: pipelined I/O + live intermediates
  nb = 1
  for cand in range(1, n + 1):
    if n % cand == 0 and cand * per_image <= act_budget_bytes:
      nb = cand
  return nb


def block_forward(inp_nchw, params, *, matmul_dtype=jnp.float32):
  """Block.forward with PyTorch NCHW input/output convention."""
  x = inp_nchw.astype(jnp.float32)
  N, Cin, H, W = x.shape
  Cout = params['stages'][0]['pw_w'].shape[-1]
  has_skip = params['skip'] is not None
  if not has_skip:
    assert Cin == Cout, "identity skip requires in_channels == out_channels"

  Hp, Wp = H + 2, W + 2
  p_real = Hp * Wp
  P = ((p_real + 127) // 128) * 128            # lane-dense per-image spatial axis

  # Fold Nb images into one grid step along the lane axis (amortizes per-step overhead
  # and widens the MXU N-dim at small shapes).  NOTE: on v7x keep >=2 grid steps when
  # possible so both TensorCores get work (see the spatial-tiling TODO above).
  Nb = _pick_group_size(N, Cin, Cout, P)
  G = N // Nb
  L = Nb * P

  # Pad ONCE; the 1-pixel halo of later stages is re-created in-kernel via the mask.
  xflat = jnp.pad(x, ((0, 0), (0, 0), (1, 1), (1, 1))).reshape(N, Cin, p_real)
  xflat = jnp.pad(xflat, ((0, 0), (0, 0), (0, P - p_real)))
  xg = xflat.reshape(G, Nb, Cin, P).transpose(0, 2, 1, 3).reshape(G, Cin, L)

  # Interior-pixel mask in the flattened padded layout, tiled once per folded image.
  q = jnp.arange(P)
  row, col = q // Wp, q % Wp
  m = ((q < p_real) & (row >= 1) & (row <= H) & (col >= 1) & (col <= W))
  mask = jnp.tile(m.astype(jnp.float32), (Nb,))[None, :]            # (1, L)

  # Host-side folding of both BatchNorms of each stage into the pointwise weight/bias.
  ops = [xg, mask]
  stage_shapes = []
  wbytes = jnp.dtype(matmul_dtype).itemsize
  weight_bytes = 0
  for p in params['stages']:
    ci, co = p['pw_w'].shape
    s1, t1 = p['dwbn_s'][0], p['dwbn_b'][0]          # BN inside SeparableConv2d
    s2, t2 = p['obn_s'][0], p['obn_b'][0]            # BN after the SeparableConv2d
    w_fold = (s1[:, None] * p['pw_w']) * s2[None, :]                # (ci, co)
    b_fold = s2 * (t1 @ p['pw_w']) + t2                             # (co,)
    ops += [p['dw_w'].T,                             # (ci, 9): taps on lanes
            w_fold.T.astype(matmul_dtype),           # (co, ci)
            b_fold[:, None].astype(jnp.float32)]     # (co, 1)
    stage_shapes.append((ci, co))
    weight_bytes += ci * 128 * 4 + co * ci * wbytes + co * 128 * 4
  if has_skip:
    sk = params['skip']
    ops += [(sk['skip_w'] * sk['sbn_s'][0][None, :]).T.astype(matmul_dtype),  # (co, ci)
            sk['sbn_b'][0][:, None].astype(jnp.float32)]                      # (co, 1)
    weight_bytes += Cout * Cin * wbytes + Cout * 128 * 4

  # Explicit VMEM budget: pipelined activation I/O + in-kernel live intermediates +
  # constants, with ~50% headroom; clamped to [32 MiB, 64 MiB] so it is legal on v7x.
  act_bytes = 4 * L * 2 * (Cin + Cout)
  live_bytes = 4 * L * (Cin + 7 * Cout)
  vmem_est = act_bytes + live_bytes + weight_bytes + 4 * L
  vmem_limit = int(min(max(int(vmem_est * 1.5), 32 << 20), 64 << 20))

  kernel = functools.partial(_block_kernel, Wp=Wp, relus=_STAGE_RELUS,
                             roll_fwd=_roll_matches_jnp_roll(), has_skip=has_skip)

  def run(single_buffer_consts):
    # Grid-invariant operands (mask, weights, biases) only need one pipeline buffer.
    ckw = dict(pipeline_mode=pl.Buffered(1)) if single_buffer_consts else {}
    in_specs = [pl.BlockSpec((1, Cin, L), lambda g: (g, 0, 0)),
                pl.BlockSpec((1, L), lambda g: (0, 0), **ckw)]
    for ci, co in stage_shapes:
      in_specs += [pl.BlockSpec((ci, 9), lambda g: (0, 0), **ckw),
                   pl.BlockSpec((co, ci), lambda g: (0, 0), **ckw),
                   pl.BlockSpec((co, 1), lambda g: (0, 0), **ckw)]
    if has_skip:
      in_specs += [pl.BlockSpec((Cout, Cin), lambda g: (0, 0), **ckw),
                   pl.BlockSpec((Cout, 1), lambda g: (0, 0), **ckw)]
    return pl.pallas_call(
        kernel,
        out_shape=jax.ShapeDtypeStruct((G, Cout, L), jnp.float32),
        grid=(G,),
        in_specs=in_specs,
        out_specs=pl.BlockSpec((1, Cout, L), lambda g: (g, 0, 0)),
        compiler_params=pltpu.CompilerParams(
            dimension_semantics=("parallel",),
            vmem_limit_bytes=vmem_limit),
    )(*ops)

  try:
    out_g = run(True)
  except Exception:    # pl.Buffered(1) not supported by this jax: default buffering
    out_g = run(False)

  # TODO(synk): fuse this crop into the consumer / keep the lane-dense layout flowing.
  out_flat = out_g.reshape(G, Cout, Nb, P).transpose(0, 2, 1, 3).reshape(N, Cout, P)
  out = out_flat[:, :, :p_real].reshape(N, Cout, Hp, Wp)
  return out[:, :, 1:H + 1, 1:W + 1]                                # NCHW


# ----------------------------- parameter setup ------------------------------ #

def _fold_bn(kg, kb, km, kv, c):
  gamma = 1.0 + 0.1 * jax.random.normal(kg, (c,), jnp.float32)
  beta = 0.1 * jax.random.normal(kb, (c,), jnp.float32)
  mean = 0.1 * jax.random.normal(km, (c,), jnp.float32)
  var = 1.0 + 0.1 * jax.random.uniform(kv, (c,), jnp.float32)
  scale = gamma * jax.lax.rsqrt(var + EPS)
  bias = beta - mean * scale
  return scale.reshape(1, c), bias.reshape(1, c)


def make_block_params(key, cin, cout):
  stages = []
  chans = [(cin, cout), (cout, cout), (cout, cout)]
  for ci, co in chans:
    key, k_dw, k_pw, *kbn = jax.random.split(key, 11)
    dwbn_s, dwbn_b = _fold_bn(kbn[0], kbn[1], kbn[2], kbn[3], ci)
    obn_s, obn_b = _fold_bn(kbn[4], kbn[5], kbn[6], kbn[7], co)
    stages.append(dict(
        dw_w=0.2 * jax.random.normal(k_dw, (9, ci), jnp.float32),   # (3*3, C) depthwise
        dwbn_s=dwbn_s, dwbn_b=dwbn_b,
        pw_w=jax.random.normal(k_pw, (ci, co), jnp.float32) / (ci ** 0.5),
        obn_s=obn_s, obn_b=obn_b,
    ))
  skip = None
  if cin != cout:  # stride is 1 (module default); skip branch only if channels change
    key, k_s, *kbn = jax.random.split(key, 6)
    sbn_s, sbn_b = _fold_bn(kbn[0], kbn[1], kbn[2], kbn[3], cout)
    skip = dict(
        skip_w=jax.random.normal(k_s, (cin, cout), jnp.float32) / (cin ** 0.5),
        sbn_s=sbn_s, sbn_b=sbn_b)
  return dict(stages=stages, skip=skip)


# ----------------------------- pure-JAX reference --------------------------- #

def block_reference(inp_nchw, params):
  x = jnp.transpose(inp_nchw, (0, 2, 3, 1)).astype(jnp.float32)
  act = x
  for (pre, post), p in zip(_STAGE_RELUS, params['stages']):
    a = jnp.maximum(act, 0.0) if pre else act
    ci = a.shape[-1]
    w = p['dw_w'].reshape(3, 3, 1, ci)
    y = jax.lax.conv_general_dilated(
        a, w, window_strides=(1, 1), padding=((1, 1), (1, 1)),
        dimension_numbers=('NHWC', 'HWIO', 'NHWC'),
        feature_group_count=ci, precision=jax.lax.Precision.HIGHEST)
    y = y * p['dwbn_s'][0] + p['dwbn_b'][0]
    y = jnp.einsum('nhwc,cd->nhwd', y, p['pw_w'],
                   precision=jax.lax.Precision.HIGHEST)
    y = y * p['obn_s'][0] + p['obn_b'][0]
    if post:
      y = jnp.maximum(y, 0.0)
    act = y
  if params['skip'] is not None:
    skip = jnp.einsum('nhwc,cd->nhwd', x, params['skip']['skip_w'],
                      precision=jax.lax.Precision.HIGHEST)
    skip = skip * params['skip']['sbn_s'][0] + params['skip']['sbn_b'][0]
  else:
    skip = x
  return jnp.transpose(act + skip, (0, 3, 1, 2))


# ---------------------------------- main ------------------------------------ #

if __name__ == "__main__":
  key = jax.random.PRNGKey(0)
  kx, kp, kp2 = jax.random.split(key, 3)
  N, Cin, Cout, H, W = 2, 8, 16, 16, 16
  x = jax.random.normal(kx, (N, Cin, H, W), jnp.float32)    # NCHW, like PyTorch

  # Case 1: channel-growing block (conv+BN skip branch).
  params = make_block_params(kp, Cin, Cout)
  ref = jax.block_until_ready(block_reference(x, params))

  out = jax.block_until_ready(block_forward(x, params))                     # f32 matmuls
  assert out.shape == (N, Cout, H, W), out.shape
  err = float(jnp.max(jnp.abs(out - ref)))
  assert jnp.allclose(out, ref, atol=5e-3, rtol=5e-3), err

  out_bf16 = jax.block_until_ready(
      block_forward(x, params, matmul_dtype=jnp.bfloat16))  # bf16 MXU inputs, f32 acc
  err_bf16 = float(jnp.max(jnp.abs(out_bf16 - ref)))
  assert jnp.allclose(out_bf16, ref, atol=5e-2, rtol=5e-2), err_bf16

  # Case 2: in_channels == out_channels -> identity skip (specialized: no skip matmul).
  params_id = make_block_params(kp2, Cout, Cout)
  x_id = jax.random.normal(kx, (N, Cout, H, W), jnp.float32)
  out_id = jax.block_until_ready(block_forward(x_id, params_id))
  ref_id = jax.block_until_ready(block_reference(x_id, params_id))
  err_id = float(jnp.max(jnp.abs(out_id - ref_id)))
  assert jnp.allclose(out_id, ref_id, atol=5e-3, rtol=5e-3), err_id

  print("KERNEL_OK")
</pallas_src>

<mosaic_0001>
module attributes {stable_mosaic.version = 11 : i64} {
  func.func @probe(%arg0: memref<8x128xf32, #tpu.memory_space<vmem>>, %arg1: memref<8x128xf32, #tpu.memory_space<vmem>>) attributes {dimension_semantics = [], scalar_prefetch = 0 : i64, scratch_operands = 0 : i64, tpu.core_type = #tpu.core_type<tc>} {
    %c0 = arith.constant 0 : index
    %c0_0 = arith.constant 0 : index
    %0 = vector.load %arg0[%c0, %c0_0] : memref<8x128xf32, #tpu.memory_space<vmem>>, vector<8x128xf32>
    %c1_i32 = arith.constant 1 : i32
    %1 = tpu.dynamic_rotate %0 by %c1_i32 dim 1 : vector<8x128xf32>, i32 -> vector<8x128xf32>
    %c0_1 = arith.constant 0 : index
    %c0_2 = arith.constant 0 : index
    %2 = vector.load %arg1[%c0_1, %c0_2] : memref<8x128xf32, #tpu.memory_space<vmem>>, vector<8x128xf32>
    tpu.vector_store %arg1[%c0_1, %c0_2], %1 {strides = array<i32>} : memref<8x128xf32, #tpu.memory_space<vmem>>, vector<8x128xf32>,
    return
  }
}

module attributes {stable_mosaic.version = 11 : i64} {
  func.func @_block_kernel(%arg0: i32, %arg1: memref<1x8x768xf32, #tpu.memory_space<vmem>>, %arg2: memref<1x768xf32, #tpu.memory_space<vmem>>, %arg3: memref<8x9xf32, #tpu.memory_space<vmem>>, %arg4: memref<16x8xf32, #tpu.memory_space<vmem>>, %arg5: memref<16x1xf32, #tpu.memory_space<vmem>>, %arg6: memref<16x9xf32, #tpu.memory_space<vmem>>, %arg7: memref<16x16xf32, #tpu.memory_space<vmem>>, %arg8: memref<16x1xf32, #tpu.memory_space<vmem>>, %arg9: memref<16x9xf32, #tpu.memory_space<vmem>>, %arg10: memref<16x16xf32, #tpu.memory_space<vmem>>, %arg11: memref<16x1xf32, #tpu.memory_space<vmem>>, %arg12: memref<16x8xf32, #tpu.memory_space<vmem>>, %arg13: memref<16x1xf32, #tpu.memory_space<vmem>>, %arg14: memref<1x16x768xf32, #tpu.memory_space<vmem>>) attributes {dimension_semantics = [#tpu.dimension_semantics<parallel>], iteration_bounds = array<i64: 1>, scalar_prefetch = 0 : i64, scratch_operands = 0 : i64, tpu.core_type = #tpu.core_type<tc>, window_params = [{transform_indices = @transform_0, window_bounds = array<i64: 1, 8, 768>}, {pipeline_mode = #tpu.pipeline_mode<synchronous>, transform_indices = @transform_1, window_bounds = array<i64: 1, 768>}, {pipeline_mode = #tpu.pipeline_mode<synchronous>, transform_indices = @transform_2, window_bounds = array<i64: 8, 9>}, {pipeline_mode = #tpu.pipeline_mode<synchronous>, transform_indices = @transform_3, window_bounds = array<i64: 16, 8>}, {pipeline_mode = #tpu.pipeline_mode<synchronous>, transform_indices = @transform_4, window_bounds = array<i64: 16, 1>}, {pipeline_mode = #tpu.pipeline_mode<synchronous>, transform_indices = @transform_5, window_bounds = array<i64: 16, 9>}, {pipeline_mode = #tpu.pipeline_mode<synchronous>, transform_indices = @transform_6, window_bounds = array<i64: 16, 16>}, {pipeline_mode = #tpu.pipeline_mode<synchronous>, transform_indices = @transform_7, window_bounds = array<i64: 16, 1>}, {pipeline_mode = #tpu.pipeline_mode<synchronous>, transform_indices = @transform_8, window_bounds = array<i64: 16, 9>}, {pipeline_mode = #tpu.pipeline_mode<synchronous>, transform_indices = @transform_9, window_bounds = array<i64: 16, 16>}, {pipeline_mode = #tpu.pipeline_mode<synchronous>, transform_indices = @transform_10, window_bounds = array<i64: 16, 1>}, {pipeline_mode = #tpu.pipeline_mode<synchronous>, transform_indices = @transform_11, window_bounds = array<i64: 16, 8>}, {pipeline_mode = #tpu.pipeline_mode<synchronous>, transform_indices = @transform_12, window_bounds = array<i64: 16, 1>}, {transform_indices = @transform_13, window_bounds = array<i64: 1, 16, 768>}]} {
    %c0 = arith.constant 0 : index
    %c0_0 = arith.constant 0 : index
    %c0_1 = arith.constant 0 : index
    %0 = vector.load %arg1[%c0, %c0_0, %c0_1] : memref<1x8x768xf32, #tpu.memory_space<vmem>>, vector<1x8x768xf32>
    %1 = vector.shape_cast %0 : vector<1x8x768xf32> to vector<8x768xf32>
    %c0_2 = arith.constant 0 : index
    %c0_3 = arith.constant 0 : index
    %2 = vector.load %arg2[%c0_2, %c0_3] : memref<1x768xf32, #tpu.memory_space<vmem>>, vector<1x768xf32>
    %c1_i32 = arith.constant 1 : i32
    %3 = tpu.dynamic_rotate %1 by %c1_i32 dim 1 : vector<8x768xf32>, i32 -> vector<8x768xf32>
    %c767_i32 = arith.constant 767 : i32
    %4 = tpu.dynamic_rotate %1 by %c767_i32 dim 1 : vector<8x768xf32>, i32 -> vector<8x768xf32>
    %c0_4 = arith.constant 0 : index
    %c0_5 = arith.constant 0 : index
    %5 = vector.load %arg3[%c0_4, %c0_5] : memref<8x9xf32, #tpu.memory_space<vmem>>, vector<8x1xf32>
    %6 = vector.broadcast %5 : vector<8x1xf32> to vector<8x768xf32>
    %7 = arith.mulf %6, %3 : vector<8x768xf32>
    %c0_6 = arith.constant 0 : index
    %c1 = arith.constant 1 : index
    %8 = vector.load %arg3[%c0_6, %c1] : memref<8x9xf32, #tpu.memory_space<vmem>>, vector<8x1xf32>
    %9 = vector.broadcast %8 : vector<8x1xf32> to vector<8x768xf32>
    %10 = arith.mulf %9, %1 : vector<8x768xf32>
    %11 = arith.addf %7, %10 : vector<8x768xf32>
    %c0_7 = arith.constant 0 : index
    %c2 = arith.constant 2 : index
    %12 = vector.load %arg3[%c0_7, %c2] : memref<8x9xf32, #tpu.memory_space<vmem>>, vector<8x1xf32>
    %13 = vector.broadcast %12 : vector<8x1xf32> to vector<8x768xf32>
    %14 = arith.mulf %13, %4 : vector<8x768xf32>
    %15 = arith.addf %11, %14 : vector<8x768xf32>
    %c0_8 = arith.constant 0 : index
    %c3 = arith.constant 3 : index
    %16 = vector.load %arg3[%c0_8, %c3] : memref<8x9xf32, #tpu.memory_space<vmem>>, vector<8x1xf32>
    %17 = vector.broadcast %16 : vector<8x1xf32> to vector<8x768xf32>
    %18 = arith.mulf %17, %3 : vector<8x768xf32>
    %c0_9 = arith.constant 0 : index
    %c4 = arith.constant 4 : index
    %19 = vector.load %arg3[%c0_9, %c4] : memref<8x9xf32, #tpu.memory_space<vmem>>, vector<8x1xf32>
    %20 = vector.broadcast %19 : vector<8x1xf32> to vector<8x768xf32>
    %21 = arith.mulf %20, %1 : vector<8x768xf32>
    %22 = arith.addf %18, %21 : vector<8x768xf32>
    %c0_10 = arith.constant 0 : index
    %c5 = arith.constant 5 : index
    %23 = vector.load %arg3[%c0_10, %c5] : memref<8x9xf32, #tpu.memory_space<vmem>>, vector<8x1xf32>
    %24 = vector.broadcast %23 : vector<8x1xf32> to vector<8x768xf32>
    %25 = arith.mulf %24, %4 : vector<8x768xf32>
    %26 = arith.addf %22, %25 : vector<8x768xf32>
    %c0_11 = arith.constant 0 : index
    %c6 = arith.constant 6 : index
    %27 = vector.load %arg3[%c0_11, %c6] : memref<8x9xf32, #tpu.memory_space<vmem>>, vector<8x1xf32>
    %28 = vector.broadcast %27 : vector<8x1xf32> to vector<8x768xf32>
    %29 = arith.mulf %28, %3 : vector<8x768xf32>
    %c0_12 = arith.constant 0 : index
    %c7 = arith.constant 7 : index
    %30 = vector.load %arg3[%c0_12, %c7] : memref<8x9xf32, #tpu.memory_space<vmem>>, vector<8x1xf32>
    %31 = vector.broadcast %30 : vector<8x1xf32> to vector<8x768xf32>
    %32 = arith.mulf %31, %1 : vector<8x768xf32>
    %33 = arith.addf %29, %32 : vector<8x768xf32>
    %c0_13 = arith.constant 0 : index
    %c8 = arith.constant 8 : index
    %34 = vector.load %arg3[%c0_13, %c8] : memref<8x9xf32, #tpu.memory_space<vmem>>, vector<8x1xf32>
    %35 = vector.broadcast %34 : vector<8x1xf32> to vector<8x768xf32>
    %36 = arith.mulf %35, %4 : vector<8x768xf32>
    %37 = arith.addf %33, %36 : vector<8x768xf32>
    %c18_i32 = arith.constant 18 : i32
    %38 = tpu.dynamic_rotate %15 by %c18_i32 dim 1 : vector<8x768xf32>, i32 -> vector<8x768xf32>
    %39 = arith.addf %38, %26 : vector<8x768xf32>
    %c750_i32 = arith.constant 750 : i32
    %40 = tpu.dynamic_rotate %37 by %c750_i32 dim 1 : vector<8x768xf32>, i32 -> vector<8x768xf32>
    %41 = arith.addf %39, %40 : vector<8x768xf32>
    %c0_14 = arith.constant 0 : index
    %c0_15 = arith.constant 0 : index
    %42 = vector.load %arg4[%c0_14, %c0_15] : memref<16x8xf32, #tpu.memory_space<vmem>>, vector<16x8xf32>
    %cst = arith.constant dense<0.000000e+00> : vector<16x768xf32>
    %43 = tpu.matmul %42, %41, %cst {dimension_numbers = #tpu.dot_dimension_numbers<[1], [0], [0], [1], [0, 0, 1, 1], [], []>} : vector<16x8xf32>, vector<8x768xf32>, vector<16x768xf32> -> vector<16x768xf32>
    %c0_16 = arith.constant 0 : index
    %c0_17 = arith.constant 0 : index
    %44 = vector.load %arg5[%c0_16, %c0_17] : memref<16x1xf32, #tpu.memory_space<vmem>>, vector<16x1xf32>
    %45 = vector.broadcast %44 : vector<16x1xf32> to vector<16x768xf32>
    %46 = arith.addf %43, %45 : vector<16x768xf32>
    %47 = vector.broadcast %2 : vector<1x768xf32> to vector<16x768xf32>
    %48 = arith.mulf %46, %47 : vector<16x768xf32>
    %cst_18 = arith.constant 0.000000e+00 : f32
    %49 = vector.broadcast %cst_18 : f32 to vector<16x768xf32>
    %50 = arith.maximumf %48, %49 : vector<16x768xf32>
    %c1_i32_19 = arith.constant 1 : i32
    %51 = tpu.dynamic_rotate %50 by %c1_i32_19 dim 1 : vector<16x768xf32>, i32 -> vector<16x768xf32>
    %c767_i32_20 = arith.constant 767 : i32
    %52 = tpu.dynamic_rotate %50 by %c767_i32_20 dim 1 : vector<16x768xf32>, i32 -> vector<16x768xf32>
    %c0_21 = arith.constant 0 : index
    %c0_22 = arith.constant 0 : index
    %53 = vector.load %arg6[%c0_21, %c0_22] : memref<16x9xf32, #tpu.memory_space<vmem>>, vector<16x1xf32>
    %54 = vector.broadcast %53 : vector<16x1xf32> to vector<16x768xf32>
    %55 = arith.mulf %54, %51 : vector<16x768xf32>
    %c0_23 = arith.constant 0 : index
    %c1_24 = arith.constant 1 : index
    %56 = vector.load %arg6[%c0_23, %c1_24] : memref<16x9xf32, #tpu.memory_space<vmem>>, vector<16x1xf32>
    %57 = vector.broadcast %56 : vector<16x1xf32> to vector<16x768xf32>
    %58 = arith.mulf %57, %50 : vector<16x768xf32>
    %59 = arith.addf %55, %58 : vector<16x768xf32>
    %c0_25 = arith.constant 0 : index
    %c2_26 = arith.constant 2 : index
    %60 = vector.load %arg6[%c0_25, %c2_26] : memref<16x9xf32, #tpu.memory_space<vmem>>, vector<16x1xf32>
    %61 = vector.broadcast %60 : vector<16x1xf32> to vector<16x768xf32>
    %62 = arith.mulf %61, %52 : vector<16x768xf32>
    %63 = arith.addf %59, %62 : vector<16x768xf32>
    %c0_27 = arith.constant 0 : index
    %c3_28 = arith.constant 3 : index
    %64 = vector.load %arg6[%c0_27, %c3_28] : memref<16x9xf32, #tpu.memory_space<vmem>>, vector<16x1xf32>
    %65 = vector.broadcast %64 : vector<16x1xf32> to vector<16x768xf32>
    %66 = arith.mulf %65, %51 : vector<16x768xf32>
    %c0_29 = arith.constant 0 : index
    %c4_30 = arith.constant 4 : index
    %67 = vector.load %arg6[%c0_29, %c4_30] : memref<16x9xf32, #tpu.memory_space<vmem>>, vector<16x1xf32>
    %68 = vector.broadcast %67 : vector<16x1xf32> to vector<16x768xf32>
    %69 = arith.mulf %68, %50 : vector<16x768xf32>
    %70 = arith.addf %66, %69 : vector<16x768xf32>
    %c0_31 = arith.constant 0 : index
    %c5_32 = arith.constant 5 : index
    %71 = vector.load %arg6[%c0_31, %c5_32] : memref<16x9xf32, #tpu.memory_space<vmem>>, vector<16x1xf32>
    %72 = vector.broadcast %71 : vector<16x1xf32> to vector<16x768xf32>
    %73 = arith.mulf %72, %52 : vector<16x768xf32>
    %74 = arith.addf %70, %73 : vector<16x768xf32>
    %c0_33 = arith.constant 0 : index
    %c6_34 = arith.constant 6 : index
    %75 = vector.load %arg6[%c0_33, %c6_34] : memref<16x9xf32, #tpu.memory_space<vmem>>, vector<16x1xf32>
    %76 = vector.broadcast %75 : vector<16x1xf32> to vector<16x768xf32>
    %77 = arith.mulf %76, %51 : vector<16x768xf32>
    %c0_35 = arith.constant 0 : index
    %c7_36 = arith.constant 7 : index
    %78 = vector.load %arg6[%c0_35, %c7_36] : memref<16x9xf32, #tpu.memory_space<vmem>>, vector<16x1xf32>
    %79 = vector.broadcast %78 : vector<16x1xf32> to vector<16x768xf32>
    %80 = arith.mulf %79, %50 : vector<16x768xf32>
    %81 = arith.addf %77, %80 : vector<16x768xf32>
    %c0_37 = arith.constant 0 : index
    %c8_38 = arith.constant 8 : index
    %82 = vector.load %arg6[%c0_37, %c8_38] : memref<16x9xf32, #tpu.memory_space<vmem>>, vector<16x1xf32>
    %83 = vector.broadcast %82 : vector<16x1xf32> to vector<16x768xf32>
    %84 = arith.mulf %83, %52 : vector<16x768xf32>
    %85 = arith.addf %81, %84 : vector<16x768xf32>
    %c18_i32_39 = arith.constant 18 : i32
    %86 = tpu.dynamic_rotate %63 by %c18_i32_39 dim 1 : vector<16x768xf32>, i32 -> vector<16x768xf32>
    %87 = arith.addf %86, %74 : vector<16x768xf32>
    %c750_i32_40 = arith.constant 750 : i32
    %88 = tpu.dynamic_rotate %85 by %c750_i32_40 dim 1 : vector<16x768xf32>, i32 -> vector<16x768xf32>
    %89 = arith.addf %87, %88 : vector<16x768xf32>
    %c0_41 = arith.constant 0 : index
    %c0_42 = arith.constant 0 : index
    %90 = vector.load %arg7[%c0_41, %c0_42] : memref<16x16xf32, #tpu.memory_space<vmem>>, vector<16x16xf32>
    %cst_43 = arith.constant dense<0.000000e+00> : vector<16x768xf32>
    %91 = tpu.matmul %90, %89, %cst_43 {dimension_numbers = #tpu.dot_dimension_numbers<[1], [0], [0], [1], [0, 0, 1, 1], [], []>} : vector<16x16xf32>, vector<16x768xf32>, vector<16x768xf32> -> vector<16x768xf32>
    %c0_44 = arith.constant 0 : index
    %c0_45 = arith.constant 0 : index
    %92 = vector.load %arg8[%c0_44, %c0_45] : memref<16x1xf32, #tpu.memory_space<vmem>>, vector<16x1xf32>
    %93 = vector.broadcast %92 : vector<16x1xf32> to vector<16x768xf32>
    %94 = arith.addf %91, %93 : vector<16x768xf32>
    %cst_46 = arith.constant 0.000000e+00 : f32
    %95 = vector.broadcast %cst_46 : f32 to vector<16x768xf32>
    %96 = arith.maximumf %94, %95 : vector<16x768xf32>
    %97 = vector.broadcast %2 : vector<1x768xf32> to vector<16x768xf32>
    %98 = arith.mulf %96, %97 : vector<16x768xf32>
    %cst_47 = arith.constant 0.000000e+00 : f32
    %99 = vector.broadcast %cst_47 : f32 to vector<16x768xf32>
    %100 = arith.maximumf %98, %99 : vector<16x768xf32>
    %c1_i32_48 = arith.constant 1 : i32
    %101 = tpu.dynamic_rotate %100 by %c1_i32_48 dim 1 : vector<16x768xf32>, i32 -> vector<16x768xf32>
    %c767_i32_49 = arith.constant 767 : i32
    %102 = tpu.dynamic_rotate %100 by %c767_i32_49 dim 1 : vector<16x768xf32>, i32 -> vector<16x768xf32>
    %c0_50 = arith.constant 0 : index
    %c0_51 = arith.constant 0 : index
    %103 = vector.load %arg9[%c0_50, %c0_51] : memref<16x9xf32, #tpu.memory_space<vmem>>, vector<16x1xf32>
    %104 = vector.broadcast %103 : vector<16x1xf32> to vector<16x768xf32>
    %105 = arith.mulf %104, %101 : vector<16x768xf32>
    %c0_52 = arith.constant 0 : index
    %c1_53 = arith.constant 1 : index
    %106 = vector.load %arg9[%c0_52, %c1_53] : memref<16x9xf32, #tpu.memory_space<vmem>>, vector<16x1xf32>
    %107 = vector.broadcast %106 : vector<16x1xf32> to vector<16x768xf32>
    %108 = arith.mulf %107, %100 : vector<16x768xf32>
    %109 = arith.addf %105, %108 : vector<16x768xf32>
    %c0_54 = arith.constant 0 : index
    %c2_55 = arith.constant 2 : index
    %110 = vector.load %arg9[%c0_54, %c2_55] : memref<16x9xf32, #tpu.memory_space<vmem>>, vector<16x1xf32>
    %111 = vector.broadcast %110 : vector<16x1xf32> to vector<16x768xf32>
    %112 = arith.mulf %111, %102 : vector<16x768xf32>
    %113 = arith.addf %109, %112 : vector<16x768xf32>
    %c0_56 = arith.constant 0 : index
    %c3_57 = arith.constant 3 : index
    %114 = vector.load %arg9[%c0_56, %c3_57] : memref<16x9xf32, #tpu.memory_space<vmem>>, vector<16x1xf32>
    %115 = vector.broadcast %114 : vector<16x1xf32> to vector<16x768xf32>
    %116 = arith.mulf %115, %101 : vector<16x768xf32>
    %c0_58 = arith.constant 0 : index
    %c4_59 = arith.constant 4 : index
    %117 = vector.load %arg9[%c0_58, %c4_59] : memref<16x9xf32, #tpu.memory_space<vmem>>, vector<16x1xf32>
    %118 = vector.broadcast %117 : vector<16x1xf32> to vector<16x768xf32>
    %119 = arith.mulf %118, %100 : vector<16x768xf32>
    %120 = arith.addf %116, %119 : vector<16x768xf32>
    %c0_60 = arith.constant 0 : index
    %c5_61 = arith.constant 5 : index
    %121 = vector.load %arg9[%c0_60, %c5_61] : memref<16x9xf32, #tpu.memory_space<vmem>>, vector<16x1xf32>
    %122 = vector.broadcast %121 : vector<16x1xf32> to vector<16x768xf32>
    %123 = arith.mulf %122, %102 : vector<16x768xf32>
    %124 = arith.addf %120, %123 : vector<16x768xf32>
    %c0_62 = arith.constant 0 : index
    %c6_63 = arith.constant 6 : index
    %125 = vector.load %arg9[%c0_62, %c6_63] : memref<16x9xf32, #tpu.memory_space<vmem>>, vector<16x1xf32>
    %126 = vector.broadcast %125 : vector<16x1xf32> to vector<16x768xf32>
    %127 = arith.mulf %126, %101 : vector<16x768xf32>
    %c0_64 = arith.constant 0 : index
    %c7_65 = arith.constant 7 : index
    %128 = vector.load %arg9[%c0_64, %c7_65] : memref<16x9xf32, #tpu.memory_space<vmem>>, vector<16x1xf32>
    %129 = vector.broadcast %128 : vector<16x1xf32> to vector<16x768xf32>
    %130 = arith.mulf %129, %100 : vector<16x768xf32>
    %131 = arith.addf %127, %130 : vector<16x768xf32>
    %c0_66 = arith.constant 0 : index
    %c8_67 = arith.constant 8 : index
    %132 = vector.load %arg9[%c0_66, %c8_67] : memref<16x9xf32, #tpu.memory_space<vmem>>, vector<16x1xf32>
    %133 = vector.broadcast %132 : vector<16x1xf32> to vector<16x768xf32>
    %134 = arith.mulf %133, %102 : vector<16x768xf32>
    %135 = arith.addf %131, %134 : vector<16x768xf32>
    %c18_i32_68 = arith.constant 18 : i32
    %136 = tpu.dynamic_rotate %113 by %c18_i32_68 dim 1 : vector<16x768xf32>, i32 -> vector<16x768xf32>
    %137 = arith.addf %136, %124 : vector<16x768xf32>
    %c750_i32_69 = arith.constant 750 : i32
    %138 = tpu.dynamic_rotate %135 by %c750_i32_69 dim 1 : vector<16x768xf32>, i32 -> vector<16x768xf32>
    %139 = arith.addf %137, %138 : vector<16x768xf32>
    %c0_70 = arith.constant 0 : index
    %c0_71 = arith.constant 0 : index
    %140 = vector.load %arg10[%c0_70, %c0_71] : memref<16x16xf32, #tpu.memory_space<vmem>>, vector<16x16xf32>
    %cst_72 = arith.constant dense<0.000000e+00> : vector<16x768xf32>
    %141 = tpu.matmul %140, %139, %cst_72 {dimension_numbers = #tpu.dot_dimension_numbers<[1], [0], [0], [1], [0, 0, 1, 1], [], []>} : vector<16x16xf32>, vector<16x768xf32>, vector<16x768xf32> -> vector<16x768xf32>
    %c0_73 = arith.constant 0 : index
    %c0_74 = arith.constant 0 : index
    %142 = vector.load %arg11[%c0_73, %c0_74] : memref<16x1xf32, #tpu.memory_space<vmem>>, vector<16x1xf32>
    %143 = vector.broadcast %142 : vector<16x1xf32> to vector<16x768xf32>
    %144 = arith.addf %141, %143 : vector<16x768xf32>
    %cst_75 = arith.constant 0.000000e+00 : f32
    %145 = vector.broadcast %cst_75 : f32 to vector<16x768xf32>
    %146 = arith.maximumf %144, %145 : vector<16x768xf32>
    %c0_76 = arith.constant 0 : index
    %c0_77 = arith.constant 0 : index
    %147 = vector.load %arg12[%c0_76, %c0_77] : memref<16x8xf32, #tpu.memory_space<vmem>>, vector<16x8xf32>
    %cst_78 = arith.constant dense<0.000000e+00> : vector<16x768xf32>
    %148 = tpu.matmul %147, %1, %cst_78 {dimension_numbers = #tpu.dot_dimension_numbers<[1], [0], [0], [1], [0, 0, 1, 1], [], []>} : vector<16x8xf32>, vector<8x768xf32>, vector<16x768xf32> -> vector<16x768xf32>
    %c0_79 = arith.constant 0 : index
    %c0_80 = arith.constant 0 : index
    %149 = vector.load %arg13[%c0_79, %c0_80] : memref<16x1xf32, #tpu.memory_space<vmem>>, vector<16x1xf32>
    %150 = vector.broadcast %149 : vector<16x1xf32> to vector<16x768xf32>
    %151 = arith.addf %148, %150 : vector<16x768xf32>
    %152 = arith.addf %146, %151 : vector<16x768xf32>
    %c0_81 = arith.constant 0 : index
    %c0_82 = arith.constant 0 : index
    %c0_83 = arith.constant 0 : index
    %153 = vector.load %arg14[%c0_81, %c0_82, %c0_83] : memref<1x16x768xf32, #tpu.memory_space<vmem>>, vector<1x16x768xf32>
    %154 = vector.shape_cast %153 : vector<1x16x768xf32> to vector<16x768xf32>
    %155 = vector.shape_cast %152 : vector<16x768xf32> to vector<1x16x768xf32>
    tpu.vector_store %arg14[%c0_81, %c0_82, %c0_83], %155 {strides = array<i32>} : memref<1x16x768xf32, #tpu.memory_space<vmem>>, vector<1x16x768xf32>,
    return
  }
  func.func @transform_0(%arg0: i32) -> (i32, i32, i32) {
    %c0_i32 = arith.constant 0 : i32
    %c0_i32_0 = arith.constant 0 : i32
    %c0_i32_1 = arith.constant 0 : i32
    return %arg0, %c0_i32, %c0_i32_0 : i32, i32, i32
  }
  func.func @transform_1(%arg0: i32) -> (i32, i32) {
    %c0_i32 = arith.constant 0 : i32
    %c0_i32_0 = arith.constant 0 : i32
    %c0_i32_1 = arith.constant 0 : i32
    return %c0_i32, %c0_i32_0 : i32, i32
  }
  func.func @transform_2(%arg0: i32) -> (i32, i32) {
    %c0_i32 = arith.constant 0 : i32
    %c0_i32_0 = arith.constant 0 : i32
    %c0_i32_1 = arith.constant 0 : i32
    return %c0_i32, %c0_i32_0 : i32, i32
  }
  func.func @transform_3(%arg0: i32) -> (i32, i32) {
    %c0_i32 = arith.constant 0 : i32
    %c0_i32_0 = arith.constant 0 : i32
    %c0_i32_1 = arith.constant 0 : i32
    return %c0_i32, %c0_i32_0 : i32, i32
  }
  func.func @transform_4(%arg0: i32) -> (i32, i32) {
    %c0_i32 = arith.constant 0 : i32
    %c0_i32_0 = arith.constant 0 : i32
    %c0_i32_1 = arith.constant 0 : i32
    return %c0_i32, %c0_i32_0 : i32, i32
  }
  func.func @transform_5(%arg0: i32) -> (i32, i32) {
    %c0_i32 = arith.constant 0 : i32
    %c0_i32_0 = arith.constant 0 : i32
    %c0_i32_1 = arith.constant 0 : i32
    return %c0_i32, %c0_i32_0 : i32, i32
  }
  func.func @transform_6(%arg0: i32) -> (i32, i32) {
    %c0_i32 = arith.constant 0 : i32
    %c0_i32_0 = arith.constant 0 : i32
    %c0_i32_1 = arith.constant 0 : i32
    return %c0_i32, %c0_i32_0 : i32, i32
  }
  func.func @transform_7(%arg0: i32) -> (i32, i32) {
    %c0_i32 = arith.constant 0 : i32
    %c0_i32_0 = arith.constant 0 : i32
    %c0_i32_1 = arith.constant 0 : i32
    return %c0_i32, %c0_i32_0 : i32, i32
  }
  func.func @transform_8(%arg0: i32) -> (i32, i32) {
    %c0_i32 = arith.constant 0 : i32
    %c0_i32_0 = arith.constant 0 : i32
    %c0_i32_1 = arith.constant 0 : i32
    return %c0_i32, %c0_i32_0 : i32, i32
  }
  func.func @transform_9(%arg0: i32) -> (i32, i32) {
    %c0_i32 = arith.constant 0 : i32
    %c0_i32_0 = arith.constant 0 : i32
    %c0_i32_1 = arith.constant 0 : i32
    return %c0_i32, %c0_i32_0 : i32, i32
  }
  func.func @transform_10(%arg0: i32) -> (i32, i32) {
    %c0_i32 = arith.constant 0 : i32
    %c0_i32_0 = arith.constant 0 : i32
    %c0_i32_1 = arith.constant 0 : i32
    return %c0_i32, %c0_i32_0 : i32, i32
  }
  func.func @transform_11(%arg0: i32) -> (i32, i32) {
    %c0_i32 = arith.constant 0 : i32
    %c0_i32_0 = arith.constant 0 : i32
    %c0_i32_1 = arith.constant 0 : i32
    return %c0_i32, %c0_i32_0 : i32, i32
  }
  func.func @transform_12(%arg0: i32) -> (i32, i32) {
    %c0_i32 = arith.constant 0 : i32
    %c0_i32_0 = arith.constant 0 : i32
    %c0_i32_1 = arith.constant 0 : i32
    return %c0_i32, %c0_i32_0 : i32, i32
  }
  func.func @transform_13(%arg0: i32) -> (i32, i32, i32) {
    %c0_i32 = arith.constant 0 : i32
    %c0_i32_0 = arith.constant 0 : i32
    %c0_i32_1 = arith.constant 0 : i32
    return %arg0, %c0_i32, %c0_i32_0 : i32, i32, i32
  }
}

module attributes {stable_mosaic.version = 11 : i64} {
  func.func @_block_kernel(%arg0: i32, %arg1: memref<1x8x768xf32, #tpu.memory_space<vmem>>, %arg2: memref<1x768xf32, #tpu.memory_space<vmem>>, %arg3: memref<8x9xf32, #tpu.memory_space<vmem>>, %arg4: memref<16x8xf32, #tpu.memory_space<vmem>>, %arg5: memref<16x1xf32, #tpu.memory_space<vmem>>, %arg6: memref<16x9xf32, #tpu.memory_space<vmem>>, %arg7: memref<16x16xf32, #tpu.memory_space<vmem>>, %arg8: memref<16x1xf32, #tpu.memory_space<vmem>>, %arg9: memref<16x9xf32, #tpu.memory_space<vmem>>, %arg10: memref<16x16xf32, #tpu.memory_space<vmem>>, %arg11: memref<16x1xf32, #tpu.memory_space<vmem>>, %arg12: memref<16x8xf32, #tpu.memory_space<vmem>>, %arg13: memref<16x1xf32, #tpu.memory_space<vmem>>, %arg14: memref<1x16x768xf32, #tpu.memory_space<vmem>>) attributes {dimension_semantics = [#tpu.dimension_semantics<parallel>], iteration_bounds = array<i64: 1>, scalar_prefetch = 0 : i64, scratch_operands = 0 : i64, tpu.core_type = #tpu.core_type<tc>, window_params = [{transform_indices = @transform_0, window_bounds = array<i64: 1, 8, 768>}, {pipeline_mode = #tpu.pipeline_mode<synchronous>, transform_indices = @transform_1, window_bounds = array<i64: 1, 768>}, {pipeline_mode = #tpu.pipeline_mode<synchronous>, transform_indices = @transform_2, window_bounds = array<i64: 8, 9>}, {pipeline_mode = #tpu.pipeline_mode<synchronous>, transform_indices = @transform_3, window_bounds = array<i64: 16, 8>}, {pipeline_mode = #tpu.pipeline_mode<synchronous>, transform_indices = @transform_4, window_bounds = array<i64: 16, 1>}, {pipeline_mode = #tpu.pipeline_mode<synchronous>, transform_indices = @transform_5, window_bounds = array<i64: 16, 9>}, {pipeline_mode = #tpu.pipeline_mode<synchronous>, transform_indices = @transform_6, window_bounds = array<i64: 16, 16>}, {pipeline_mode = #tpu.pipeline_mode<synchronous>, transform_indices = @transform_7, window_bounds = array<i64: 16, 1>}, {pipeline_mode = #tpu.pipeline_mode<synchronous>, transform_indices = @transform_8, window_bounds = array<i64: 16, 9>}, {pipeline_mode = #tpu.pipeline_mode<synchronous>, transform_indices = @transform_9, window_bounds = array<i64: 16, 16>}, {pipeline_mode = #tpu.pipeline_mode<synchronous>, transform_indices = @transform_10, window_bounds = array<i64: 16, 1>}, {pipeline_mode = #tpu.pipeline_mode<synchronous>, transform_indices = @transform_11, window_bounds = array<i64: 16, 8>}, {pipeline_mode = #tpu.pipeline_mode<synchronous>, transform_indices = @transform_12, window_bounds = array<i64: 16, 1>}, {transform_indices = @transform_13, window_bounds = array<i64: 1, 16, 768>}]} {
    %c0 = arith.constant 0 : index
    %c0_0 = arith.constant 0 : index
    %c0_1 = arith.constant 0 : index
    %0 = vector.load %arg1[%c0, %c0_0, %c0_1] : memref<1x8x768xf32, #tpu.memory_space<vmem>>, vector<1x8x768xf32>
    %1 = vector.shape_cast %0 : vector<1x8x768xf32> to vector<8x768xf32>
    %c0_2 = arith.constant 0 : index
    %c0_3 = arith.constant 0 : index
    %2 = vector.load %arg2[%c0_2, %c0_3] : memref<1x768xf32, #tpu.memory_space<vmem>>, vector<1x768xf32>
    %c1_i32 = arith.constant 1 : i32
    %3 = tpu.dynamic_rotate %1 by %c1_i32 dim 1 : vector<8x768xf32>, i32 -> vector<8x768xf32>
    %c767_i32 = arith.constant 767 : i32
    %4 = tpu.dynamic_rotate %1 by %c767_i32 dim 1 : vector<8x768xf32>, i32 -> vector<8x768xf32>
    %c0_4 = arith.constant 0 : index
    %c0_5 = arith.constant 0 : index
    %5 = vector.load %arg3[%c0_4, %c0_5] : memref<8x9xf32, #tpu.memory_space<vmem>>, vector<8x1xf32>
    %6 = vector.broadcast %5 : vector<8x1xf32> to vector<8x768xf32>
    %7 = arith.mulf %6, %3 : vector<8x768xf32>
    %c0_6 = arith.constant 0 : index
    %c1 = arith.constant 1 : index
    %8 = vector.load %arg3[%c0_6, %c1] : memref<8x9xf32, #tpu.memory_space<vmem>>, vector<8x1xf32>
    %9 = vector.broadcast %8 : vector<8x1xf32> to vector<8x768xf32>
    %10 = arith.mulf %9, %1 : vector<8x768xf32>
    %11 = arith.addf %7, %10 : vector<8x768xf32>
    %c0_7 = arith.constant 0 : index
    %c2 = arith.constant 2 : index
    %12 = vector.load %arg3[%c0_7, %c2] : memref<8x9xf32, #tpu.memory_space<vmem>>, vector<8x1xf32>
    %13 = vector.broadcast %12 : vector<8x1xf32> to vector<8x768xf32>
    %14 = arith.mulf %13, %4 : vector<8x768xf32>
    %15 = arith.addf %11, %14 : vector<8x768xf32>
    %c0_8 = arith.constant 0 : index
    %c3 = arith.constant 3 : index
    %16 = vector.load %arg3[%c0_8, %c3] : memref<8x9xf32, #tpu.memory_space<vmem>>, vector<8x1xf32>
    %17 = vector.broadcast %16 : vector<8x1xf32> to vector<8x768xf32>
    %18 = arith.mulf %17, %3 : vector<8x768xf32>
    %c0_9 = arith.constant 0 : index
    %c4 = arith.constant 4 : index
    %19 = vector.load %arg3[%c0_9, %c4] : memref<8x9xf32, #tpu.memory_space<vmem>>, vector<8x1xf32>
    %20 = vector.broadcast %19 : vector<8x1xf32> to vector<8x768xf32>
    %21 = arith.mulf %20, %1 : vector<8x768xf32>
    %22 = arith.addf %18, %21 : vector<8x768xf32>
    %c0_10 = arith.constant 0 : index
    %c5 = arith.constant 5 : index
    %23 = vector.load %arg3[%c0_10, %c5] : memref<8x9xf32, #tpu.memory_space<vmem>>, vector<8x1xf32>
    %24 = vector.broadcast %23 : vector<8x1xf32> to vector<8x768xf32>
    %25 = arith.mulf %24, %4 : vector<8x768xf32>
    %26 = arith.addf %22, %25 : vector<8x768xf32>
    %c0_11 = arith.constant 0 : index
    %c6 = arith.constant 6 : index
    %27 = vector.load %arg3[%c0_11, %c6] : memref<8x9xf32, #tpu.memory_space<vmem>>, vector<8x1xf32>
    %28 = vector.broadcast %27 : vector<8x1xf32> to vector<8x768xf32>
    %29 = arith.mulf %28, %3 : vector<8x768xf32>
    %c0_12 = arith.constant 0 : index
    %c7 = arith.constant 7 : index
    %30 = vector.load %arg3[%c0_12, %c7] : memref<8x9xf32, #tpu.memory_space<vmem>>, vector<8x1xf32>
    %31 = vector.broadcast %30 : vector<8x1xf32> to vector<8x768xf32>
    %32 = arith.mulf %31, %1 : vector<8x768xf32>
    %33 = arith.addf %29, %32 : vector<8x768xf32>
    %c0_13 = arith.constant 0 : index
    %c8 = arith.constant 8 : index
    %34 = vector.load %arg3[%c0_13, %c8] : memref<8x9xf32, #tpu.memory_space<vmem>>, vector<8x1xf32>
    %35 = vector.broadcast %34 : vector<8x1xf32> to vector<8x768xf32>
    %36 = arith.mulf %35, %4 : vector<8x768xf32>
    %37 = arith.addf %33, %36 : vector<8x768xf32>
    %c18_i32 = arith.constant 18 : i32
    %38 = tpu.dynamic_rotate %15 by %c18_i32 dim 1 : vector<8x768xf32>, i32 -> vector<8x768xf32>
    %39 = arith.addf %38, %26 : vector<8x768xf32>
    %c750_i32 = arith.constant 750 : i32
    %40 = tpu.dynamic_rotate %37 by %c750_i32 dim 1 : vector<8x768xf32>, i32 -> vector<8x768xf32>
    %41 = arith.addf %39, %40 : vector<8x768xf32>
    %c0_14 = arith.constant 0 : index
    %c0_15 = arith.constant 0 : index
    %42 = vector.load %arg4[%c0_14, %c0_15] : memref<16x8xf32, #tpu.memory_space<vmem>>, vector<16x8xf32>
    %cst = arith.constant dense<0.000000e+00> : vector<16x768xf32>
    %43 = tpu.matmul %42, %41, %cst {dimension_numbers = #tpu.dot_dimension_numbers<[1], [0], [0], [1], [0, 0, 1, 1], [], []>} : vector<16x8xf32>, vector<8x768xf32>, vector<16x768xf32> -> vector<16x768xf32>
    %c0_16 = arith.constant 0 : index
    %c0_17 = arith.constant 0 : index
    %44 = vector.load %arg5[%c0_16, %c0_17] : memref<16x1xf32, #tpu.memory_space<vmem>>, vector<16x1xf32>
    %45 = vector.broadcast %44 : vector<16x1xf32> to vector<16x768xf32>
    %46 = arith.addf %43, %45 : vector<16x768xf32>
    %47 = vector.broadcast %2 : vector<1x768xf32> to vector<16x768xf32>
    %48 = arith.mulf %46, %47 : vector<16x768xf32>
    %cst_18 = arith.constant 0.000000e+00 : f32
    %49 = vector.broadcast %cst_18 : f32 to vector<16x768xf32>
    %50 = arith.maximumf %48, %49 : vector<16x768xf32>
    %c1_i32_19 = arith.constant 1 : i32
    %51 = tpu.dynamic_rotate %50 by %c1_i32_19 dim 1 : vector<16x768xf32>, i32 -> vector<16x768xf32>
    %c767_i32_20 = arith.constant 767 : i32
    %52 = tpu.dynamic_rotate %50 by %c767_i32_20 dim 1 : vector<16x768xf32>, i32 -> vector<16x768xf32>
    %c0_21 = arith.constant 0 : index
    %c0_22 = arith.constant 0 : index
    %53 = vector.load %arg6[%c0_21, %c0_22] : memref<16x9xf32, #tpu.memory_space<vmem>>, vector<16x1xf32>
    %54 = vector.broadcast %53 : vector<16x1xf32> to vector<16x768xf32>
    %55 = arith.mulf %54, %51 : vector<16x768xf32>
    %c0_23 = arith.constant 0 : index
    %c1_24 = arith.constant 1 : index
    %56 = vector.load %arg6[%c0_23, %c1_24] : memref<16x9xf32, #tpu.memory_space<vmem>>, vector<16x1xf32>
    %57 = vector.broadcast %56 : vector<16x1xf32> to vector<16x768xf32>
    %58 = arith.mulf %57, %50 : vector<16x768xf32>
    %59 = arith.addf %55, %58 : vector<16x768xf32>
    %c0_25 = arith.constant 0 : index
    %c2_26 = arith.constant 2 : index
    %60 = vector.load %arg6[%c0_25, %c2_26] : memref<16x9xf32, #tpu.memory_space<vmem>>, vector<16x1xf32>
    %61 = vector.broadcast %60 : vector<16x1xf32> to vector<16x768xf32>
    %62 = arith.mulf %61, %52 : vector<16x768xf32>
    %63 = arith.addf %59, %62 : vector<16x768xf32>
    %c0_27 = arith.constant 0 : index
    %c3_28 = arith.constant 3 : index
    %64 = vector.load %arg6[%c0_27, %c3_28] : memref<16x9xf32, #tpu.memory_space<vmem>>, vector<16x1xf32>
    %65 = vector.broadcast %64 : vector<16x1xf32> to vector<16x768xf32>
    %66 = arith.mulf %65, %51 : vector<16x768xf32>
    %c0_29 = arith.constant 0 : index
    %c4_30 = arith.constant 4 : index
    %67 = vector.load %arg6[%c0_29, %c4_30] : memref<16x9xf32, #tpu.memory_space<vmem>>, vector<16x1xf32>
    %68 = vector.broadcast %67 : vector<16x1xf32> to vector<16x768xf32>
    %69 = arith.mulf %68, %50 : vector<16x768xf32>
    %70 = arith.addf %66, %69 : vector<16x768xf32>
    %c0_31 = arith.constant 0 : index
    %c5_32 = arith.constant 5 : index
    %71 = vector.load %arg6[%c0_31, %c5_32] : memref<16x9xf32, #tpu.memory_space<vmem>>, vector<16x1xf32>
    %72 = vector.broadcast %71 : vector<16x1xf32> to vector<16x768xf32>
    %73 = arith.mulf %72, %52 : vector<16x768xf32>
    %74 = arith.addf %70, %73 : vector<16x768xf32>
    %c0_33 = arith.constant 0 : index
    %c6_34 = arith.constant 6 : index
    %75 = vector.load %arg6[%c0_33, %c6_34] : memref<16x9xf32, #tpu.memory_space<vmem>>, vector<16x1xf32>
    %76 = vector.broadcast %75 : vector<16x1xf32> to vector<16x768xf32>
    %77 = arith.mulf %76, %51 : vector<16x768xf32>
    %c0_35 = arith.constant 0 : index
    %c7_36 = arith.constant 7 : index
    %78 = vector.load %arg6[%c0_35, %c7_36] : memref<16x9xf32, #tpu.memory_space<vmem>>, vector<16x1xf32>
    %79 = vector.broadcast %78 : vector<16x1xf32> to vector<16x768xf32>
    %80 = arith.mulf %79, %50 : vector<16x768xf32>
    %81 = arith.addf %77, %80 : vector<16x768xf32>
    %c0_37 = arith.constant 0 : index
    %c8_38 = arith.constant 8 : index
    %82 = vector.load %arg6[%c0_37, %c8_38] : memref<16x9xf32, #tpu.memory_space<vmem>>, vector<16x1xf32>
    %83 = vector.broadcast %82 : vector<16x1xf32> to vector<16x768xf32>
    %84 = arith.mulf %83, %52 : vector<16x768xf32>
    %85 = arith.addf %81, %84 : vector<16x768xf32>
    %c18_i32_39 = arith.constant 18 : i32
    %86 = tpu.dynamic_rotate %63 by %c18_i32_39 dim 1 : vector<16x768xf32>, i32 -> vector<16x768xf32>
    %87 = arith.addf %86, %74 : vector<16x768xf32>
    %c750_i32_40 = arith.constant 750 : i32
    %88 = tpu.dynamic_rotate %85 by %c750_i32_40 dim 1 : vector<16x768xf32>, i32 -> vector<16x768xf32>
    %89 = arith.addf %87, %88 : vector<16x768xf32>
    %c0_41 = arith.constant 0 : index
    %c0_42 = arith.constant 0 : index
    %90 = vector.load %arg7[%c0_41, %c0_42] : memref<16x16xf32, #tpu.memory_space<vmem>>, vector<16x16xf32>
    %cst_43 = arith.constant dense<0.000000e+00> : vector<16x768xf32>
    %91 = tpu.matmul %90, %89, %cst_43 {dimension_numbers = #tpu.dot_dimension_numbers<[1], [0], [0], [1], [0, 0, 1, 1], [], []>} : vector<16x16xf32>, vector<16x768xf32>, vector<16x768xf32> -> vector<16x768xf32>
    %c0_44 = arith.constant 0 : index
    %c0_45 = arith.constant 0 : index
    %92 = vector.load %arg8[%c0_44, %c0_45] : memref<16x1xf32, #tpu.memory_space<vmem>>, vector<16x1xf32>
    %93 = vector.broadcast %92 : vector<16x1xf32> to vector<16x768xf32>
    %94 = arith.addf %91, %93 : vector<16x768xf32>
    %cst_46 = arith.constant 0.000000e+00 : f32
    %95 = vector.broadcast %cst_46 : f32 to vector<16x768xf32>
    %96 = arith.maximumf %94, %95 : vector<16x768xf32>
    %97 = vector.broadcast %2 : vector<1x768xf32> to vector<16x768xf32>
    %98 = arith.mulf %96, %97 : vector<16x768xf32>
    %cst_47 = arith.constant 0.000000e+00 : f32
    %99 = vector.broadcast %cst_47 : f32 to vector<16x768xf32>
    %100 = arith.maximumf %98, %99 : vector<16x768xf32>
    %c1_i32_48 = arith.constant 1 : i32
    %101 = tpu.dynamic_rotate %100 by %c1_i32_48 dim 1 : vector<16x768xf32>, i32 -> vector<16x768xf32>
    %c767_i32_49 = arith.constant 767 : i32
    %102 = tpu.dynamic_rotate %100 by %c767_i32_49 dim 1 : vector<16x768xf32>, i32 -> vector<16x768xf32>
    %c0_50 = arith.constant 0 : index
    %c0_51 = arith.constant 0 : index
    %103 = vector.load %arg9[%c0_50, %c0_51] : memref<16x9xf32, #tpu.memory_space<vmem>>, vector<16x1xf32>
    %104 = vector.broadcast %103 : vector<16x1xf32> to vector<16x768xf32>
    %105 = arith.mulf %104, %101 : vector<16x768xf32>
    %c0_52 = arith.constant 0 : index
    %c1_53 = arith.constant 1 : index
    %106 = vector.load %arg9[%c0_52, %c1_53] : memref<16x9xf32, #tpu.memory_space<vmem>>, vector<16x1xf32>
    %107 = vector.broadcast %106 : vector<16x1xf32> to vector<16x768xf32>
    %108 = arith.mulf %107, %100 : vector<16x768xf32>
    %109 = arith.addf %105, %108 : vector<16x768xf32>
    %c0_54 = arith.constant 0 : index
    %c2_55 = arith.constant 2 : index
    %110 = vector.load %arg9[%c0_54, %c2_55] : memref<16x9xf32, #tpu.memory_space<vmem>>, vector<16x1xf32>
    %111 = vector.broadcast %110 : vector<16x1xf32> to vector<16x768xf32>
    %112 = arith.mulf %111, %102 : vector<16x768xf32>
    %113 = arith.addf %109, %112 : vector<16x768xf32>
    %c0_56 = arith.constant 0 : index
    %c3_57 = arith.constant 3 : index
    %114 = vector.load %arg9[%c0_56, %c3_57] : memref<16x9xf32, #tpu.memory_space<vmem>>, vector<16x1xf32>
    %115 = vector.broadcast %114 : vector<16x1xf32> to vector<16x768xf32>
    %116 = arith.mulf %115, %101 : vector<16x768xf32>
    %c0_58 = arith.constant 0 : index
    %c4_59 = arith.constant 4 : index
    %117 = vector.load %arg9[%c0_58, %c4_59] : memref<16x9xf32, #tpu.memory_space<vmem>>, vector<16x1xf32>
    %118 = vector.broadcast %117 : vector<16x1xf32> to vector<16x768xf32>
    %119 = arith.mulf %118, %100 : vector<16x768xf32>
    %120 = arith.addf %116, %119 : vector<16x768xf32>
    %c0_60 = arith.constant 0 : index
    %c5_61 = arith.constant 5 : index
    %121 = vector.load %arg9[%c0_60, %c5_61] : memref<16x9xf32, #tpu.memory_space<vmem>>, vector<16x1xf32>
    %122 = vector.broadcast %121 : vector<16x1xf32> to vector<16x768xf32>
    %123 = arith.mulf %122, %102 : vector<16x768xf32>
    %124 = arith.addf %120, %123 : vector<16x768xf32>
    %c0_62 = arith.constant 0 : index
    %c6_63 = arith.constant 6 : index
    %125 = vector.load %arg9[%c0_62, %c6_63] : memref<16x9xf32, #tpu.memory_space<vmem>>, vector<16x1xf32>
    %126 = vector.broadcast %125 : vector<16x1xf32> to vector<16x768xf32>
    %127 = arith.mulf %126, %101 : vector<16x768xf32>
    %c0_64 = arith.constant 0 : index
    %c7_65 = arith.constant 7 : index
    %128 = vector.load %arg9[%c0_64, %c7_65] : memref<16x9xf32, #tpu.memory_space<vmem>>, vector<16x1xf32>
    %129 = vector.broadcast %128 : vector<16x1xf32> to vector<16x768xf32>
    %130 = arith.mulf %129, %100 : vector<16x768xf32>
    %131 = arith.addf %127, %130 : vector<16x768xf32>
    %c0_66 = arith.constant 0 : index
    %c8_67 = arith.constant 8 : index
    %132 = vector.load %arg9[%c0_66, %c8_67] : memref<16x9xf32, #tpu.memory_space<vmem>>, vector<16x1xf32>
    %133 = vector.broadcast %132 : vector<16x1xf32> to vector<16x768xf32>
    %134 = arith.mulf %133, %102 : vector<16x768xf32>
    %135 = arith.addf %131, %134 : vector<16x768xf32>
    %c18_i32_68 = arith.constant 18 : i32
    %136 = tpu.dynamic_rotate %113 by %c18_i32_68 dim 1 : vector<16x768xf32>, i32 -> vector<16x768xf32>
    %137 = arith.addf %136, %124 : vector<16x768xf32>
    %c750_i32_69 = arith.constant 750 : i32
    %138 = tpu.dynamic_rotate %135 by %c750_i32_69 dim 1 : vector<16x768xf32>, i32 -> vector<16x768xf32>
    %139 = arith.addf %137, %138 : vector<16x768xf32>
    %c0_70 = arith.constant 0 : index
    %c0_71 = arith.constant 0 : index
    %140 = vector.load %arg10[%c0_70, %c0_71] : memref<16x16xf32, #tpu.memory_space<vmem>>, vector<16x16xf32>
    %cst_72 = arith.constant dense<0.000000e+00> : vector<16x768xf32>
    %141 = tpu.matmul %140, %139, %cst_72 {dimension_numbers = #tpu.dot_dimension_numbers<[1], [0], [0], [1], [0, 0, 1, 1], [], []>} : vector<16x16xf32>, vector<16x768xf32>, vector<16x768xf32> -> vector<16x768xf32>
    %c0_73 = arith.constant 0 : index
    %c0_74 = arith.constant 0 : index
    %142 = vector.load %arg11[%c0_73, %c0_74] : memref<16x1xf32, #tpu.memory_space<vmem>>, vector<16x1xf32>
    %143 = vector.broadcast %142 : vector<16x1xf32> to vector<16x768xf32>
    %144 = arith.addf %141, %143 : vector<16x768xf32>
    %cst_75 = arith.constant 0.000000e+00 : f32
    %145 = vector.broadcast %cst_75 : f32 to vector<16x768xf32>
    %146 = arith.maximumf %144, %145 : vector<16x768xf32>
    %c0_76 = arith.constant 0 : index
    %c0_77 = arith.constant 0 : index
    %147 = vector.load %arg12[%c0_76, %c0_77] : memref<16x8xf32, #tpu.memory_space<vmem>>, vector<16x8xf32>
    %cst_78 = arith.constant dense<0.000000e+00> : vector<16x768xf32>
    %148 = tpu.matmul %147, %1, %cst_78 {dimension_numbers = #tpu.dot_dimension_numbers<[1], [0], [0], [1], [0, 0, 1, 1], [], []>} : vector<16x8xf32>, vector<8x768xf32>, vector<16x768xf32> -> vector<16x768xf32>
    %c0_79 = arith.constant 0 : index
    %c0_80 = arith.constant 0 : index
    %149 = vector.load %arg13[%c0_79, %c0_80] : memref<16x1xf32, #tpu.memory_space<vmem>>, vector<16x1xf32>
    %150 = vector.broadcast %149 : vector<16x1xf32> to vector<16x768xf32>
    %151 = arith.addf %148, %150 : vector<16x768xf32>
    %152 = arith.addf %146, %151 : vector<16x768xf32>
    %c0_81 = arith.constant 0 : index
    %c0_82 = arith.constant 0 : index
    %c0_83 = arith.constant 0 : index
    %153 = vector.load %arg14[%c0_81, %c0_82, %c0_83] : memref<1x16x768xf32, #tpu.memory_space<vmem>>, vector<1x16x768xf32>
    %154 = vector.shape_cast %153 : vector<1x16x768xf32> to vector<16x768xf32>
    %155 = vector.shape_cast %152 : vector<16x768xf32> to vector<1x16x768xf32>
    tpu.vector_store %arg14[%c0_81, %c0_82, %c0_83], %155 {strides = array<i32>} : memref<1x16x768xf32, #tpu.memory_space<vmem>>, vector<1x16x768xf32>,
    return
  }
  func.func @transform_0(%arg0: i32) -> (i32, i32, i32) {
    %c0_i32 = arith.constant 0 : i32
    %c0_i32_0 = arith.constant 0 : i32
    %c0_i32_1 = arith.constant 0 : i32
    return %arg0, %c0_i32, %c0_i32_0 : i32, i32, i32
  }
  func.func @transform_1(%arg0: i32) -> (i32, i32) {
    %c0_i32 = arith.constant 0 : i32
    %c0_i32_0 = arith.constant 0 : i32
    %c0_i32_1 = arith.constant 0 : i32
    return %c0_i32, %c0_i32_0 : i32, i32
  }
  func.func @transform_2(%arg0: i32) -> (i32, i32) {
    %c0_i32 = arith.constant 0 : i32
    %c0_i32_0 = arith.constant 0 : i32
    %c0_i32_1 = arith.constant 0 : i32
    return %c0_i32, %c0_i32_0 : i32, i32
  }
  func.func @transform_3(%arg0: i32) -> (i32, i32) {
    %c0_i32 = arith.constant 0 : i32
    %c0_i32_0 = arith.constant 0 : i32
    %c0_i32_1 = arith.constant 0 : i32
    return %c0_i32, %c0_i32_0 : i32, i32
  }
  func.func @transform_4(%arg0: i32) -> (i32, i32) {
    %c0_i32 = arith.constant 0 : i32
    %c0_i32_0 = arith.constant 0 : i32
    %c0_i32_1 = arith.constant 0 : i32
    return %c0_i32, %c0_i32_0 : i32, i32
  }
  func.func @transform_5(%arg0: i32) -> (i32, i32) {
    %c0_i32 = arith.constant 0 : i32
    %c0_i32_0 = arith.constant 0 : i32
    %c0_i32_1 = arith.constant 0 : i32
    return %c0_i32, %c0_i32_0 : i32, i32
  }
  func.func @transform_6(%arg0: i32) -> (i32, i32) {
    %c0_i32 = arith.constant 0 : i32
    %c0_i32_0 = arith.constant 0 : i32
    %c0_i32_1 = arith.constant 0 : i32
    return %c0_i32, %c0_i32_0 : i32, i32
  }
  func.func @transform_7(%arg0: i32) -> (i32, i32) {
    %c0_i32 = arith.constant 0 : i32
    %c0_i32_0 = arith.constant 0 : i32
    %c0_i32_1 = arith.constant 0 : i32
    return %c0_i32, %c0_i32_0 : i32, i32
  }
  func.func @transform_8(%arg0: i32) -> (i32, i32) {
    %c0_i32 = arith.constant 0 : i32
    %c0_i32_0 = arith.constant 0 : i32
    %c0_i32_1 = arith.constant 0 : i32
    return %c0_i32, %c0_i32_0 : i32, i32
  }
  func.func @transform_9(%arg0: i32) -> (i32, i32) {
    %c0_i32 = arith.constant 0 : i32
    %c0_i32_0 = arith.constant 0 : i32
    %c0_i32_1 = arith.constant 0 : i32
    return %c0_i32, %c0_i32_0 : i32, i32
  }
  func.func @transform_10(%arg0: i32) -> (i32, i32) {
    %c0_i32 = arith.constant 0 : i32
    %c0_i32_0 = arith.constant 0 : i32
    %c0_i32_1 = arith.constant 0 : i32
    return %c0_i32, %c0_i32_0 : i32, i32
  }
  func.func @transform_11(%arg0: i32) -> (i32, i32) {
    %c0_i32 = arith.constant 0 : i32
    %c0_i32_0 = arith.constant 0 : i32
    %c0_i32_1 = arith.constant 0 : i32
    return %c0_i32, %c0_i32_0 : i32, i32
  }
  func.func @transform_12(%arg0: i32) -> (i32, i32) {
    %c0_i32 = arith.constant 0 : i32
    %c0_i32_0 = arith.constant 0 : i32
    %c0_i32_1 = arith.constant 0 : i32
    return %c0_i32, %c0_i32_0 : i32, i32
  }
  func.func @transform_13(%arg0: i32) -> (i32, i32, i32) {
    %c0_i32 = arith.constant 0 : i32
    %c0_i32_0 = arith.constant 0 : i32
    %c0_i32_1 = arith.constant 0 : i32
    return %arg0, %c0_i32, %c0_i32_0 : i32, i32, i32
  }
}

</mosaic_0001>

<bundles_post_ra>
// kernel: tpu_custom_call.1
= control target key start
LH: loop header
LB: loop body
LE: loop exit
PB: predicated region body
PF: predicated region fallthrough
CT: control target
= control target key end

     0   :  { %6 = vsyncpa [#allocation3], 0  ;;  %s128_s0 = inlined_call_operand.hbm [shape: f32[8,128], index: 0, kind: input, shape index: {}]   ;;  %s129_s1 = inlined_call_operand.hbm [shape: f32[8,128], index: 1, kind: output, shape index: {}]  }
   0x1   :  { %7 = vsyncpa [#allocation4], 0  ;;  %s91_s6 = smov [#allocation2]   ;;  %s43_s10 = scalar_lea.hbm %s128_s0, 128 }
   0x2   :  { %s14_s7 = sshll.u32 %s91_s6, 4  ;;  %p44_p0 = scmp.ne.s32.totalorder %s128_s0, %s43_s10  ;;  %s15_s7 = int_to_ptr.vmem [resolvable:$true] %s14_s7 }
   0x3   :  { %p47_p1 = scmp.lt.u32.totalorder %s43_s10, %s128_s0 }
   0x5   :  { %p49_p2 = pnand %p47_p1, %p44_p0 }
   0x7   :  { %52 = shalt.err (!%p49_p2)
}
   0x8   :  { %s53_s15 = scalar_lea.vmem %s15_s7, 128  ;;  %p58_p4 = scmp.lt.s32.totalorder %s15_s7, %s15_s7 }
   0x9   :  { %p54_p3 = scmp.ne.s32.totalorder %s15_s7, %s53_s15  ;;  %p59_p5 = scmp.lt.s32.totalorder %s53_s15, %s53_s15 }
   0xb   :  { %p60_p6 = por %p59_p5, %p58_p4 }
   0xd   :  { %p61_p7 = pnand %p60_p6, %p54_p3 }
   0xf   :  { %64 = shalt.err (!%p61_p7)
}
  0x10   :  { %17 = dma.hbm_to_vmem [thread:$0]  %s128_s0, 128, %s15_s7, [#allocation3]  }
  0x11   :  { %87 = dma.done.wait [#allocation3], 128  }
  0x12   :  { %88 = vsyncadd [#allocation3], 4294967168  ;;  %v21_v0 = vld [vmem:[#allocation2] sm:$0xff]  ;;  %s92_s18 = smov 1   ;;  %s93_s19 = smov [#allocation5]  }
  0x13   :  { %22 = vrot.lane.b32.xlu0 %v21_v0, %s92_s18  ;;  %s31_s20 = sshll.u32 %s93_s19, 4  ;;  %s32_s20 = int_to_ptr.vmem [resolvable:$true] %s31_s20 }
  0x14   :  { %s65_s21 = scalar_lea.vmem %s32_s20, 128  ;;  %p70_p9 = scmp.lt.s32.totalorder %s32_s20, %s32_s20 }
  0x15   :  { %p66_p8 = scmp.ne.s32.totalorder %s32_s20, %s65_s21  ;;  %p71_p10 = scmp.lt.s32.totalorder %s65_s21, %s65_s21 }
  0x17   :  { %p72_p11 = por %p71_p10, %p70_p9 }
  0x19   :  { %p73_p12 = pnand %p72_p11, %p66_p8 }
  0x85   :  { %v23_v1 = vpop.permute.xlu0 %22 }
  0x86   :  { %24 = vst [vmem:[#allocation5] sm:$0xff] %v23_v1 }
  0x87   :  { %76 = shalt.err (!%p73_p12)
}
  0x88   :  { %s77_s0 = scalar_lea.hbm %s129_s1, 128 }
  0x89   :  { %p78_p13 = scmp.ne.s32.totalorder %s129_s1, %s77_s0  ;;  %p81_p0 = scmp.lt.u32.totalorder %s77_s0, %s129_s1 }
  0x8b   :  { %p83_p1 = pnand %p81_p0, %p78_p13 }
  0x8d   :  { %86 = shalt.err (!%p83_p1)
}
  0x8e   :  { %34 = dma.vmem_to_hbm [thread:$0]  %s32_s20, 128, %s129_s1, [#allocation4]  }
  0x8f   :  { %89 = dma.done.wait [#allocation4], 128  }
  0x90   :  { %90 = vsyncadd [#allocation4], 4294967168 }
  0x91   :  { %38 = vsyncpa [#allocation3], 1 }
  0x92   :  { %39 = vsyncpa [#allocation4], 1 }

// kernel: tpu_custom_call.1
= control target key start
LH: loop header
LB: loop body
LE: loop exit
PB: predicated region body
PF: predicated region fallthrough
CT: control target
= control target key end

     0   :  { %18 = vsyncpa [#allocation3], 0  ;;  %s4164_s0 = inlined_call_operand.vmem [shape: f32[1,8,768], index: 0, kind: input, shape index: {}]   ;;  %s4165_s1 = inlined_call_operand.vmem [shape: f32[1,768], index: 1, kind: input, shape index: {}]   ;;  %s4166_s2 = inlined_call_operand.hbm [shape: f32[8,9], index: 2, kind: input, shape index: {}]   ;;  %s4167_s3 = inlined_call_operand.vmem [shape: f32[16,8], index: 3, kind: input, shape index: {}]   ;;  %s4168_s4 = inlined_call_operand.vmem [shape: f32[16,1], index: 4, kind: input, shape index: {}]   ;;  %s4169_s5 = inlined_call_operand.vmem [shape: f32[16,9], index: 5, kind: input, shape index: {}]   ;;  %s4170_s6 = inlined_call_operand.vmem [shape: f32[16,16], index: 6, kind: input, shape index: {}]   ;;  %s4171_s7 = inlined_call_operand.vmem [shape: f32[16,1], index: 7, kind: input, shape index: {}]   ;;  %s4172_s8 = inlined_call_operand.vmem [shape: f32[16,9], index: 8, kind: input, shape index: {}]   ;;  %s4173_s9 = inlined_call_operand.vmem [shape: f32[16,16], index: 9, kind: input, shape index: {}]   ;;  %s4174_s10 = inlined_call_operand.vmem [shape: f32[16,1], index: 10, kind: input, shape index: {}]   ;;  %s4175_s11 = inlined_call_operand.vmem [shape: f32[16,8], index: 11, kind: input, shape index: {}]   ;;  %s4176_s12 = inlined_call_operand.vmem [shape: f32[16,1], index: 12, kind: input, shape index: {}]   ;;  %s4177_s13 = inlined_call_operand.hbm [shape: f32[1,16,768], index: 13, kind: output, shape index: {}]  }
   0x1   :  { %19 = vsyncpa [#allocation4], 0  ;;  %s2441_s25 = smov [#allocation2]   ;;  %s2393_s29 = scalar_lea.hbm %s4166_s2, 128 }
   0x2   :  { %s30_s26 = sshll.u32 %s2441_s25, 4  ;;  %p2394_p0 = scmp.ne.s32.totalorder %s4166_s2, %s2393_s29  ;;  %s31_s26 = int_to_ptr.vmem [resolvable:$true] %s30_s26 }
   0x3   :  { %p2397_p1 = scmp.lt.u32.totalorder %s2393_s29, %s4166_s2 }
   0x5   :  { %p2399_p2 = pnand %p2397_p1, %p2394_p0 }
   0x7   :  { %2402 = shalt.err (!%p2399_p2)
}
   0x8   :  { %s2403_s17 = scalar_lea.vmem %s31_s26, 128  ;;  %p2408_p4 = scmp.lt.s32.totalorder %s31_s26, %s31_s26 }
   0x9   :  { %p2404_p3 = scmp.ne.s32.totalorder %s31_s26, %s2403_s17  ;;  %p2409_p5 = scmp.lt.s32.totalorder %s2403_s17, %s2403_s17 }
   0xb   :  { %p2410_p6 = por %p2409_p5, %p2408_p4 }
   0xd   :  { %p2411_p7 = pnand %p2410_p6, %p2404_p3 }
   0xf   :  { %2414 = shalt.err (!%p2411_p7)
}
  0x10   :  { %33 = dma.hbm_to_vmem [thread:$0]  %s4166_s2, 128, %s31_s26, [#allocation3]  }
  0x11   :  { %2437 = dma.done.wait [#allocation3], 128  }
  0x12   :  { %2438 = vsyncadd [#allocation3], 4294967168  ;;  %v4190_v0 = vmov 2   ;;  %v4179_v1 = vmov 0   ;;  %v104_v2 = vld [vmem:[#allocation2] sm:$0xff]  ;;  %v4191_v3 = vmov 6   ;;  %v76_v22 = vlaneseq }
  0x13   :  { %2348 = vset.pattern.permute.xlu1 %v4190_v0  ;;  %2346 = vset.pattern.permute.xlu0 %v4179_v1  ;;  %v4193_v4 = vmov 1   ;;  %v4188_v5 = vmov 7   ;;  %v4185_v6 = vmov 8   ;;  %v2550_v7 = vld [vmem:[%s4164_s0 + $0x28] sm:$0xff]  ;;  %v2555_v8 = vld [vmem:[%s4164_s0] sm:$0xff]  ;;  %s2448_s23 = smov 1  }
  0x14   :  { %133 = vperm.xlu1 %2348, %v104_v2   ;;  %107 = vperm.xlu0 %2346, %v104_v2   ;;  %v2564_v9 = vld [vmem:[%s4164_s0 + $0x10] sm:$0xff]  ;;  %v2569_v10 = vld [vmem:[%s4164_s0 + $0x8] sm:$0xff]  ;;  %v4186_v11 = vmov 3   ;;  %v4181_v12 = vmov 4   ;;  %v2580_v13 = vld [vmem:[%s4164_s0 + $0x20] sm:$0xff]  ;;  %s2451_s30 = smov 127  }
  0x15   :  { %v2593_v14 = vld [vmem:[%s4164_s0 + $0x18] sm:$0xff]  ;;  %v4178_v15 = vmov 5   ;;  %v2617_v24 = vand.u32 127, %v76_v22  ;;  %s2453_s16 = smov 18   ;;  %s2455_s17 = smov 110   ;;  %vm296_vm4 = vcmask 64512  }
  0x16   :  { %vm1027_vm5 = vcmask 130048  }
  0x17   :  { %4231 = vst [vmem:[#allocation8_spill] sm:$0xff] %v2617_v24  ;;  %vm78_vm0 = vcmp.lt.s32.totalorder %v2617_v24, 1  ;;  %vm97_vm1 = vcmp.lt.s32.totalorder %v2617_v24, 127  ;;  %vm244_vm2 = vcmp.lt.s32.totalorder %v2617_v24, 18  ;;  %vm269_vm3 = vcmp.lt.s32.totalorder %v2617_v24, 110 }
  0x18   :  { %2349 = vset.pattern.permute.xlu1 %v4191_v3  ;;  %2347 = vset.pattern.permute.xlu0 %v4193_v4 }
  0x19   :  { %191 = vperm.xlu1 %2349, %v104_v2   ;;  %117 = vperm.xlu0 %2347, %v104_v2  }
  0x1d   :  { %2350 = vset.pattern.permute.xlu1 %v4188_v5  ;;  %2351 = vset.pattern.permute.xlu0 %v4185_v6 }
  0x1e   :  { %201 = vperm.xlu1 %2350, %v104_v2   ;;  %217 = vperm.xlu0 %2351, %v104_v2  }
  0x22   :  { %74 = vrot.lane.b32.xlu0 %v2550_v7, %s2448_s23  ;;  %64 = vrot.lane.b32.xlu1 %v2555_v8, %s2448_s23 }
  0x23   :  { %2352 = vset.pattern.permute.xlu0 %v4186_v11  ;;  %2353 = vset.pattern.permute.xlu1 %v4181_v12 }
  0x26   :  { %68 = vrot.lane.b32.xlu0 %v2564_v9, %s2448_s23  ;;  %66 = vrot.lane.b32.xlu1 %v2569_v10, %s2448_s23 }
  0x2a   :  { %87 = vrot.lane.b32.xlu0 %v2569_v10, %s2451_s30  ;;  %72 = vrot.lane.b32.xlu1 %v2580_v13, %s2448_s23 }
  0x2e   :  { %95 = vrot.lane.b32.xlu0 %v2550_v7, %s2451_s30  ;;  %85 = vrot.lane.b32.xlu1 %v2555_v8, %s2451_s30 }
  0x32   :  { %70 = vrot.lane.b32.xlu0 %v2593_v14, %s2448_s23  ;;  %89 = vrot.lane.b32.xlu1 %v2564_v9, %s2451_s30 }
  0x36   :  { %149 = vperm.xlu0 %2352, %v104_v2   ;;  %91 = vrot.lane.b32.xlu1 %v2593_v14, %s2451_s30 }
  0x3a   :  { %93 = vrot.lane.b32.xlu1 %v2580_v13, %s2451_s30  ;;  %2355 = vset.pattern.permute.xlu0 %v4179_v1 }
  0x3e   :  { %159 = vperm.xlu1 %2353, %v104_v2  }
  0x42   :  { %2354 = vset.pattern.permute.xlu1 %v4178_v15 }
  0x43   :  { %175 = vperm.xlu1 %2354, %v104_v2  }
  0x47   :  { %2356 = vset.pattern.permute.xlu1 %v4179_v1 }
  0x93   :  { %v2606_v16 = vpop.permute.xlu1 %133  ;;  %v2608_v17 = vpop.permute.xlu0 %107 }
  0x98   :  { %v2610_v18 = vpop.permute.xlu1 %191  ;;  %v118_v19 = vpop.permute.xlu0 %117 }
  0x99   :  { %v120_v36 = vmul.f32 %v118_v19, %v2555_v8  ;;  %v121_v44 = vmul.f32 %v118_v19, %v2569_v10  ;;  %v125_v49 = vmul.f32 %v118_v19, %v2550_v7  ;;  %v124_v50 = vmul.f32 %v118_v19, %v2580_v13 }
  0x9a   :  { %v123_v53 = vmul.f32 %v118_v19, %v2593_v14  ;;  %v122_v54 = vmul.f32 %v118_v19, %v2564_v9 }
  0x9d   :  { %v2612_v20 = vpop.permute.xlu1 %201  ;;  %v2614_v21 = vpop.permute.xlu0 %217 }
  0x9e   :  { %v205_v52 = vmul.f32 %v2612_v20, %v2569_v10  ;;  %v206_v58 = vmul.f32 %v2612_v20, %v2564_v9 }
  0xa1   :  { %v75_v23 = vpop.permute.xlu0 %74  ;;  %v65_v25 = vpop.permute.xlu1 %64 }
  0xa2   :  { %v2622_v28 = vsel %vm78_vm0, %v75_v23, %v65_v25 }
  0xa3   :  { %v110_v31 = vmul.f32 %v2608_v17, %v2622_v28  ;;  %v194_v62 = vmul.f32 %v2610_v18, %v2622_v28 }
  0xa5   :  { %v69_v26 = vpop.permute.xlu0 %68  ;;  %v67_v27 = vpop.permute.xlu1 %66  ;;  %v126_v41 = vadd.f32 %v120_v36, %v110_v31 }
  0xa6   :  { %v2633_v33 = vsel %vm78_vm0, %v65_v25, %v67_v27  ;;  %v2650_v42 = vsel %vm78_vm0, %v67_v27, %v69_v26  ;;  %v4183_v25 = vmov 0.0  }
  0xa7   :  { %v111_v43 = vmul.f32 %v2608_v17, %v2633_v33  ;;  %v195_v55 = vmul.f32 %v2610_v18, %v2633_v33  ;;  %v196_v56 = vmul.f32 %v2610_v18, %v2650_v42  ;;  %367 = vmatprep.mubr.f32.mxu0 %v4183_v25  ;;  %444 = vmatprep.mubr.f32.mxu1 %v4183_v25 }
  0xa9   :  { %v88_v29 = vpop.permute.xlu0 %87  ;;  %v73_v30 = vpop.permute.xlu1 %72  ;;  %v127_v61 = vadd.f32 %v121_v44, %v111_v43  ;;  %v211_v44 = vadd.f32 %v205_v52, %v195_v55  ;;  %v207_v55 = vmul.f32 %v2612_v20, %v2593_v14 }
  0xaa   :  { %v2629_v32 = vsel %vm78_vm0, %v73_v30, %v75_v23  ;;  %v204_v23 = vmul.f32 %v2612_v20, %v2555_v8 }
  0xab   :  { %v115_v39 = vmul.f32 %v2608_v17, %v2629_v32  ;;  %v199_v63 = vmul.f32 %v2610_v18, %v2629_v32 }
  0xad   :  { %v96_v34 = vpop.permute.xlu0 %95  ;;  %v86_v35 = vpop.permute.xlu1 %85  ;;  %v131_v57 = vadd.f32 %v125_v49, %v115_v39  ;;  %v212_v39 = vadd.f32 %v206_v58, %v196_v56  ;;  %v208_v49 = vmul.f32 %v2612_v20, %v2580_v13 }
  0xae   :  { %v2638_v37 = vsel %vm97_vm1, %v86_v35, %v88_v29  ;;  %v2642_v38 = vsel %vm97_vm1, %v96_v34, %v86_v35 }
  0xaf   :  { %v136_v40 = vmul.f32 %v2606_v16, %v2638_v37  ;;  %v141_v45 = vmul.f32 %v2606_v16, %v2642_v38  ;;  %v225_v43 = vmul.f32 %v2614_v21, %v2642_v38 }
  0xb1   :  { %v71_v46 = vpop.permute.xlu0 %70  ;;  %v90_v47 = vpop.permute.xlu1 %89  ;;  %v142_v48 = vadd.f32 %v136_v40, %v126_v41  ;;  %v147_v19 = vadd.f32 %v141_v45, %v131_v57  ;;  %v112_v40 = vmul.f32 %v2608_v17, %v2650_v42  ;;  %v220_v41 = vmul.f32 %v2614_v21, %v2638_v37 }
  0xb2   :  { %v2661_v51 = vsel %vm97_vm1, %v88_v29, %v90_v47  ;;  %v80_v59 = vsel %vm78_vm0, %v71_v46, %v73_v30  ;;  %v81_v27 = vsel %vm78_vm0, %v69_v26, %v71_v46  ;;  %v209_v26 = vmul.f32 %v2612_v20, %v2550_v7 }
  0xb3   :  { %232 = vrot.lane.b32.xlu0 %v142_v48, %s2453_s16  ;;  %v137_v60 = vmul.f32 %v2606_v16, %v2661_v51  ;;  %v221_v29 = vmul.f32 %v2614_v21, %v2661_v51  ;;  %v114_v35 = vmul.f32 %v2608_v17, %v80_v59  ;;  %v113_v45 = vmul.f32 %v2608_v17, %v81_v27 }
  0xb4   :  { %v210_v48 = vadd.f32 %v204_v23, %v194_v62  ;;  %v197_v62 = vmul.f32 %v2610_v18, %v81_v27  ;;  %v128_v23 = vadd.f32 %v122_v54, %v112_v40 }
  0xb5   :  { %v92_v2 = vpop.permute.xlu1 %91  ;;  %v143_v31 = vadd.f32 %v137_v60, %v127_v61  ;;  %v227_v58 = vadd.f32 %v221_v29, %v211_v44  ;;  %v215_v60 = vadd.f32 %v209_v26, %v199_v63  ;;  %v198_v61 = vmul.f32 %v2610_v18, %v80_v59 }
  0xb6   :  { %v2691_v30 = vsel %vm97_vm1, %v90_v47, %v92_v2  ;;  %v130_v17 = vadd.f32 %v124_v50, %v114_v35 }
  0xb7   :  { %v222_v36 = vmul.f32 %v2614_v21, %v2691_v30  ;;  %242 = vrot.lane.b32.xlu0 %v147_v19, %s2453_s16  ;;  %234 = vrot.lane.b32.xlu1 %v143_v31, %s2453_s16  ;;  %v150_v19 = vpop.permute.xlu0 %149  ;;  %v138_v26 = vmul.f32 %v2606_v16, %v2691_v30  ;;  %v214_v54 = vadd.f32 %v208_v49, %v198_v61 }
  0xb8   :  { %v153_v40 = vmul.f32 %v150_v19, %v2633_v33  ;;  %v155_v44 = vmul.f32 %v150_v19, %v81_v27 }
  0xb9   :  { %v94_v46 = vpop.permute.xlu1 %93  ;;  %v228_v47 = vadd.f32 %v222_v36, %v212_v39  ;;  %v129_v39 = vadd.f32 %v123_v53, %v113_v45  ;;  %v156_v53 = vmul.f32 %v150_v19, %v80_v59 }
  0xba   :  { %v98_v56 = vsel %vm97_vm1, %v94_v46, %v96_v34  ;;  %v99_v57 = vsel %vm97_vm1, %v92_v2, %v94_v46  ;;  %v226_v34 = vadd.f32 %v220_v41, %v210_v48  ;;  %v231_v2 = vadd.f32 %v225_v43, %v215_v60 }
  0xbb   :  { %v140_v52 = vmul.f32 %v2606_v16, %v98_v56  ;;  %261 = vrot.lane.b32.xlu0 %v228_v47, %s2455_s17  ;;  %259 = vrot.lane.b32.xlu1 %v227_v58, %s2455_s17  ;;  %v139_v63 = vmul.f32 %v2606_v16, %v99_v57  ;;  %v224_v29 = vmul.f32 %v2614_v21, %v98_v56 }
  0xbc   :  { %v157_v41 = vmul.f32 %v150_v19, %v2629_v32  ;;  %v154_v16 = vmul.f32 %v150_v19, %v2650_v42 }
  0xbd   :  { %v160_v31 = vpop.permute.xlu1 %159  ;;  %v146_v36 = vadd.f32 %v140_v52, %v130_v17  ;;  %v230_v43 = vadd.f32 %v224_v29, %v214_v54  ;;  %v223_v17 = vmul.f32 %v2614_v21, %v99_v57  ;;  %v2759_v21 = vld [vmem:[%s4169_s5 + $0x8] sm:$0xff] }
  0xbe   :  { %v163_v50 = vmul.f32 %v160_v31, %v2569_v10  ;;  %v167_v35 = vmul.f32 %v160_v31, %v2550_v7  ;;  %v166_v20 = vmul.f32 %v160_v31, %v2580_v13  ;;  %v162_v18 = vmul.f32 %v160_v31, %v2555_v8 }
  0xbf   :  { %240 = vrot.lane.b32.xlu0 %v146_v36, %s2453_s16  ;;  %257 = vrot.lane.b32.xlu1 %v226_v34, %s2455_s17  ;;  %v152_v10 = vmul.f32 %v150_v19, %v2622_v28  ;;  %v165_v7 = vmul.f32 %v160_v31, %v2593_v14  ;;  %v164_v13 = vmul.f32 %v160_v31, %v2564_v9 }
  0xc0   :  { %v145_v8 = vadd.f32 %v139_v63, %v129_v39  ;;  %v169_v46 = vadd.f32 %v163_v50, %v153_v40  ;;  %v173_v47 = vadd.f32 %v167_v35, %v157_v41  ;;  %v172_v33 = vadd.f32 %v166_v20, %v156_v53  ;;  %v282_v41 = vld [vmem:[%s4167_s3] sm:$0xff] }
  0xc1   :  { %v168_v48 = vadd.f32 %v162_v18, %v152_v10  ;;  %v171_v9 = vadd.f32 %v165_v7, %v155_v44  ;;  %v170_v49 = vadd.f32 %v164_v13, %v154_v16  ;;  %v283_v44 = vld [vmem:[%s4167_s3 + $0x8] sm:$0xff] }
  0xc2   :  { %v176_v45 = vpop.permute.xlu1 %175 }
  0xc3   :  { %267 = vrot.lane.b32.xlu0 %v231_v2, %s2455_s17  ;;  %v179_v32 = vmul.f32 %v176_v45, %v2661_v51  ;;  %v183_v28 = vmul.f32 %v176_v45, %v2642_v38  ;;  %v182_v59 = vmul.f32 %v176_v45, %v98_v56  ;;  %v178_v14 = vmul.f32 %v176_v45, %v2638_v37 }
  0xc4   :  { %238 = vrot.lane.b32.xlu1 %v145_v8, %s2453_s16  ;;  %v181_v27 = vmul.f32 %v176_v45, %v99_v57  ;;  %v180_v42 = vmul.f32 %v176_v45, %v2691_v30  ;;  %v144_v51 = vadd.f32 %v138_v26, %v128_v23  ;;  %v213_v37 = vadd.f32 %v207_v55, %v197_v62  ;;  %v284_v30 = vld [vmem:[%s4168_s4] sm:$0xff]  ;;  %v285_v57 = vld [vmem:[%s4168_s4 + $0x8] sm:$0xff] }
  0xc5   :  { %v185_v58 = vadd.f32 %v179_v32, %v169_v46  ;;  %v189_v60 = vadd.f32 %v183_v28, %v173_v47  ;;  %v2743_v61 = vadd.f32 %v182_v59, %v172_v33  ;;  %v184_v52 = vadd.f32 %v178_v14, %v168_v48  ;;  %v2768_v55 = vld [vmem:[%s4169_s5] sm:$0xff] }
  0xc6   :  { %v2746_v19 = vadd.f32 %v181_v27, %v171_v9  ;;  %v2748_v38 = vadd.f32 %v180_v42, %v170_v49  ;;  %v229_v56 = vadd.f32 %v223_v17, %v213_v37 }
  0xc7   :  { %265 = vrot.lane.b32.xlu0 %v230_v43, %s2455_s17 }
  0xc8   :  { %236 = vrot.lane.b32.xlu1 %v144_v51, %s2453_s16 }
  0xcb   :  { %288 = vperm.xlu0 %2355, %v284_v30  }
  0xcc   :  { %263 = vrot.lane.b32.xlu1 %v229_v56, %s2455_s17 }
  0xcf   :  { %670 = vperm.xlu0 %2355, %v2759_v21  }
  0xd0   :  { %293 = vperm.xlu1 %2356, %v285_v57  }
  0xd3   :  { %2358 = vset.pattern.permute.xlu0 %v4193_v4 }
  0xd4   :  { %665 = vperm.xlu1 %2356, %v2768_v55   ;;  %690 = vperm.xlu0 %2358, %v2759_v21  }
  0xd8   :  { %2357 = vset.pattern.permute.xlu1 %v4193_v4  ;;  %2360 = vset.pattern.permute.xlu0 %v4191_v3 }
  0xd9   :  { %686 = vperm.xlu1 %2357, %v2768_v55   ;;  %834 = vperm.xlu0 %2360, %v2768_v55  }
  0xdd   :  { %2359 = vset.pattern.permute.xlu1 %v4190_v0  ;;  %2363 = vset.pattern.permute.xlu0 %v4188_v5 }
  0xde   :  { %718 = vperm.xlu1 %2359, %v2768_v55   ;;  %858 = vperm.xlu0 %2363, %v2759_v21  }
  0xe2   :  { %722 = vperm.xlu1 %2359, %v2759_v21   ;;  %2365 = vset.pattern.permute.xlu0 %v4186_v11 }
  0xe6   :  { %2361 = vset.pattern.permute.xlu1 %v4191_v3 }
  0xe7   :  { %838 = vperm.xlu1 %2361, %v2759_v21  }
  0xeb   :  { %2362 = vset.pattern.permute.xlu1 %v4188_v5 }
  0xec   :  { %854 = vperm.xlu1 %2362, %v2768_v55  }
  0xf0   :  { %2364 = vset.pattern.permute.xlu1 %v4185_v6 }
  0xf1   :  { %886 = vperm.xlu1 %2364, %v2768_v55  }
  0xf5   :  { %890 = vperm.xlu1 %2364, %v2759_v21  }
  0xf9   :  { %2366 = vset.pattern.permute.xlu1 %v4186_v11 }
 0x125   :  { %v233_v62 = vpop.permute.xlu0 %232 }
 0x129   :  { %v243_v34 = vpop.permute.xlu0 %242  ;;  %v235_v2 = vpop.permute.xlu1 %234 }
 0x12a   :  { %v249_v23 = vsel %vm244_vm2, %v233_v62, %v235_v2  ;;  %v250_v36 = vsel %vm244_vm2, %v243_v34, %v233_v62 }
 0x12b   :  { %v252_v31 = vadd.f32 %v249_v23, %v185_v58  ;;  %v251_v26 = vadd.f32 %v250_v36, %v184_v52  ;;  %v536_v58 = vshrl.u32 %v76_v22, 7 }
 0x12d   :  { %v262_v63 = vpop.permute.xlu0 %261  ;;  %v260_v29 = vpop.permute.xlu1 %259  ;;  %v545_v23 = vsub.s32 2, %v536_v58 }
 0x12e   :  { %v273_v39 = vsel %vm269_vm3, %v260_v29, %v262_v63 }
 0x12f   :  { %v277_v50 = vadd.f32 %v273_v39, %v252_v31 }
 0x131   :  { %v241_v35 = vpop.permute.xlu0 %240  ;;  %v258_v20 = vpop.permute.xlu1 %257  ;;  %303 = vmatprep.subr.mxu0 %v277_v50 }
 0x132   :  { %v245_v18 = vsel %vm244_vm2, %v241_v35, %v243_v34  ;;  %v274_v54 = vsel %vm269_vm3, %v258_v20, %v260_v29 }
 0x133   :  { %v276_v40 = vadd.f32 %v274_v54, %v251_v26  ;;  %v256_v53 = vadd.f32 %v245_v18, %v189_v60  ;;  %v537_v60 = vsub.s32 0, %v536_v58  ;;  %v541_v54 = vsub.s32 1, %v536_v58 }
 0x135   :  { %v268_v10 = vpop.permute.xlu0 %267  ;;  %304 = vmatpush1.msra.mxu0 %v276_v40 }
 0x136   :  { %v239_v7 = vpop.permute.xlu1 %238  ;;  %v275_v13 = vsel %vm269_vm3, %v268_v10, %v258_v20  ;;  %2280 = vmatmul.mubr.msk.f32.vlgmr.msra.gmra.mrb[0].mxu0 %vm296_vm4, %v282_v41 }
 0x137   :  { %v246_v8 = vsel %vm244_vm2, %v239_v7, %v241_v35  ;;  %v281_v43 = vadd.f32 %v275_v13, %v256_v53  ;;  %373 = vmatprep.mubr.f32.mxu0 %v4183_v25 }
 0x138   :  { %v255_v16 = vadd.f32 %v246_v8, %v2743_v61  ;;  %v63_v61 = vld [vmem:[%s4165_s1] sm:$0x3f] }
 0x139   :  { %457 = vmatprep.subr.mxu0 %v281_v43  ;;  %v266_v45 = vpop.permute.xlu0 %265  ;;  %v2842_v52 = vrot.slane %v63_v61, %v537_v60  ;;  %v2854_v36 = vrot.slane %v63_v61, %v545_v23  ;;  %v2862_v13 = vrot.slane %v63_v61, %v541_v54 }
 0x13a   :  { %v237_v46 = vpop.permute.xlu1 %236  ;;  %v270_v47 = vsel %vm269_vm3, %v266_v45, %v268_v10  ;;  %2281 = vmatmul.mubr.msk.f32.gmra.mrb[2].mxu0 %vm296_vm4, %v283_v44 }
 0x13b   :  { %v248_v33 = vsel %vm244_vm2, %v235_v2, %v237_v46  ;;  %v280_v48 = vadd.f32 %v270_v47, %v255_v16  ;;  %v247_v32 = vsel %vm244_vm2, %v237_v46, %v239_v7  ;;  %521 = vmatprep.mubr.f32.mxu0 %v4183_v25  ;;  %4232 = vst [vmem:[#allocation9_spill] sm:$0xff] %v2842_v52  ;;  %4235 = vst [vmem:[#allocation12_spill] sm:$0xff] %v2854_v36 }
 0x13c   :  { %v254_v59 = vadd.f32 %v247_v32, %v2746_v19  ;;  %v253_v14 = vadd.f32 %v248_v33, %v2748_v38  ;;  %4236 = vst [vmem:[#allocation13_spill] sm:$0xff] %v2862_v13  ;;  %v549_v16 = vsub.s32 3, %v536_v58 }
 0x13d   :  { %458 = vmatpush1.msra.mxu0 %v280_v48 }
 0x13e   :  { %v264_v28 = vpop.permute.xlu1 %263  ;;  %2284 = vmatmul.mubr.msk.f32.vlgmr.msra.gmra.mrb[4].mxu0 %vm296_vm4, %v282_v41  ;;  %v2878_v48 = vrot.slane %v63_v61, %v549_v16 }
 0x13f   :  { %v271_v9 = vsel %vm269_vm3, %v264_v28, %v266_v45  ;;  %v272_v27 = vsel %vm269_vm3, %v262_v63, %v264_v28  ;;  %527 = vmatprep.mubr.f32.mxu0 %v4183_v25  ;;  %v553_v45 = vsub.s32 4, %v536_v58  ;;  %v557_v28 = vsub.s32 5, %v536_v58 }
 0x140   :  { %v279_v49 = vadd.f32 %v271_v9, %v254_v59  ;;  %v278_v42 = vadd.f32 %v272_v27, %v253_v14  ;;  %4238 = vst [vmem:[#allocation15_spill] sm:$0xff] %v2878_v48 }
 0x141   :  { %v2884_v32 = vrot.slane %v63_v61, %v553_v45 }
 0x142   :  { %380 = vmatprep.subr.mxu1 %v279_v49  ;;  %2285 = vmatmul.mubr.msk.f32.gmra.mrb[6].mxu0 %vm296_vm4, %v283_v44 }
 0x143   :  { %381 = vmatpush1.msra.mxu1 %v278_v42  ;;  %1175 = vmatprep.mubr.f32.mxu0 %v4183_v25  ;;  %4239 = vst [vmem:[#allocation16_spill] sm:$0xff] %v2884_v32  ;;  %v2893_v42 = vrot.slane %v63_v61, %v557_v28 }
 0x144   :  { %2282 = vmatmul.mubr.msk.f32.vlgmr.msra.gmra.mrb[0].mxu1 %vm296_vm4, %v282_v41 }
 0x145   :  { %450 = vmatprep.mubr.f32.mxu1 %v4183_v25  ;;  %4241 = vst [vmem:[#allocation18_spill] sm:$0xff] %v2893_v42 }
 0x148   :  { %2283 = vmatmul.mubr.msk.f32.gmra.mrb[2].mxu1 %vm296_vm4, %v283_v44 }
 0x149   :  { %1098 = vmatprep.mubr.f32.mxu1 %v4183_v25 }
 0x14a   :  { %v289_v17 = vpop.permute.xlu0 %288 }
 0x14f   :  { %v294_v30 = vpop.permute.xlu1 %293 }
 0x209   :  { %v369_v51 = vpop.f32.mrb[0].mxu0 }
 0x20a   :  { %v370_v19 = vadd.f32 %v369_v51, %v289_v17  ;;  %v371_v38 = vpop.f32.mrb[1].mxu0 }
 0x20b   :  { %v372_v7 = vadd.f32 %v371_v38, %v289_v17 }
 0x20c   :  { %v565_v37 = vmul.f32 %v2842_v52, %v370_v19 }
 0x20d   :  { %v375_v56 = vpop.f32.mrb[2].mxu0  ;;  %v566_v43 = vmul.f32 %v2862_v13, %v372_v7 }
 0x20e   :  { %v2845_v57 = vmax.f32 %v565_v37, 0.0  ;;  %v376_v62 = vadd.f32 %v375_v56, %v294_v30  ;;  %v377_v34 = vpop.f32.mrb[3].mxu0 }
 0x20f   :  { %v378_v44 = vadd.f32 %v377_v34, %v294_v30  ;;  %v2875_v46 = vmax.f32 %v566_v43, 0.0 }
 0x210   :  { %4233 = vst [vmem:[#allocation10_spill] sm:$0xff] %v2845_v57  ;;  %v571_v22 = vmul.f32 %v2842_v52, %v376_v62  ;;  %589 = vrot.lane.b32.xlu0 %v2845_v57, %s2448_s23 }
 0x211   :  { %v523_v2 = vpop.f32.mrb[4].mxu0  ;;  %4237 = vst [vmem:[#allocation14_spill] sm:$0xff] %v2875_v46  ;;  %v572_v47 = vmul.f32 %v2862_v13, %v378_v44 }
 0x212   :  { %v2850_v63 = vmax.f32 %v571_v22, 0.0  ;;  %v525_v29 = vpop.f32.mrb[5].mxu0  ;;  %v524_v14 = vadd.f32 %v523_v2, %v289_v17  ;;  %v2949_v2 = vpop.permute.xlu1 %665 }
 0x213   :  { %v2886_v59 = vmax.f32 %v572_v47, 0.0  ;;  %v526_v49 = vadd.f32 %v525_v29, %v289_v17 }
 0x214   :  { %4234 = vst [vmem:[#allocation11_spill] sm:$0xff] %v2850_v63  ;;  %591 = vrot.lane.b32.xlu1 %v2850_v63, %s2448_s23  ;;  %v569_v60 = vmul.f32 %v2884_v32, %v524_v14 }
 0x215   :  { %v529_v31 = vpop.f32.mrb[6].mxu0  ;;  %4240 = vst [vmem:[#allocation17_spill] sm:$0xff] %v2886_v59  ;;  %v570_v38 = vmul.f32 %v2893_v42, %v526_v49 }
 0x216   :  { %v531_v50 = vpop.f32.mrb[7].mxu0  ;;  %v530_v51 = vadd.f32 %v529_v31, %v294_v30  ;;  %v2904_v37 = vmax.f32 %v569_v60, 0.0  ;;  %v2951_v23 = vpop.permute.xlu1 %686 }
 0x217   :  { %v446_v39 = vpop.f32.mrb[0].mxu1  ;;  %v2913_v62 = vmax.f32 %v570_v38, 0.0  ;;  %v694_v49 = vmul.f32 %v2951_v23, %v2875_v46 }
 0x218   :  { %v447_v35 = vadd.f32 %v446_v39, %v289_v17  ;;  %v448_v20 = vpop.f32.mrb[1].mxu1  ;;  %v575_v61 = vmul.f32 %v2884_v32, %v530_v51  ;;  %v2957_v39 = vpop.permute.xlu0 %670 }
 0x219   :  { %v449_v33 = vadd.f32 %v448_v20, %v289_v17  ;;  %v532_v17 = vadd.f32 %v531_v50, %v294_v30 }
 0x21a   :  { %v567_v18 = vmul.f32 %v2854_v36, %v447_v35  ;;  %v2915_v34 = vmax.f32 %v575_v61, 0.0  ;;  %v2953_v29 = vpop.permute.xlu1 %718 }
 0x21b   :  { %v452_v26 = vpop.f32.mrb[2].mxu1  ;;  %v568_v9 = vmul.f32 %v2878_v48, %v449_v33  ;;  %v576_v22 = vmul.f32 %v2893_v42, %v532_v17 }
 0x21c   :  { %v2857_v40 = vmax.f32 %v567_v18, 0.0  ;;  %v453_v41 = vadd.f32 %v452_v26, %v294_v30  ;;  %v454_v53 = vpop.f32.mrb[3].mxu1  ;;  %v2961_v35 = vpop.permute.xlu0 %690 }
 0x21d   :  { %v455_v27 = vadd.f32 %v454_v53, %v294_v30  ;;  %v2896_v19 = vmax.f32 %v568_v9, 0.0  ;;  %v2922_v30 = vmax.f32 %v576_v22, 0.0 }
 0x21e   :  { %v573_v10 = vmul.f32 %v2854_v36, %v453_v41  ;;  %597 = vrot.lane.b32.xlu0 %v2857_v40, %s2448_s23  ;;  %v2955_v31 = vpop.permute.xlu1 %722 }
 0x21f   :  { %v574_v58 = vmul.f32 %v2878_v48, %v455_v27 }
 0x220   :  { %v2864_v8 = vmax.f32 %v573_v10, 0.0 }
 0x221   :  { %v2907_v56 = vmax.f32 %v574_v58, 0.0 }
 0x222   :  { %599 = vrot.lane.b32.xlu1 %v2864_v8, %s2448_s23  ;;  %625 = vrot.lane.b32.xlu0 %v2845_v57, %s2451_s30  ;;  %v2959_v50 = vpop.permute.xlu1 %838 }
 0x226   :  { %627 = vrot.lane.b32.xlu1 %v2850_v63, %s2451_s30  ;;  %633 = vrot.lane.b32.xlu0 %v2857_v40, %s2451_s30  ;;  %v2963_v20 = vpop.permute.xlu1 %854 }
 0x22a   :  { %635 = vrot.lane.b32.xlu1 %v2864_v8, %s2451_s30  ;;  %593 = vrot.lane.b32.xlu0 %v2875_v46, %s2448_s23 }
 0x22e   :  { %595 = vrot.lane.b32.xlu1 %v2886_v59, %s2448_s23  ;;  %629 = vrot.lane.b32.xlu0 %v2875_v46, %s2451_s30 }
 0x232   :  { %631 = vrot.lane.b32.xlu1 %v2886_v59, %s2451_s30  ;;  %637 = vrot.lane.b32.xlu0 %v2896_v19, %s2451_s30 }
 0x236   :  { %639 = vrot.lane.b32.xlu1 %v2907_v56, %s2451_s30  ;;  %605 = vrot.lane.b32.xlu0 %v2904_v37, %s2448_s23 }
 0x23a   :  { %607 = vrot.lane.b32.xlu1 %v2915_v34, %s2448_s23  ;;  %609 = vrot.lane.b32.xlu0 %v2913_v62, %s2448_s23 }
 0x23e   :  { %611 = vrot.lane.b32.xlu1 %v2922_v30, %s2448_s23  ;;  %645 = vrot.lane.b32.xlu0 %v2913_v62, %s2451_s30 }
 0x242   :  { %647 = vrot.lane.b32.xlu1 %v2922_v30, %s2451_s30  ;;  %601 = vrot.lane.b32.xlu0 %v2896_v19, %s2448_s23 }
 0x246   :  { %603 = vrot.lane.b32.xlu1 %v2907_v56, %s2448_s23  ;;  %641 = vrot.lane.b32.xlu0 %v2904_v37, %s2451_s30 }
 0x24a   :  { %643 = vrot.lane.b32.xlu1 %v2915_v34, %s2451_s30  ;;  %750 = vperm.xlu0 %2365, %v2768_v55  }
 0x24e   :  { %754 = vperm.xlu1 %2366, %v2759_v21   ;;  %2368 = vset.pattern.permute.xlu0 %v4181_v12 }
 0x24f   :  { %774 = vperm.xlu0 %2368, %v2759_v21  }
 0x252   :  { %2367 = vset.pattern.permute.xlu1 %v4181_v12 }
 0x253   :  { %770 = vperm.xlu1 %2367, %v2768_v55   ;;  %2370 = vset.pattern.permute.xlu0 %v4179_v1 }
 0x257   :  { %2369 = vset.pattern.permute.xlu1 %v4178_v15  ;;  %v700_v15 = vmul.f32 %v2961_v35, %v2886_v59 }
 0x258   :  { %802 = vperm.xlu1 %2369, %v2768_v55   ;;  %v2965_v55 = vpop.permute.xlu0 %834 }
 0x25c   :  { %806 = vperm.xlu1 %2369, %v2759_v21   ;;  %v2967_v21 = vpop.permute.xlu1 %886  ;;  %v2969_v18 = vpop.permute.xlu0 %858 }
 0x25d   :  { %v869_v13 = vmul.f32 %v2969_v18, %v2864_v8 }
 0x260   :  { %2371 = vset.pattern.permute.xlu1 %v4179_v1  ;;  %v2971_v26 = vpop.permute.xlu1 %890 }
 0x282   :  { %v2973_v54 = vpop.permute.xlu0 %589 }
 0x286   :  { %v2975_v41 = vpop.permute.xlu1 %591 }
 0x290   :  { %v2977_v53 = vpop.permute.xlu0 %597 }
 0x294   :  { %v2979_v10 = vpop.permute.xlu1 %599  ;;  %v2981_v7 = vpop.permute.xlu0 %625 }
 0x298   :  { %v2983_v43 = vpop.permute.xlu1 %627  ;;  %v634_v44 = vpop.permute.xlu0 %633 }
 0x29c   :  { %v636_v16 = vpop.permute.xlu1 %635  ;;  %v594_v45 = vpop.permute.xlu0 %593 }
 0x29d   :  { %v2988_v47 = vsel %vm78_vm0, %v2973_v54, %v594_v45  ;;  %v3015_v61 = vsel %vm78_vm0, %v594_v45, %v2977_v53 }
 0x29e   :  { %v674_v33 = vmul.f32 %v2949_v2, %v2988_v47  ;;  %v842_v51 = vmul.f32 %v2965_v55, %v2988_v47  ;;  %v843_v5 = vmul.f32 %v2965_v55, %v3015_v61 }
 0x2a0   :  { %v596_v28 = vpop.permute.xlu1 %595  ;;  %v2992_v14 = vpop.permute.xlu0 %629  ;;  %v706_v38 = vadd.f32 %v694_v49, %v674_v33  ;;  %v862_v49 = vmul.f32 %v2963_v20, %v2875_v46  ;;  %v870_v46 = vmul.f32 %v2969_v18, %v2907_v56 }
 0x2a1   :  { %v2997_v9 = vsel %vm78_vm0, %v2975_v41, %v596_v28  ;;  %v3002_v27 = vsel %vm97_vm1, %v2992_v14, %v634_v44 }
 0x2a2   :  { %4242 = vst [vmem:[#allocation19_spill] sm:$0xff] %v2997_v9  ;;  %4243 = vst [vmem:[#allocation20_spill] sm:$0xff] %v3002_v27  ;;  %v680_v60 = vmul.f32 %v2957_v39, %v2997_v9  ;;  %v726_v58 = vmul.f32 %v2953_v29, %v3002_v27  ;;  %v894_v1 = vmul.f32 %v2967_v21, %v3002_v27 }
 0x2a3   :  { %v848_v45 = vmul.f32 %v2959_v50, %v2997_v9  ;;  %v702_v27 = vmul.f32 %v2961_v35, %v2907_v56 }
 0x2a4   :  { %v3017_v17 = vpop.permute.xlu1 %631  ;;  %v638_v22 = vpop.permute.xlu0 %637  ;;  %v738_v33 = vadd.f32 %v726_v58, %v706_v38  ;;  %v712_v11 = vadd.f32 %v700_v15, %v680_v60  ;;  %v3043_v58 = vsel %vm78_vm0, %v596_v28, %v2979_v10  ;;  %v874_v38 = vadd.f32 %v862_v49, %v842_v51 }
 0x2a5   :  { %v3026_v12 = vsel %vm97_vm1, %v3017_v17, %v636_v16  ;;  %v3036_v6 = vsel %vm97_vm1, %v634_v44, %v638_v22  ;;  %v868_v15 = vmul.f32 %v2969_v18, %v2886_v59  ;;  %v849_v49 = vmul.f32 %v2959_v50, %v3043_v58 }
 0x2a6   :  { %4244 = vst [vmem:[#allocation21_spill] sm:$0xff] %v3026_v12  ;;  %v732_v25 = vmul.f32 %v2955_v31, %v3026_v12  ;;  %4245 = vst [vmem:[#allocation22_spill] sm:$0xff] %v3036_v6  ;;  %921 = vrot.lane.b32.xlu0 %v738_v33, %s2453_s16  ;;  %v900_v0 = vmul.f32 %v2971_v26, %v3026_v12  ;;  %v895_v60 = vmul.f32 %v2967_v21, %v3036_v6 }
 0x2a7   :  { %v906_v51 = vadd.f32 %v894_v1, %v874_v38  ;;  %v863_v33 = vmul.f32 %v2963_v20, %v2857_v40 }
 0x2a8   :  { %v3048_v3 = vpop.permute.xlu1 %639  ;;  %v3050_v4 = vpop.permute.xlu0 %605  ;;  %v744_v44 = vadd.f32 %v732_v25, %v712_v11  ;;  %v880_v11 = vadd.f32 %v868_v15, %v848_v45  ;;  %v675_v25 = vmul.f32 %v2949_v2, %v3015_v61  ;;  %v727_v45 = vmul.f32 %v2953_v29, %v3036_v6 }
 0x2a9   :  { %v3059_v28 = vsel %vm97_vm1, %v636_v16, %v3048_v3  ;;  %v875_v42 = vadd.f32 %v863_v33, %v843_v5  ;;  %v695_v15 = vmul.f32 %v2951_v23, %v2857_v40  ;;  %v681_v5 = vmul.f32 %v2957_v39, %v3043_v58 }
 0x2aa   :  { %4246 = vst [vmem:[#allocation23_spill] sm:$0xff] %v3059_v28  ;;  %923 = vrot.lane.b32.xlu1 %v744_v44, %s2453_s16  ;;  %969 = vrot.lane.b32.xlu0 %v906_v51, %s2455_s17  ;;  %v901_v16 = vmul.f32 %v2971_v26, %v3059_v28  ;;  %v912_v38 = vadd.f32 %v900_v0, %v880_v11 }
 0x2ab   :  { %v907_v44 = vadd.f32 %v895_v60, %v875_v42  ;;  %v881_v51 = vadd.f32 %v869_v13, %v849_v49  ;;  %v707_v33 = vadd.f32 %v695_v15, %v675_v25  ;;  %v733_v0 = vmul.f32 %v2955_v31, %v3059_v28 }
 0x2ac   :  { %v3071_v32 = vpop.permute.xlu1 %607  ;;  %v3073_v1 = vpop.permute.xlu0 %609  ;;  %v701_v60 = vmul.f32 %v2961_v35, %v2864_v8  ;;  %v693_v15 = vmul.f32 %v2951_v23, %v2845_v57  ;;  %v864_v6 = vmul.f32 %v2963_v20, %v2896_v19 }
 0x2ad   :  { %v913_v42 = vadd.f32 %v901_v16, %v881_v51  ;;  %v739_v48 = vadd.f32 %v727_v45, %v707_v33  ;;  %v3124_v51 = vmul.f32 %v2961_v35, %v2850_v63  ;;  %v3128_v33 = vmul.f32 %v2969_v18, %v2850_v63 }
 0x2ae   :  { %971 = vrot.lane.b32.xlu1 %v912_v38, %s2455_s17  ;;  %973 = vrot.lane.b32.xlu0 %v907_v44, %s2455_s17  ;;  %v713_v36 = vadd.f32 %v701_v60, %v681_v5  ;;  %v3120_v5 = vmul.f32 %v2963_v20, %v2845_v57  ;;  %v698_v63 = vmul.f32 %v2951_v23, %v2913_v62 }
 0x2b0   :  { %v3087_v11 = vpop.permute.xlu1 %611  ;;  %v3089_v52 = vpop.permute.xlu0 %645  ;;  %v745_v25 = vadd.f32 %v733_v0, %v713_v36 }
 0x2b2   :  { %975 = vrot.lane.b32.xlu1 %v913_v42, %s2455_s17  ;;  %925 = vrot.lane.b32.xlu0 %v739_v48, %s2453_s16 }
 0x2b4   :  { %v3095_v13 = vpop.permute.xlu1 %647  ;;  %v602_v49 = vpop.permute.xlu0 %601 }
 0x2b5   :  { %v3100_v38 = vsel %vm78_vm0, %v2977_v53, %v602_v49  ;;  %v696_v53 = vmul.f32 %v2951_v23, %v2896_v19  ;;  %v3145_v12 = vsel %vm78_vm0, %v602_v49, %v3050_v4 }
 0x2b6   :  { %927 = vrot.lane.b32.xlu1 %v745_v25, %s2453_s16  ;;  %v676_v16 = vmul.f32 %v2949_v2, %v3100_v38  ;;  %v844_v0 = vmul.f32 %v2965_v55, %v3100_v38  ;;  %v3140_v25 = vmul.f32 %v2963_v20, %v2904_v37 }
 0x2b8   :  { %v604_v45 = vpop.permute.xlu1 %603  ;;  %v642_v44 = vpop.permute.xlu0 %641  ;;  %v708_v60 = vadd.f32 %v696_v53, %v676_v16  ;;  %v3157_v16 = vsel %vm78_vm0, %v3073_v1, %v2973_v54 }
 0x2b9   :  { %v3110_v48 = vsel %vm78_vm0, %v2979_v10, %v604_v45  ;;  %v3114_v36 = vsel %vm97_vm1, %v638_v22, %v642_v44  ;;  %v697_v22 = vmul.f32 %v2951_v23, %v2904_v37  ;;  %v3171_v23 = vsel %vm97_vm1, %v642_v44, %v3089_v52 }
 0x2ba   :  { %4247 = vst [vmem:[#allocation24_spill] sm:$0xff] %v3114_v36  ;;  %v682_v10 = vmul.f32 %v2957_v39, %v3110_v48  ;;  %v728_v42 = vmul.f32 %v2953_v29, %v3114_v36  ;;  %v896_v49 = vmul.f32 %v2967_v21, %v3114_v36  ;;  %v850_v59 = vmul.f32 %v2959_v50, %v3110_v48 }
 0x2bb   :  { %v677_v36 = vmul.f32 %v2949_v2, %v3145_v12  ;;  %v673_v44 = vmul.f32 %v2949_v2, %v3157_v16 }
 0x2bc   :  { %v644_v28 = vpop.permute.xlu1 %643  ;;  %v740_v57 = vadd.f32 %v728_v42, %v708_v60  ;;  %v714_v9 = vadd.f32 %v702_v27, %v682_v10  ;;  %v876_v42 = vadd.f32 %v864_v6, %v844_v0  ;;  %v3185_v60 = vmul.f32 %v2963_v20, %v2913_v62 }
 0x2bd   :  { %v3164_v53 = vsel %vm97_vm1, %v3048_v3, %v644_v28  ;;  %v3180_v3 = vsel %vm78_vm0, %v604_v45, %v3071_v32  ;;  %v729_v6 = vmul.f32 %v2953_v29, %v3171_v23  ;;  %v3204_v20 = vsel %vm97_vm1, %v644_v28, %v3095_v13 }
 0x2be   :  { %v734_v54 = vmul.f32 %v2955_v31, %v3164_v53  ;;  %929 = vrot.lane.b32.xlu0 %v740_v57, %s2453_s16  ;;  %v902_v27 = vmul.f32 %v2971_v26, %v3164_v53  ;;  %v3197_v57 = vsel %vm78_vm0, %v3087_v11, %v2975_v41  ;;  %v908_v45 = vadd.f32 %v896_v49, %v876_v42 }
 0x2bf   :  { %v683_v0 = vmul.f32 %v2957_v39, %v3180_v3  ;;  %v703_v41 = vmul.f32 %v2961_v35, %v2915_v34  ;;  %v3221_v28 = vsel %vm97_vm1, %v2981_v7, %v2992_v14  ;;  %v704_v49 = vmul.f32 %v2961_v35, %v2922_v30 }
 0x2c0   :  { %v746_v10 = vadd.f32 %v734_v54, %v714_v9  ;;  %v3210_v9 = vsel %vm78_vm0, %v3050_v4, %v3073_v1  ;;  %v882_v54 = vadd.f32 %v870_v46, %v850_v59  ;;  %v871_v4 = vmul.f32 %v2969_v18, %v2915_v34 }
 0x2c1   :  { %v709_v1 = vadd.f32 %v697_v22, %v677_v36  ;;  %v3232_v46 = vsel %vm97_vm1, %v2983_v43, %v3017_v17  ;;  %v679_v59 = vmul.f32 %v2957_v39, %v3197_v57  ;;  %v735_v14 = vmul.f32 %v2955_v31, %v3204_v20 }
 0x2c2   :  { %931 = vrot.lane.b32.xlu1 %v746_v10, %s2453_s16  ;;  %977 = vrot.lane.b32.xlu0 %v908_v45, %s2455_s17  ;;  %v914_v42 = vadd.f32 %v902_v27, %v882_v54  ;;  %v678_v35 = vmul.f32 %v2949_v2, %v3210_v9  ;;  %v872_v10 = vmul.f32 %v2969_v18, %v2922_v30 }
 0x2c3   :  { %v741_v36 = vadd.f32 %v729_v6, %v709_v1  ;;  %v705_v22 = vadd.f32 %v693_v15, %v673_v44  ;;  %v841_v45 = vmul.f32 %v2965_v55, %v3157_v16  ;;  %v3248_v17 = vsel %vm78_vm0, %v3071_v32, %v3087_v11 }
 0x2c4   :  { %v3254_v27 = vsel %vm97_vm1, %v3089_v52, %v2981_v7  ;;  %v715_v2 = vadd.f32 %v703_v41, %v683_v0  ;;  %v725_v18 = vmul.f32 %v2953_v29, %v3221_v28  ;;  %v893_v15 = vmul.f32 %v2967_v21, %v3221_v28 }
 0x2c5   :  { %v731_v44 = vmul.f32 %v2955_v31, %v3232_v46  ;;  %v847_v32 = vmul.f32 %v2959_v50, %v3197_v57  ;;  %v846_v52 = vmul.f32 %v2965_v55, %v3210_v9  ;;  %v711_v7 = vadd.f32 %v3124_v51, %v679_v59 }
 0x2c6   :  { %979 = vrot.lane.b32.xlu1 %v914_v42, %s2455_s17  ;;  %933 = vrot.lane.b32.xlu0 %v741_v36, %s2453_s16  ;;  %v3273_v11 = vsel %vm97_vm1, %v3095_v13, %v2983_v43  ;;  %v747_v6 = vadd.f32 %v735_v14, %v715_v2  ;;  %v684_v0 = vmul.f32 %v2957_v39, %v3248_v17 }
 0x2c7   :  { %v852_v41 = vmul.f32 %v2959_v50, %v3248_v17  ;;  %v730_v54 = vmul.f32 %v2953_v29, %v3254_v27  ;;  %v737_v42 = vadd.f32 %v725_v18, %v705_v22  ;;  %v845_v51 = vmul.f32 %v2965_v55, %v3145_v12 }
 0x2c8   :  { %v851_v59 = vmul.f32 %v2959_v50, %v3180_v3  ;;  %v710_v43 = vadd.f32 %v698_v63, %v678_v35  ;;  %v873_v13 = vadd.f32 %v3120_v5, %v841_v45  ;;  %v879_v39 = vadd.f32 %v3128_v33, %v847_v32 }
 0x2c9   :  { %v751_v1 = vpop.permute.xlu0 %750  ;;  %v898_v14 = vmul.f32 %v2967_v21, %v3254_v27  ;;  %v736_v29 = vmul.f32 %v2955_v31, %v3273_v11  ;;  %v904_v36 = vmul.f32 %v2971_v26, %v3273_v11  ;;  %v899_v50 = vmul.f32 %v2971_v26, %v3232_v46 }
 0x2ca   :  { %935 = vrot.lane.b32.xlu1 %v747_v6, %s2453_s16  ;;  %917 = vrot.lane.b32.xlu0 %v737_v42, %s2453_s16  ;;  %v897_v63 = vmul.f32 %v2967_v21, %v3171_v23  ;;  %v903_v55 = vmul.f32 %v2971_v26, %v3204_v20  ;;  %v743_v5 = vadd.f32 %v731_v44, %v711_v7 }
 0x2cb   :  { %v716_v33 = vadd.f32 %v704_v49, %v684_v0  ;;  %v884_v35 = vadd.f32 %v872_v10, %v852_v41  ;;  %v742_v45 = vadd.f32 %v730_v54, %v710_v43  ;;  %v878_v31 = vadd.f32 %v3185_v60, %v846_v52  ;;  %v4251_v43 = vld [vmem:[#allocation10_spill] sm:$0xff] }
 0x2cc   :  { %v883_v2 = vadd.f32 %v871_v4, %v851_v59  ;;  %v905_v18 = vadd.f32 %v893_v15, %v873_v13  ;;  %v877_v32 = vadd.f32 %v3140_v25, %v845_v51  ;;  %v911_v42 = vadd.f32 %v899_v50, %v879_v39  ;;  %v4249_v51 = vld [vmem:[#allocation19_spill] sm:$0xff]  ;;  %v4250_v59 = vld [vmem:[#allocation17_spill] sm:$0xff] }
 0x2cd   :  { %v755_v22 = vpop.permute.xlu1 %754  ;;  %v748_v21 = vadd.f32 %v736_v29, %v716_v33  ;;  %v910_v24 = vadd.f32 %v898_v14, %v878_v31  ;;  %v3305_v26 = vadd.f32 %v904_v36, %v884_v35  ;;  %v759_v44 = vmul.f32 %v751_v1, %v3015_v61  ;;  %v4252_v14 = vld [vmem:[#allocation11_spill] sm:$0xff]  ;;  %v4255_v35 = vld [vmem:[#allocation20_spill] sm:$0xff] }
 0x2ce   :  { %919 = vrot.lane.b32.xlu1 %v743_v5, %s2453_s16  ;;  %937 = vrot.lane.b32.xlu0 %v742_v45, %s2453_s16  ;;  %v775_v6 = vpop.permute.xlu0 %774  ;;  %v909_v49 = vadd.f32 %v897_v63, %v877_v32  ;;  %v915_v10 = vadd.f32 %v903_v55, %v883_v2  ;;  %v760_v60 = vmul.f32 %v751_v1, %v3100_v38 }
 0x2cf   :  { %v761_v4 = vmul.f32 %v751_v1, %v3145_v12  ;;  %v758_v15 = vmul.f32 %v751_v1, %v2988_v47  ;;  %v757_v25 = vmul.f32 %v751_v1, %v3157_v16  ;;  %v762_v52 = vmul.f32 %v751_v1, %v3210_v9  ;;  %v4248_v16 = vld [vmem:[#allocation14_spill] sm:$0xff] }
 0x2d0   :  { %v765_v0 = vmul.f32 %v755_v22, %v3043_v58  ;;  %v785_v41 = vmul.f32 %v775_v6, %v2864_v8  ;;  %v766_v54 = vmul.f32 %v755_v22, %v3110_v48  ;;  %v786_v61 = vmul.f32 %v775_v6, %v2907_v56 }
 0x2d1   :  { %v767_v1 = vmul.f32 %v755_v22, %v3180_v3  ;;  %v787_v58 = vmul.f32 %v775_v6, %v2915_v34  ;;  %v764_v8 = vmul.f32 %v755_v22, %v4249_v51  ;;  %v784_v48 = vmul.f32 %v775_v6, %v4250_v59 }
 0x2d2   :  { %v771_v7 = vpop.permute.xlu1 %770  ;;  %939 = vrot.lane.b32.xlu1 %v748_v21, %s2453_s16  ;;  %965 = vrot.lane.b32.xlu0 %v905_v18, %s2455_s17  ;;  %v798_v39 = vadd.f32 %v786_v61, %v766_v54  ;;  %v783_v3 = vmul.f32 %v775_v6, %v4252_v14  ;;  %v788_v34 = vmul.f32 %v775_v6, %v2922_v30  ;;  %v4263_v51 = vmov 8   ;;  %v2391_v14 = vld [vmem:[%s4164_s0 + $0x18] sm:$0xff] }
 0x2d3   :  { %v779_v12 = vmul.f32 %v771_v7, %v2857_v40  ;;  %v780_v47 = vmul.f32 %v771_v7, %v2896_v19  ;;  %v781_v38 = vmul.f32 %v771_v7, %v2904_v37  ;;  %v778_v9 = vmul.f32 %v771_v7, %v4248_v16 }
 0x2d4   :  { %v777_v56 = vmul.f32 %v771_v7, %v4251_v43  ;;  %v782_v13 = vmul.f32 %v771_v7, %v2913_v62  ;;  %v763_v40 = vmul.f32 %v755_v22, %v3197_v57  ;;  %v768_v19 = vmul.f32 %v755_v22, %v3248_v17  ;;  %v4253_v62 = vld [vmem:[#allocation22_spill] sm:$0xff]  ;;  %v4254_v57 = vld [vmem:[#allocation24_spill] sm:$0xff] }
 0x2d5   :  { %v797_v37 = vadd.f32 %v785_v41, %v765_v0  ;;  %v791_v36 = vadd.f32 %v779_v12, %v759_v44  ;;  %v792_v50 = vadd.f32 %v780_v47, %v760_v60  ;;  %v793_v63 = vadd.f32 %v781_v38, %v761_v4  ;;  %v3385_v47 = vld [vmem:[%s4172_s8] sm:$0xff] }
 0x2d6   :  { %967 = vrot.lane.b32.xlu1 %v911_v42, %s2455_s17  ;;  %981 = vrot.lane.b32.xlu0 %v909_v49, %s2455_s17  ;;  %v790_v55 = vadd.f32 %v778_v9, %v758_v15  ;;  %v789_v45 = vadd.f32 %v777_v56, %v757_v25  ;;  %v794_v31 = vadd.f32 %v782_v13, %v762_v52  ;;  %v4257_v15 = vld [vmem:[#allocation21_spill] sm:$0xff]  ;;  %v4258_v38 = vmov 1  }
 0x2d7   :  { %v803_v29 = vpop.permute.xlu1 %802  ;;  %v799_v42 = vadd.f32 %v787_v58, %v767_v1  ;;  %v796_v49 = vadd.f32 %v784_v48, %v764_v8  ;;  %v800_v0 = vadd.f32 %v788_v34, %v768_v19  ;;  %v4259_v16 = vmov 6  }
 0x2d8   :  { %v811_v5 = vmul.f32 %v803_v29, %v4253_v62  ;;  %v812_v33 = vmul.f32 %v803_v29, %v4254_v57  ;;  %v813_v17 = vmul.f32 %v803_v29, %v3171_v23  ;;  %v810_v22 = vmul.f32 %v803_v29, %v4255_v35 }
 0x2d9   :  { %v809_v2 = vmul.f32 %v803_v29, %v3221_v28  ;;  %v814_v30 = vmul.f32 %v803_v29, %v3254_v27  ;;  %v4256_v27 = vld [vmem:[#allocation23_spill] sm:$0xff]  ;;  %v4260_v9 = vmov 2   ;;  %v4261_v1 = vmov 7  }
 0x2da   :  { %983 = vrot.lane.b32.xlu1 %v915_v10, %s2455_s17  ;;  %v3342_v18 = vadd.f32 %v811_v5, %v791_v36  ;;  %v3344_v32 = vadd.f32 %v812_v33, %v792_v50  ;;  %v3346_v6 = vadd.f32 %v813_v17, %v793_v63  ;;  %v3348_v21 = vadd.f32 %v810_v22, %v790_v55 }
 0x2db   :  { %985 = vrot.lane.b32.xlu0 %v910_v24, %s2455_s17  ;;  %v807_v23 = vpop.permute.xlu1 %806  ;;  %v3351_v44 = vadd.f32 %v809_v2, %v789_v45  ;;  %v3353_v28 = vadd.f32 %v814_v30, %v794_v31  ;;  %v795_v24 = vadd.f32 %v783_v3, %v763_v40  ;;  %v4262_v58 = vmov 3  }
 0x2dc   :  { %v817_v60 = vmul.f32 %v807_v23, %v4256_v27  ;;  %v818_v10 = vmul.f32 %v807_v23, %v3164_v53  ;;  %v819_v4 = vmul.f32 %v807_v23, %v3204_v20  ;;  %v816_v25 = vmul.f32 %v807_v23, %v4257_v15  ;;  %v1015_v53 = vld [vmem:[%s4171_s7] sm:$0xff] }
 0x2dd   :  { %v815_v52 = vmul.f32 %v807_v23, %v3232_v46  ;;  %v820_v7 = vmul.f32 %v807_v23, %v3273_v11  ;;  %v1016_v11 = vld [vmem:[%s4171_s7 + $0x8] sm:$0xff] }
 0x2de   :  { %987 = vrot.lane.b32.xlu1 %v3305_v26, %s2455_s17  ;;  %v829_v41 = vadd.f32 %v817_v60, %v797_v37  ;;  %v3363_v54 = vadd.f32 %v818_v10, %v798_v39  ;;  %v3365_v61 = vadd.f32 %v819_v4, %v799_v42  ;;  %v828_v12 = vadd.f32 %v816_v25, %v796_v49  ;;  %v3380_v26 = vld [vmem:[%s4172_s8 + $0x8] sm:$0xff] }
 0x2df   :  { %v3370_v20 = vadd.f32 %v815_v52, %v795_v24  ;;  %v3372_v46 = vadd.f32 %v820_v7, %v800_v0  ;;  %1019 = vperm.xlu0 %2370, %v1015_v53  }
 0x2e2   :  { %1024 = vperm.xlu1 %2371, %v1016_v11  }
 0x2e3   :  { %1382 = vperm.xlu0 %2370, %v3380_v26  }
 0x2e6   :  { %1377 = vperm.xlu1 %2371, %v3385_v47  }
 0x2e7   :  { %2373 = vset.pattern.permute.xlu0 %v4258_v38 }
 0x2e8   :  { %1402 = vperm.xlu0 %2373, %v3380_v26  }
 0x2ea   :  { %2372 = vset.pattern.permute.xlu1 %v4258_v38 }
 0x2eb   :  { %1398 = vperm.xlu1 %2372, %v3385_v47  }
 0x2ec   :  { %2375 = vset.pattern.permute.xlu0 %v4259_v16 }
 0x2ed   :  { %1546 = vperm.xlu0 %2375, %v3385_v47  }
 0x2ef   :  { %2374 = vset.pattern.permute.xlu1 %v4260_v9 }
 0x2f0   :  { %1430 = vperm.xlu1 %2374, %v3385_v47  }
 0x2f1   :  { %2378 = vset.pattern.permute.xlu0 %v4261_v1 }
 0x2f2   :  { %1570 = vperm.xlu0 %2378, %v3380_v26  }
 0x2f4   :  { %1434 = vperm.xlu1 %2374, %v3380_v26  }
 0x2f6   :  { %2380 = vset.pattern.permute.xlu0 %v4262_v58 }
 0x2f8   :  { %2376 = vset.pattern.permute.xlu1 %v4259_v16 }
 0x2f9   :  { %1550 = vperm.xlu1 %2376, %v3380_v26  }
 0x2fd   :  { %2377 = vset.pattern.permute.xlu1 %v4261_v1 }
 0x2fe   :  { %1566 = vperm.xlu1 %2377, %v3385_v47  }
 0x302   :  { %2379 = vset.pattern.permute.xlu1 %v4263_v51 }
 0x303   :  { %1598 = vperm.xlu1 %2379, %v3385_v47  }
 0x307   :  { %1602 = vperm.xlu1 %2379, %v3380_v26  }
 0x30b   :  { %2381 = vset.pattern.permute.xlu1 %v4262_v58 }
 0x318   :  { %v922_v8 = vpop.permute.xlu0 %921 }
 0x31c   :  { %v924_v59 = vpop.permute.xlu1 %923  ;;  %v970_v48 = vpop.permute.xlu0 %969 }
 0x320   :  { %v972_v43 = vpop.permute.xlu1 %971  ;;  %v974_v56 = vpop.permute.xlu0 %973 }
 0x321   :  { %v995_v42 = vsel %vm269_vm3, %v970_v48, %v974_v56 }
 0x324   :  { %v976_v13 = vpop.permute.xlu1 %975  ;;  %v926_v40 = vpop.permute.xlu0 %925 }
 0x325   :  { %v947_v3 = vsel %vm244_vm2, %v922_v8, %v926_v40  ;;  %v996_v49 = vsel %vm269_vm3, %v972_v43, %v976_v13 }
 0x326   :  { %v955_v50 = vadd.f32 %v947_v3, %v3342_v18 }
 0x328   :  { %v928_v19 = vpop.permute.xlu1 %927 }
 0x329   :  { %v948_v34 = vsel %vm244_vm2, %v924_v59, %v928_v19 }
 0x32a   :  { %v961_v63 = vadd.f32 %v948_v34, %v829_v41 }
 0x330   :  { %v930_v37 = vpop.permute.xlu0 %929 }
 0x331   :  { %v945_v41 = vsel %vm244_vm2, %v926_v40, %v930_v37  ;;  %v1013_v40 = vld [vmem:[%s4170_s6] sm:$0xff] }
 0x334   :  { %v932_v39 = vpop.permute.xlu1 %931  ;;  %v978_v29 = vpop.permute.xlu0 %977 }
 0x335   :  { %v993_v36 = vsel %vm269_vm3, %v974_v56, %v978_v29 }
 0x336   :  { %v3418_v57 = vadd.f32 %v993_v36, %v955_v50 }
 0x338   :  { %v980_v55 = vpop.permute.xlu1 %979  ;;  %v934_v5 = vpop.permute.xlu0 %933 }
 0x339   :  { %v994_v62 = vsel %vm269_vm3, %v976_v13, %v980_v55  ;;  %v943_v1 = vsel %vm244_vm2, %v930_v37, %v934_v5 }
 0x33a   :  { %v3420_v33 = vadd.f32 %v994_v62, %v961_v63 }
 0x33c   :  { %v2310_v17 = vpack.c.bf16 %v3420_v33, %v3418_v57  ;;  %v936_v35 = vpop.permute.xlu1 %935  ;;  %v918_v22 = vpop.permute.xlu0 %917 }
 0x33d   :  { %v949_v45 = vsel %vm244_vm2, %v918_v22, %v922_v8  ;;  %v944_v8 = vsel %vm244_vm2, %v932_v39, %v936_v35 }
 0x33e   :  { %v954_v31 = vadd.f32 %v949_v45, %v3348_v21 }
 0x340   :  { %v920_v2 = vpop.permute.xlu1 %919  ;;  %v938_v18 = vpop.permute.xlu0 %937  ;;  %v1002_v27 = vadd.f32 %v995_v42, %v954_v31 }
 0x341   :  { %v950_v30 = vsel %vm244_vm2, %v920_v2, %v924_v59  ;;  %v951_v4 = vsel %vm244_vm2, %v938_v18, %v918_v22  ;;  %v941_v59 = vsel %vm244_vm2, %v934_v5, %v938_v18 }
 0x342   :  { %v960_v23 = vadd.f32 %v950_v30, %v828_v12  ;;  %v953_v7 = vadd.f32 %v951_v4, %v3351_v44  ;;  %v946_v12 = vsel %vm244_vm2, %v928_v19, %v932_v39  ;;  %v956_v44 = vadd.f32 %v945_v41, %v3344_v32 }
 0x343   :  { %v957_v19 = vadd.f32 %v943_v1, %v3346_v6  ;;  %v963_v39 = vadd.f32 %v944_v8, %v3365_v61  ;;  %v958_v3 = vadd.f32 %v941_v59, %v3353_v28  ;;  %v4265_v61 = vmov 0.0   ;;  %v1014_v28 = vld [vmem:[%s4170_s6 + $0x8] sm:$0xff] }
 0x344   :  { %v1008_v60 = vadd.f32 %v996_v49, %v960_v23  ;;  %v940_v10 = vpop.permute.xlu1 %939  ;;  %v966_v15 = vpop.permute.xlu0 %965 }
 0x345   :  { %v952_v21 = vsel %vm244_vm2, %v940_v10, %v920_v2  ;;  %v997_v52 = vsel %vm269_vm3, %v966_v15, %v970_v48  ;;  %v942_v48 = vsel %vm244_vm2, %v936_v35, %v940_v10 }
 0x346   :  { %v2304_v25 = vpack.c.bf16 %v1008_v60, %v1002_v27  ;;  %v959_v24 = vadd.f32 %v952_v21, %v3370_v20  ;;  %v1001_v38 = vadd.f32 %v997_v52, %v953_v7  ;;  %v962_v20 = vadd.f32 %v946_v12, %v3363_v54  ;;  %v4266_v60 = vld [vmem:[#allocation12_spill] sm:$0xff] }
 0x347   :  { %v964_v34 = vadd.f32 %v942_v48, %v3372_v46 }
 0x348   :  { %v968_v0 = vpop.permute.xlu1 %967  ;;  %2305 = vmatprep.subr.bf16.mxu1 %v2304_v25  ;;  %v982_v11 = vpop.permute.xlu0 %981 }
 0x349   :  { %v998_v53 = vsel %vm269_vm3, %v968_v0, %v972_v43  ;;  %v991_v9 = vsel %vm269_vm3, %v978_v29, %v982_v11 }
 0x34a   :  { %v1007_v16 = vadd.f32 %v998_v53, %v959_v24  ;;  %v1004_v56 = vadd.f32 %v991_v9, %v956_v44 }
 0x34c   :  { %v2306_v58 = vpack.c.bf16 %v1007_v16, %v1001_v38  ;;  %v984_v51 = vpop.permute.xlu1 %983 }
 0x34d   :  { %v992_v43 = vsel %vm269_vm3, %v980_v55, %v984_v51  ;;  %v986_v32 = vpop.permute.xlu0 %985 }
 0x34e   :  { %v1010_v54 = vadd.f32 %v992_v43, %v962_v20  ;;  %v989_v13 = vsel %vm269_vm3, %v982_v11, %v986_v32  ;;  %2307 = vmatpush1.bf16.msra.mxu1 %v2306_v58  ;;  %v999_v37 = vsel %vm269_vm3, %v986_v32, %v966_v15  ;;  %v4267_v11 = vld [vmem:[#allocation15_spill] sm:$0xff] }
 0x34f   :  { %v1005_v50 = vadd.f32 %v989_v13, %v957_v19  ;;  %v1006_v6 = vadd.f32 %v999_v37, %v958_v3 }
 0x350   :  { %v988_v29 = vpop.permute.xlu1 %987  ;;  %v2308_v36 = vpack.c.bf16 %v1010_v54, %v1004_v56 }
 0x351   :  { %v990_v63 = vsel %vm269_vm3, %v984_v51, %v988_v29  ;;  %v1000_v55 = vsel %vm269_vm3, %v988_v29, %v968_v0  ;;  %2286 = vmatmul.mubr.msk.f32.vlgmr.msra.gmra.mrb[4].mxu1 %vm1027_vm5, %v1013_v40  ;;  %v4269_v51 = vld [vmem:[#allocation9_spill] sm:$0xff] }
 0x352   :  { %v1011_v62 = vadd.f32 %v990_v63, %v963_v39  ;;  %v1012_v5 = vadd.f32 %v1000_v55, %v964_v34  ;;  %2309 = vmatprep.subr.bf16.mxu0 %v2308_v36  ;;  %1104 = vmatprep.mubr.f32.mxu1 %v4265_v61  ;;  %v4274_v55 = vld [vmem:[#allocation16_spill] sm:$0xff] }
 0x353   :  { %2311 = vmatpush1.bf16.msra.mxu0 %v2310_v17 }
 0x354   :  { %v2314_v46 = vpack.c.bf16 %v1011_v62, %v1005_v50  ;;  %v2312_v57 = vpack.c.bf16 %v1012_v5, %v1006_v6 }
 0x355   :  { %2287 = vmatmul.mubr.msk.f32.gmra.mrb[6].mxu1 %vm1027_vm5, %v1014_v28 }
 0x356   :  { %2288 = vmatmul.mubr.msk.f32.vlgmr.msra.gmra.mrb[8].mxu0 %vm1027_vm5, %v1013_v40  ;;  %2313 = vmatprep.subr.bf16.mxu1 %v2312_v57 }
 0x357   :  { %2315 = vmatpush1.bf16.msra.mxu1 %v2314_v46  ;;  %1181 = vmatprep.mubr.f32.mxu0 %v4265_v61 }
 0x358   :  { %1252 = vmatprep.mubr.f32.mxu1 %v4265_v61 }
 0x35a   :  { %2289 = vmatmul.mubr.msk.f32.gmra.mrb[10].mxu0 %vm1027_vm5, %v1014_v28  ;;  %2290 = vmatmul.mubr.msk.f32.vlgmr.msra.gmra.mrb[8].mxu1 %vm1027_vm5, %v1013_v40  ;;  %v4271_v40 = vld [vmem:[#allocation13_spill] sm:$0xff] }
 0x35b   :  { %1258 = vmatprep.mubr.f32.mxu1 %v4265_v61  ;;  %1809 = vmatprep.mubr.f32.mxu0 %v4265_v61 }
 0x35e   :  { %2291 = vmatmul.mubr.msk.f32.gmra.mrb[10].mxu1 %vm1027_vm5, %v1014_v28  ;;  %v1020_v35 = vpop.permute.xlu0 %1019 }
 0x35f   :  { %1886 = vmatprep.mubr.f32.mxu1 %v4265_v61 }
 0x361   :  { %v1025_v18 = vpop.permute.xlu1 %1024 }
 0x424   :  { %v1100_v33 = vpop.f32.mrb[4].mxu1 }
 0x425   :  { %v1102_v17 = vpop.f32.mrb[5].mxu1  ;;  %v1101_v53 = vadd.f32 %v1100_v33, %v1020_v35 }
 0x426   :  { %v1103_v59 = vadd.f32 %v1102_v17, %v1020_v35  ;;  %v4275_v17 = vld [vmem:[#allocation18_spill] sm:$0xff] }
 0x427   :  { %v1265_v44 = vmax.f32 %v1101_v53, 0.0 }
 0x428   :  { %v1106_v22 = vpop.f32.mrb[6].mxu1  ;;  %v1266_v56 = vmax.f32 %v1103_v59, 0.0 }
 0x429   :  { %v1177_v45 = vpop.f32.mrb[8].mxu0  ;;  %v1108_v31 = vpop.f32.mrb[7].mxu1  ;;  %v1107_v1 = vadd.f32 %v1106_v22, %v1025_v18  ;;  %v1277_v8 = vmul.f32 %v1265_v44, %v4269_v51 }
 0x42a   :  { %v1178_v2 = vadd.f32 %v1177_v45, %v1020_v35  ;;  %v1179_v30 = vpop.f32.mrb[9].mxu0  ;;  %v1109_v13 = vadd.f32 %v1108_v31, %v1025_v18  ;;  %v1278_v19 = vmul.f32 %v1266_v56, %v4271_v40 }
 0x42b   :  { %v1180_v42 = vadd.f32 %v1179_v30, %v1020_v35  ;;  %v1271_v48 = vmax.f32 %v1107_v1, 0.0  ;;  %v3518_v32 = vmax.f32 %v1277_v8, 0.0 }
 0x42c   :  { %v1267_v23 = vmax.f32 %v1178_v2, 0.0  ;;  %v1272_v39 = vmax.f32 %v1109_v13, 0.0  ;;  %v3532_v34 = vmax.f32 %v1278_v19, 0.0 }
 0x42d   :  { %v1183_v49 = vpop.f32.mrb[10].mxu0  ;;  %v1254_v27 = vpop.f32.mrb[8].mxu1  ;;  %v1268_v52 = vmax.f32 %v1180_v42, 0.0  ;;  %4270 = vst [vmem:[#allocation19_spill] sm:$0xff] %v3518_v32  ;;  %v1283_v54 = vmul.f32 %v1271_v48, %v4269_v51  ;;  %v4278_v42 = vmov 5  }
 0x42e   :  { %v1279_v10 = vmul.f32 %v1267_v23, %v4266_v60  ;;  %v1184_v4 = vadd.f32 %v1183_v49, %v1025_v18  ;;  %v1185_v21 = vpop.f32.mrb[11].mxu0  ;;  %v1256_v15 = vpop.f32.mrb[9].mxu1  ;;  %v1255_v3 = vadd.f32 %v1254_v27, %v1020_v35  ;;  %4272 = vst [vmem:[#allocation17_spill] sm:$0xff] %v3532_v34  ;;  %v1284_v29 = vmul.f32 %v1272_v39, %v4271_v40 }
 0x42f   :  { %v1186_v24 = vadd.f32 %v1185_v21, %v1025_v18  ;;  %v1280_v38 = vmul.f32 %v1268_v52, %v4267_v11  ;;  %v3526_v37 = vmax.f32 %v1283_v54, 0.0  ;;  %v1257_v62 = vadd.f32 %v1256_v15, %v1020_v35  ;;  %v3586_v49 = vpop.permute.xlu1 %1377 }
 0x430   :  { %v3492_v25 = vmax.f32 %v1279_v10, 0.0  ;;  %v1273_v7 = vmax.f32 %v1184_v4, 0.0  ;;  %v1269_v36 = vmax.f32 %v1255_v3, 0.0  ;;  %v3539_v63 = vmax.f32 %v1284_v29, 0.0  ;;  %v3594_v4 = vpop.permute.xlu0 %1382 }
 0x431   :  { %v1260_v0 = vpop.f32.mrb[10].mxu1  ;;  %v1274_v9 = vmax.f32 %v1186_v24, 0.0  ;;  %v3504_v20 = vmax.f32 %v1280_v38, 0.0  ;;  %v1270_v46 = vmax.f32 %v1257_v62, 0.0  ;;  %v4277_v23 = vmov 0  }
 0x432   :  { %v1285_v41 = vmul.f32 %v1273_v7, %v4266_v60  ;;  %v1262_v12 = vpop.f32.mrb[11].mxu1  ;;  %1309 = vrot.lane.b32.xlu0 %v3492_v25, %s2448_s23  ;;  %v1261_v50 = vadd.f32 %v1260_v0, %v1025_v18  ;;  %4273 = vst [vmem:[#allocation10_spill] sm:$0xff] %v3539_v63  ;;  %v1281_v6 = vmul.f32 %v1269_v36, %v4274_v55 }
 0x433   :  { %4268 = vst [vmem:[#allocation14_spill] sm:$0xff] %v3504_v20  ;;  %v1286_v58 = vmul.f32 %v1274_v9, %v4267_v11  ;;  %v1263_v33 = vadd.f32 %v1262_v12, %v1025_v18  ;;  %v1282_v35 = vmul.f32 %v1270_v46, %v4275_v17  ;;  %v4276_v18 = vmov 4   ;;  %v3588_v27 = vpop.permute.xlu1 %1398 }
 0x434   :  { %v3498_v16 = vmax.f32 %v1285_v41, 0.0  ;;  %v1275_v5 = vmax.f32 %v1261_v50, 0.0  ;;  %v3546_v28 = vmax.f32 %v1281_v6, 0.0  ;;  %v3598_v15 = vpop.permute.xlu0 %1402  ;;  %v1406_v13 = vmul.f32 %v3588_v27, %v3532_v34 }
 0x435   :  { %v3512_v43 = vmax.f32 %v1286_v58, 0.0  ;;  %v1276_v45 = vmax.f32 %v1263_v33, 0.0  ;;  %v3560_v31 = vmax.f32 %v1282_v35, 0.0 }
 0x436   :  { %1311 = vrot.lane.b32.xlu1 %v3498_v16, %s2448_s23  ;;  %1345 = vrot.lane.b32.xlu0 %v3492_v25, %s2451_s30  ;;  %v1287_v57 = vmul.f32 %v1275_v5, %v4274_v55  ;;  %v1407_v55 = vmul.f32 %v3588_v27, %v3492_v25 }
 0x437   :  { %v1288_v2 = vmul.f32 %v1276_v45, %v4275_v17  ;;  %v3590_v60 = vpop.permute.xlu1 %1430 }
 0x438   :  { %v3554_v22 = vmax.f32 %v1287_v57, 0.0  ;;  %v1412_v57 = vmul.f32 %v3598_v15, %v3539_v63 }
 0x439   :  { %v3567_v30 = vmax.f32 %v1288_v2, 0.0 }
 0x43a   :  { %1347 = vrot.lane.b32.xlu1 %v3498_v16, %s2451_s30  ;;  %1313 = vrot.lane.b32.xlu0 %v3504_v20, %s2448_s23 }
 0x43b   :  { %v3592_v10 = vpop.permute.xlu1 %1434 }
 0x43e   :  { %1315 = vrot.lane.b32.xlu1 %v3512_v43, %s2448_s23  ;;  %1349 = vrot.lane.b32.xlu0 %v3504_v20, %s2451_s30 }
 0x43f   :  { %v3596_v21 = vpop.permute.xlu1 %1550 }
 0x442   :  { %1351 = vrot.lane.b32.xlu1 %v3512_v43, %s2451_s30  ;;  %1301 = vrot.lane.b32.xlu0 %v3518_v32, %s2448_s23 }
 0x443   :  { %v3600_v52 = vpop.permute.xlu1 %1566 }
 0x446   :  { %1303 = vrot.lane.b32.xlu1 %v3526_v37, %s2448_s23  ;;  %1337 = vrot.lane.b32.xlu0 %v3518_v32, %s2451_s30 }
 0x44a   :  { %1339 = vrot.lane.b32.xlu1 %v3526_v37, %s2451_s30  ;;  %1305 = vrot.lane.b32.xlu0 %v3532_v34, %s2448_s23 }
 0x44e   :  { %1307 = vrot.lane.b32.xlu1 %v3539_v63, %s2448_s23  ;;  %1341 = vrot.lane.b32.xlu0 %v3532_v34, %s2451_s30 }
 0x452   :  { %1343 = vrot.lane.b32.xlu1 %v3539_v63, %s2451_s30  ;;  %1317 = vrot.lane.b32.xlu0 %v3546_v28, %s2448_s23 }
 0x456   :  { %1319 = vrot.lane.b32.xlu1 %v3554_v22, %s2448_s23  ;;  %1353 = vrot.lane.b32.xlu0 %v3546_v28, %s2451_s30 }
 0x45a   :  { %1355 = vrot.lane.b32.xlu1 %v3554_v22, %s2451_s30  ;;  %1321 = vrot.lane.b32.xlu0 %v3560_v31, %s2448_s23 }
 0x45e   :  { %1323 = vrot.lane.b32.xlu1 %v3567_v30, %s2448_s23  ;;  %1357 = vrot.lane.b32.xlu0 %v3560_v31, %s2451_s30 }
 0x462   :  { %1359 = vrot.lane.b32.xlu1 %v3567_v30, %s2451_s30  ;;  %1462 = vperm.xlu0 %2380, %v3385_v47  }
 0x466   :  { %1466 = vperm.xlu1 %2381, %v3380_v26   ;;  %2383 = vset.pattern.permute.xlu0 %v4276_v18 }
 0x467   :  { %1486 = vperm.xlu0 %2383, %v3380_v26  }
 0x46a   :  { %2382 = vset.pattern.permute.xlu1 %v4276_v18  ;;  %v1413_v18 = vmul.f32 %v3598_v15, %v3498_v16 }
 0x46b   :  { %1482 = vperm.xlu1 %2382, %v3385_v47   ;;  %2385 = vset.pattern.permute.xlu0 %v4277_v23 }
 0x46f   :  { %2384 = vset.pattern.permute.xlu1 %v4278_v42 }
 0x470   :  { %1514 = vperm.xlu1 %2384, %v3385_v47   ;;  %v3602_v47 = vpop.permute.xlu0 %1546 }
 0x474   :  { %1518 = vperm.xlu1 %2384, %v3380_v26   ;;  %v3604_v26 = vpop.permute.xlu1 %1598  ;;  %v3606_v7 = vpop.permute.xlu0 %1570 }
 0x478   :  { %2386 = vset.pattern.permute.xlu1 %v4277_v23  ;;  %v3608_v24 = vpop.permute.xlu1 %1602 }
 0x4a4   :  { %v1310_v0 = vpop.permute.xlu0 %1309 }
 0x4a8   :  { %v3610_v41 = vpop.permute.xlu1 %1311  ;;  %v1346_v12 = vpop.permute.xlu0 %1345 }
 0x4ac   :  { %v1348_v53 = vpop.permute.xlu1 %1347  ;;  %v3612_v11 = vpop.permute.xlu0 %1313 }
 0x4b0   :  { %v3614_v38 = vpop.permute.xlu1 %1315  ;;  %v1350_v9 = vpop.permute.xlu0 %1349 }
 0x4b1   :  { %v3666_v5 = vsel %vm97_vm1, %v1346_v12, %v1350_v9 }
 0x4b2   :  { %4281 = vst [vmem:[#allocation24_spill] sm:$0xff] %v3666_v5 }
 0x4b4   :  { %v3616_v44 = vpop.permute.xlu1 %1351  ;;  %v3618_v1 = vpop.permute.xlu0 %1301 }
 0x4b8   :  { %v3620_v58 = vpop.permute.xlu1 %1303  ;;  %v3622_v51 = vpop.permute.xlu0 %1337 }
 0x4bc   :  { %v3624_v8 = vpop.permute.xlu1 %1339  ;;  %v1306_v59 = vpop.permute.xlu0 %1305 }
 0x4bd   :  { %v3629_v48 = vsel %vm78_vm0, %v3618_v1, %v1306_v59  ;;  %v3633_v56 = vsel %vm78_vm0, %v1306_v59, %v1310_v0  ;;  %v3690_v59 = vsel %vm97_vm1, %v1348_v53, %v3616_v44 }
 0x4be   :  { %v1386_v54 = vmul.f32 %v3586_v49, %v3629_v48  ;;  %v1387_v39 = vmul.f32 %v3586_v49, %v3633_v56  ;;  %4283 = vst [vmem:[#allocation23_spill] sm:$0xff] %v3690_v59 }
 0x4c0   :  { %v1308_v40 = vpop.permute.xlu1 %1307  ;;  %v3639_v19 = vpop.permute.xlu0 %1341  ;;  %v1418_v6 = vadd.f32 %v1406_v13, %v1386_v54  ;;  %v1419_v35 = vadd.f32 %v1407_v55, %v1387_v39  ;;  %v1554_v54 = vmul.f32 %v3602_v47, %v3629_v48  ;;  %v1574_v55 = vmul.f32 %v3600_v52, %v3532_v34 }
 0x4c1   :  { %v3646_v3 = vsel %vm78_vm0, %v1308_v40, %v3610_v41  ;;  %v3651_v29 = vsel %vm78_vm0, %v3620_v58, %v1308_v40  ;;  %v3656_v36 = vsel %vm97_vm1, %v3639_v19, %v1346_v12  ;;  %v1439_v12 = vmul.f32 %v3590_v60, %v3666_v5 }
 0x4c2   :  { %4279 = vst [vmem:[#allocation11_spill] sm:$0xff] %v3651_v29  ;;  %4280 = vst [vmem:[#allocation22_spill] sm:$0xff] %v3656_v36  ;;  %v1392_v50 = vmul.f32 %v3594_v4, %v3651_v29  ;;  %v1438_v62 = vmul.f32 %v3590_v60, %v3656_v36  ;;  %v1393_v46 = vmul.f32 %v3594_v4, %v3646_v3 }
 0x4c4   :  { %v3672_v33 = vpop.permute.xlu1 %1343  ;;  %v3674_v17 = vpop.permute.xlu0 %1317  ;;  %v1450_v45 = vadd.f32 %v1438_v62, %v1418_v6  ;;  %v1424_v23 = vadd.f32 %v1412_v57, %v1392_v50  ;;  %v1425_v13 = vadd.f32 %v1413_v18, %v1393_v46  ;;  %v1555_v6 = vmul.f32 %v3602_v47, %v3633_v56 }
 0x4c5   :  { %v3679_v2 = vsel %vm97_vm1, %v3672_v33, %v1348_v53  ;;  %v1606_v53 = vmul.f32 %v3604_v26, %v3656_v36  ;;  %v1451_v62 = vadd.f32 %v1439_v12, %v1419_v35  ;;  %v1445_v57 = vmul.f32 %v3592_v10, %v3690_v59 }
 0x4c6   :  { %4282 = vst [vmem:[#allocation20_spill] sm:$0xff] %v3679_v2  ;;  %v1444_v42 = vmul.f32 %v3592_v10, %v3679_v2  ;;  %1633 = vrot.lane.b32.xlu0 %v1450_v45, %s2453_s16  ;;  %v1560_v46 = vmul.f32 %v3596_v21, %v3651_v29  ;;  %v1575_v45 = vmul.f32 %v3600_v52, %v3492_v25 }
 0x4c7   :  { %v1586_v18 = vadd.f32 %v1574_v55, %v1554_v54  ;;  %v3716_v35 = vsel %vm78_vm0, %v1310_v0, %v3612_v11  ;;  %v1612_v12 = vmul.f32 %v3608_v24, %v3679_v2  ;;  %v1457_v61 = vadd.f32 %v1445_v57, %v1425_v13 }
 0x4c8   :  { %v1456_v40 = vadd.f32 %v1444_v42, %v1424_v23  ;;  %v3695_v39 = vpop.permute.xlu1 %1319  ;;  %v1354_v50 = vpop.permute.xlu0 %1353  ;;  %v1580_v23 = vmul.f32 %v3606_v7, %v3539_v63  ;;  %v1561_v42 = vmul.f32 %v3596_v21, %v3646_v3  ;;  %v1587_v36 = vadd.f32 %v1575_v45, %v1555_v6 }
 0x4c9   :  { %v1618_v54 = vadd.f32 %v1606_v53, %v1586_v18  ;;  %v3728_v0 = vsel %vm97_vm1, %v1350_v9, %v1354_v50  ;;  %v1388_v29 = vmul.f32 %v3586_v49, %v3716_v35  ;;  %v3737_v13 = vsel %vm78_vm0, %v3610_v41, %v3614_v38 }
 0x4ca   :  { %1635 = vrot.lane.b32.xlu1 %v1456_v40, %s2453_s16  ;;  %1637 = vrot.lane.b32.xlu0 %v1451_v62, %s2453_s16  ;;  %v1581_v62 = vmul.f32 %v3606_v7, %v3498_v16  ;;  %v1592_v63 = vadd.f32 %v1580_v23, %v1560_v46  ;;  %4284 = vst [vmem:[#allocation21_spill] sm:$0xff] %v3728_v0 }
 0x4cb   :  { %v1607_v6 = vmul.f32 %v3604_v26, %v3666_v5  ;;  %v1408_v9 = vmul.f32 %v3588_v27, %v3504_v20  ;;  %v1556_v45 = vmul.f32 %v3602_v47, %v3716_v35  ;;  %v1440_v41 = vmul.f32 %v3590_v60, %v3728_v0 }
 0x4cc   :  { %v1356_v40 = vpop.permute.xlu1 %1355  ;;  %v3722_v55 = vpop.permute.xlu0 %1321  ;;  %v1593_v53 = vadd.f32 %v1581_v62, %v1561_v42  ;;  %v1624_v57 = vadd.f32 %v1612_v12, %v1592_v63  ;;  %v1576_v63 = vmul.f32 %v3600_v52, %v3504_v20  ;;  %v1394_v42 = vmul.f32 %v3594_v4, %v3737_v13 }
 0x4cd   :  { %v3755_v18 = vsel %vm97_vm1, %v3616_v44, %v1356_v40  ;;  %v1619_v23 = vadd.f32 %v1607_v6, %v1587_v36  ;;  %v1613_v12 = vmul.f32 %v3608_v24, %v3690_v59  ;;  %v1420_v62 = vadd.f32 %v1408_v9, %v1388_v29 }
 0x4ce   :  { %1639 = vrot.lane.b32.xlu1 %v1457_v61, %s2453_s16  ;;  %1681 = vrot.lane.b32.xlu0 %v1618_v54, %s2455_s17  ;;  %v1405_v61 = vmul.f32 %v3588_v27, %v3518_v32  ;;  %4285 = vst [vmem:[#allocation8_spill] sm:$0xff] %v3755_v18  ;;  %v3765_v54 = vmul.f32 %v3600_v52, %v3518_v32 }
 0x4cf   :  { %v1414_v44 = vmul.f32 %v3598_v15, %v3512_v43  ;;  %v1582_v36 = vmul.f32 %v3606_v7, %v3512_v43  ;;  %v3774_v6 = vmul.f32 %v3588_v27, %v3546_v28  ;;  %v3781_v59 = vsel %vm78_vm0, %v3612_v11, %v3674_v17 }
 0x4d0   :  { %v3746_v46 = vpop.permute.xlu1 %1323  ;;  %v1358_v2 = vpop.permute.xlu0 %1357  ;;  %v1608_v29 = vmul.f32 %v3604_v26, %v3728_v0  ;;  %v1446_v9 = vmul.f32 %v3592_v10, %v3755_v18  ;;  %v1588_v5 = vadd.f32 %v1576_v63, %v1556_v45  ;;  %v1577_v32 = vmul.f32 %v3600_v52, %v3546_v28 }
 0x4d1   :  { %v1452_v34 = vadd.f32 %v1440_v41, %v1420_v62  ;;  %v1426_v20 = vadd.f32 %v1414_v44, %v1394_v42  ;;  %v1562_v11 = vmul.f32 %v3596_v21, %v3737_v13  ;;  %v3797_v0 = vsel %vm78_vm0, %v3722_v55, %v3618_v1 }
 0x4d2   :  { %1683 = vrot.lane.b32.xlu1 %v1624_v57, %s2455_s17  ;;  %1685 = vrot.lane.b32.xlu0 %v1619_v23, %s2455_s17  ;;  %v1625_v57 = vadd.f32 %v1613_v12, %v1593_v53  ;;  %v1410_v23 = vmul.f32 %v3588_v27, %v3560_v31  ;;  %v3801_v53 = vsel %vm97_vm1, %v1354_v50, %v1358_v2 }
 0x4d3   :  { %v1557_v27 = vmul.f32 %v3602_v47, %v3781_v59  ;;  %v3810_v41 = vsel %vm78_vm0, %v3614_v38, %v3695_v39  ;;  %v1415_v1 = vmul.f32 %v3598_v15, %v3554_v22  ;;  %v1578_v63 = vmul.f32 %v3600_v52, %v3560_v31 }
 0x4d4   :  { %v1360_v45 = vpop.permute.xlu1 %1359  ;;  %v1583_v50 = vmul.f32 %v3606_v7, %v3554_v22  ;;  %v1620_v42 = vadd.f32 %v1608_v29, %v1588_v5  ;;  %v1458_v12 = vadd.f32 %v1446_v9, %v1426_v20  ;;  %v1614_v62 = vmul.f32 %v3608_v24, %v3755_v18 }
 0x4d5   :  { %v1385_v38 = vmul.f32 %v3586_v49, %v3797_v0  ;;  %v3827_v44 = vsel %vm78_vm0, %v3746_v46, %v3620_v58  ;;  %v3833_v52 = vsel %vm97_vm1, %v1356_v40, %v1360_v45  ;;  %v1594_v20 = vadd.f32 %v1582_v36, %v1562_v11 }
 0x4d6   :  { %1687 = vrot.lane.b32.xlu1 %v1625_v57, %s2455_s17  ;;  %1641 = vrot.lane.b32.xlu0 %v1452_v34, %s2453_s16  ;;  %v1609_v34 = vmul.f32 %v3604_v26, %v3801_v53  ;;  %v3839_v5 = vsel %vm97_vm1, %v3622_v51, %v3639_v19  ;;  %v1563_v29 = vmul.f32 %v3596_v21, %v3810_v41 }
 0x4d7   :  { %v1411_v58 = vmul.f32 %v3598_v15, %v3526_v37  ;;  %v1589_v9 = vadd.f32 %v1577_v32, %v1557_v27  ;;  %v3850_v40 = vsel %vm78_vm0, %v3674_v17, %v3722_v55  ;;  %v1416_v36 = vmul.f32 %v3598_v15, %v3567_v30 }
 0x4d8   :  { %v1579_v19 = vmul.f32 %v3606_v7, %v3526_v37  ;;  %v1626_v57 = vadd.f32 %v1614_v62, %v1594_v20  ;;  %v1391_v11 = vmul.f32 %v3594_v4, %v3827_v44  ;;  %v1584_v32 = vmul.f32 %v3606_v7, %v3567_v30 }
 0x4d9   :  { %v1615_v27 = vmul.f32 %v3608_v24, %v3833_v52  ;;  %v1437_v17 = vmul.f32 %v3590_v60, %v3839_v5  ;;  %v1605_v15 = vmul.f32 %v3604_v26, %v3839_v5  ;;  %v1417_v55 = vadd.f32 %v1405_v61, %v1385_v38 }
 0x4da   :  { %1643 = vrot.lane.b32.xlu1 %v1458_v12, %s2453_s16  ;;  %1689 = vrot.lane.b32.xlu0 %v1620_v42, %s2455_s17  ;;  %v1621_v12 = vadd.f32 %v1609_v34, %v1589_v9  ;;  %v1595_v18 = vadd.f32 %v1583_v50, %v1563_v29  ;;  %v1390_v42 = vmul.f32 %v3586_v49, %v3850_v40 }
 0x4db   :  { %v3873_v7 = vsel %vm78_vm0, %v3695_v39, %v3746_v46  ;;  %v3878_v62 = vsel %vm97_vm1, %v1358_v2, %v3622_v51  ;;  %v3885_v61 = vsel %vm97_vm1, %v3624_v8, %v3672_v33  ;;  %v1389_v50 = vmul.f32 %v3586_v49, %v3781_v59 }
 0x4dc   :  { %v1395_v39 = vmul.f32 %v3594_v4, %v3810_v41  ;;  %v1553_v46 = vmul.f32 %v3602_v47, %v3797_v0  ;;  %v1423_v51 = vadd.f32 %v1411_v58, %v1391_v11  ;;  %v1559_v2 = vmul.f32 %v3596_v21, %v3827_v44 }
 0x4dd   :  { %v3899_v33 = vsel %vm97_vm1, %v1360_v45, %v3624_v8  ;;  %v1627_v38 = vadd.f32 %v1615_v27, %v1595_v18  ;;  %v1558_v49 = vmul.f32 %v3602_v47, %v3850_v40  ;;  %v1396_v34 = vmul.f32 %v3594_v4, %v3873_v7 }
 0x4de   :  { %1691 = vrot.lane.b32.xlu1 %v1626_v57, %s2455_s17  ;;  %1693 = vrot.lane.b32.xlu0 %v1621_v12, %s2455_s17  ;;  %v1442_v20 = vmul.f32 %v3590_v60, %v3878_v62  ;;  %v1449_v58 = vadd.f32 %v1437_v17, %v1417_v55  ;;  %v1443_v9 = vmul.f32 %v3592_v10, %v3885_v61 }
 0x4df   :  { %v1422_v57 = vadd.f32 %v1410_v23, %v1390_v42  ;;  %v1564_v8 = vmul.f32 %v3596_v21, %v3873_v7  ;;  %v1441_v18 = vmul.f32 %v3590_v60, %v3801_v53  ;;  %v1585_v47 = vadd.f32 %v3765_v54, %v1553_v46 }
 0x4e0   :  { %v1610_v4 = vmul.f32 %v3604_v26, %v3878_v62  ;;  %v1447_v45 = vmul.f32 %v3592_v10, %v3833_v52  ;;  %v1448_v11 = vmul.f32 %v3592_v10, %v3899_v33  ;;  %v1421_v21 = vadd.f32 %v3774_v6, %v1389_v50 }
 0x4e1   :  { %v1463_v29 = vpop.permute.xlu0 %1462  ;;  %v1591_v23 = vadd.f32 %v1579_v19, %v1559_v2  ;;  %v1616_v60 = vmul.f32 %v3608_v24, %v3899_v33  ;;  %v1455_v27 = vadd.f32 %v1443_v9, %v1423_v51  ;;  %v1427_v17 = vadd.f32 %v1415_v1, %v1395_v39 }
 0x4e2   :  { %1695 = vrot.lane.b32.xlu1 %v1627_v38, %s2455_s17  ;;  %1629 = vrot.lane.b32.xlu0 %v1449_v58, %s2453_s16  ;;  %v1590_v54 = vadd.f32 %v1578_v63, %v1558_v49  ;;  %v1428_v55 = vadd.f32 %v1416_v36, %v1396_v34  ;;  %v1454_v12 = vadd.f32 %v1442_v20, %v1422_v57  ;;  %v4289_v57 = vld [vmem:[#allocation11_spill] sm:$0xff] }
 0x4e3   :  { %v1611_v42 = vmul.f32 %v3608_v24, %v3885_v61  ;;  %v1596_v46 = vadd.f32 %v1584_v32, %v1564_v8  ;;  %v1453_v38 = vadd.f32 %v1441_v18, %v1421_v21  ;;  %v1459_v58 = vadd.f32 %v1447_v45, %v1427_v17  ;;  %v4290_v18 = vld [vmem:[#allocation10_spill] sm:$0xff] }
 0x4e4   :  { %v1622_v10 = vadd.f32 %v1610_v4, %v1590_v54  ;;  %v1460_v6 = vadd.f32 %v1448_v11, %v1428_v55  ;;  %v1617_v50 = vadd.f32 %v1605_v15, %v1585_v47  ;;  %v1471_v63 = vmul.f32 %v1463_v29, %v3633_v56 }
 0x4e5   :  { %v1467_v26 = vpop.permute.xlu1 %1466  ;;  %v3929_v51 = vadd.f32 %v1616_v60, %v1596_v46  ;;  %v1623_v1 = vadd.f32 %v1611_v42, %v1591_v23  ;;  %v1472_v36 = vmul.f32 %v1463_v29, %v3716_v35  ;;  %v1470_v24 = vmul.f32 %v1463_v29, %v3629_v48  ;;  %v4286_v35 = vld [vmem:[#allocation14_spill] sm:$0xff] }
 0x4e6   :  { %1631 = vrot.lane.b32.xlu1 %v1455_v27, %s2453_s16  ;;  %1649 = vrot.lane.b32.xlu0 %v1454_v12, %s2453_s16  ;;  %v1487_v19 = vpop.permute.xlu0 %1486  ;;  %v1469_v32 = vmul.f32 %v1463_v29, %v3797_v0  ;;  %v1473_v39 = vmul.f32 %v1463_v29, %v3781_v59  ;;  %v1474_v2 = vmul.f32 %v1463_v29, %v3850_v40  ;;  %v4287_v59 = vld [vmem:[#allocation17_spill] sm:$0xff]  ;;  %v4288_v40 = vld [vmem:[#allocation19_spill] sm:$0xff] }
 0x4e7   :  { %v1477_v15 = vmul.f32 %v1467_v26, %v3646_v3  ;;  %v1497_v34 = vmul.f32 %v1487_v19, %v3498_v16  ;;  %v1478_v20 = vmul.f32 %v1467_v26, %v3737_v13  ;;  %v1498_v56 = vmul.f32 %v1487_v19, %v3512_v43 }
 0x4e8   :  { %v1476_v8 = vmul.f32 %v1467_v26, %v4289_v57  ;;  %v1496_v3 = vmul.f32 %v1487_v19, %v4290_v18  ;;  %v1475_v16 = vmul.f32 %v1467_v26, %v3827_v44  ;;  %v1495_v13 = vmul.f32 %v1487_v19, %v3526_v37 }
 0x4e9   :  { %v1480_v4 = vmul.f32 %v1467_v26, %v3873_v7  ;;  %v1509_v45 = vadd.f32 %v1497_v34, %v1477_v15  ;;  %v1510_v11 = vadd.f32 %v1498_v56, %v1478_v20  ;;  %v1499_v21 = vmul.f32 %v1487_v19, %v3554_v22  ;;  %v4293_v7 = vld [vmem:[#allocation22_spill] sm:$0xff] }
 0x4ea   :  { %v1483_v49 = vpop.permute.xlu1 %1482  ;;  %1651 = vrot.lane.b32.xlu1 %v1460_v6, %s2453_s16  ;;  %1677 = vrot.lane.b32.xlu0 %v1617_v50, %s2455_s17  ;;  %v1500_v23 = vmul.f32 %v1487_v19, %v3567_v30 }
 0x4eb   :  { %v1491_v48 = vmul.f32 %v1483_v49, %v3492_v25  ;;  %v1492_v0 = vmul.f32 %v1483_v49, %v4286_v35  ;;  %v1490_v9 = vmul.f32 %v1483_v49, %v4287_v59  ;;  %v1489_v29 = vmul.f32 %v1483_v49, %v4288_v40 }
 0x4ec   :  { %v1493_v43 = vmul.f32 %v1483_v49, %v3546_v28  ;;  %v1494_v47 = vmul.f32 %v1483_v49, %v3560_v31  ;;  %v1479_v25 = vmul.f32 %v1467_v26, %v3810_v41  ;;  %v4291_v31 = vld [vmem:[#allocation24_spill] sm:$0xff]  ;;  %v4292_v41 = vld [vmem:[#allocation21_spill] sm:$0xff]  ;;  %v1512_v34 = vadd.f32 %v1500_v23, %v1480_v4 }
 0x4ed   :  { %v1503_v37 = vadd.f32 %v1491_v48, %v1471_v63  ;;  %v1504_v60 = vadd.f32 %v1492_v0, %v1472_v36  ;;  %v1502_v28 = vadd.f32 %v1490_v9, %v1470_v24  ;;  %v1501_v27 = vadd.f32 %v1489_v29, %v1469_v32 }
 0x4ee   :  { %1679 = vrot.lane.b32.xlu1 %v1623_v1, %s2455_s17  ;;  %1645 = vrot.lane.b32.xlu0 %v1453_v38, %s2453_s16  ;;  %v1505_v26 = vadd.f32 %v1493_v43, %v1473_v39  ;;  %v1506_v42 = vadd.f32 %v1494_v47, %v1474_v2  ;;  %v1508_v1 = vadd.f32 %v1496_v3, %v1476_v8 }
 0x4ef   :  { %v1515_v44 = vpop.permute.xlu1 %1514  ;;  %v1507_v63 = vadd.f32 %v1495_v13, %v1475_v16 }
 0x4f0   :  { %v1523_v17 = vmul.f32 %v1515_v44, %v4291_v31  ;;  %v1524_v54 = vmul.f32 %v1515_v44, %v4292_v41  ;;  %v1522_v55 = vmul.f32 %v1515_v44, %v4293_v7  ;;  %v1521_v12 = vmul.f32 %v1515_v44, %v3839_v5 }
 0x4f1   :  { %v1525_v22 = vmul.f32 %v1515_v44, %v3801_v53  ;;  %v1526_v30 = vmul.f32 %v1515_v44, %v3878_v62  ;;  %v4294_v53 = vld [vmem:[#allocation23_spill] sm:$0xff]  ;;  %v4295_v62 = vld [vmem:[#allocation8_spill] sm:$0xff] }
 0x4f2   :  { %1647 = vrot.lane.b32.xlu1 %v1459_v58, %s2453_s16  ;;  %v1535_v46 = vadd.f32 %v1523_v17, %v1503_v37  ;;  %v1536_v38 = vadd.f32 %v1524_v54, %v1504_v60  ;;  %v3966_v6 = vadd.f32 %v1522_v55, %v1502_v28  ;;  %v3968_v19 = vadd.f32 %v1521_v12, %v1501_v27  ;;  %v4296_v58 = vld [vmem:[#allocation20_spill] sm:$0xff] }
 0x4f3   :  { %1697 = vrot.lane.b32.xlu0 %v1622_v10, %s2455_s17  ;;  %v1519_v50 = vpop.permute.xlu1 %1518  ;;  %v3971_v5 = vadd.f32 %v1525_v22, %v1505_v26  ;;  %v3973_v36 = vadd.f32 %v1526_v30, %v1506_v42  ;;  %v1511_v10 = vadd.f32 %v1499_v21, %v1479_v25 }
 0x4f4   :  { %v1529_v24 = vmul.f32 %v1519_v50, %v4294_v53  ;;  %v1530_v32 = vmul.f32 %v1519_v50, %v4295_v62  ;;  %v1528_v39 = vmul.f32 %v1519_v50, %v4296_v58  ;;  %v1527_v2 = vmul.f32 %v1519_v50, %v3885_v61  ;;  %v1727_v61 = vld [vmem:[%s4174_s10] sm:$0xff] }
 0x4f5   :  { %v1531_v49 = vmul.f32 %v1519_v50, %v3833_v52  ;;  %v1532_v15 = vmul.f32 %v1519_v50, %v3899_v33  ;;  %v1728_v52 = vld [vmem:[%s4174_s10 + $0x8] sm:$0xff]  ;;  %v1990_v33 = vld [vmem:[%s4176_s12] sm:$0xff] }
 0x4f6   :  { %1699 = vrot.lane.b32.xlu1 %v3929_v51, %s2455_s17  ;;  %v1541_v20 = vadd.f32 %v1529_v24, %v1509_v45  ;;  %v1542_v56 = vadd.f32 %v1530_v32, %v1510_v11  ;;  %v1540_v48 = vadd.f32 %v1528_v39, %v1508_v1  ;;  %v3983_v35 = vadd.f32 %v1527_v2, %v1507_v63  ;;  %v1991_v51 = vld [vmem:[%s4176_s12 + $0x8] sm:$0xff]  ;;  %v4038_v32 = vld [vmem:[%s4173_s9] sm:$0xff] }
 0x4f7   :  { %v3985_v0 = vadd.f32 %v1531_v49, %v1511_v10  ;;  %v3987_v59 = vadd.f32 %v1532_v15, %v1512_v34  ;;  %1731 = vperm.xlu0 %2385, %v1727_v61   ;;  %v2387_v2 = vld [vmem:[%s4164_s0 + $0x8] sm:$0xff] }
 0x4fa   :  { %1736 = vperm.xlu1 %2386, %v1728_v52   ;;  %v2388_v52 = vld [vmem:[%s4164_s0] sm:$0xff] }
 0x4fb   :  { %1999 = vperm.xlu0 %2385, %v1991_v51  }
 0x4fe   :  { %1994 = vperm.xlu1 %2386, %v1990_v33  }
 0x538   :  { %v1634_v9 = vpop.permute.xlu0 %1633 }
 0x53c   :  { %v1636_v40 = vpop.permute.xlu1 %1635  ;;  %v1638_v29 = vpop.permute.xlu0 %1637 }
 0x53d   :  { %v1659_v47 = vsel %vm244_vm2, %v1634_v9, %v1638_v29 }
 0x53e   :  { %v1667_v11 = vadd.f32 %v1659_v47, %v1535_v46 }
 0x540   :  { %v1640_v57 = vpop.permute.xlu1 %1639  ;;  %v1682_v8 = vpop.permute.xlu0 %1681 }
 0x541   :  { %v1660_v25 = vsel %vm244_vm2, %v1636_v40, %v1640_v57 }
 0x542   :  { %v1673_v21 = vadd.f32 %v1660_v25, %v1541_v20 }
 0x544   :  { %v1684_v18 = vpop.permute.xlu1 %1683  ;;  %v1686_v3 = vpop.permute.xlu0 %1685 }
 0x545   :  { %v1707_v24 = vsel %vm269_vm3, %v1682_v8, %v1686_v3 }
 0x548   :  { %v1688_v16 = vpop.permute.xlu1 %1687  ;;  %v4001_v13 = vpop.permute.xlu0 %1641 }
 0x549   :  { %v1657_v44 = vsel %vm244_vm2, %v1638_v29, %v4001_v13  ;;  %v1708_v62 = vsel %vm269_vm3, %v1684_v18, %v1688_v16 }
 0x54a   :  { %v1668_v41 = vadd.f32 %v1657_v44, %v1536_v38 }
 0x54c   :  { %v4003_v43 = vpop.permute.xlu1 %1643  ;;  %v1690_v4 = vpop.permute.xlu0 %1689 }
 0x54d   :  { %v1705_v45 = vsel %vm269_vm3, %v1686_v3, %v1690_v4  ;;  %v1658_v37 = vsel %vm244_vm2, %v1640_v57, %v4003_v43 }
 0x54e   :  { %v1715_v27 = vadd.f32 %v1705_v45, %v1667_v11  ;;  %v1674_v54 = vadd.f32 %v1658_v37, %v1542_v56  ;;  %v4297_v56 = vmov 0.0  }
 0x550   :  { %v1692_v23 = vpop.permute.xlu1 %1691  ;;  %v1694_v28 = vpop.permute.xlu0 %1693 }
 0x551   :  { %v1706_v60 = vsel %vm269_vm3, %v1688_v16, %v1692_v23  ;;  %v1703_v17 = vsel %vm269_vm3, %v1690_v4, %v1694_v28  ;;  %v1988_v16 = vld [vmem:[%s4175_s11] sm:$0xff] }
 0x552   :  { %v1721_v31 = vadd.f32 %v1706_v60, %v1673_v21  ;;  %v1716_v42 = vadd.f32 %v1703_v17, %v1668_v41  ;;  %v2392_v41 = vld [vmem:[%s4164_s0 + $0x10] sm:$0xff] }
 0x554   :  { %v2322_v7 = vpack.c.bf16 %v1721_v31, %v1715_v27  ;;  %v4021_v55 = vpop.permute.xlu1 %1695  ;;  %v1630_v26 = vpop.permute.xlu0 %1629 }
 0x555   :  { %v1704_v12 = vsel %vm269_vm3, %v1692_v23, %v4021_v55  ;;  %v1661_v30 = vsel %vm244_vm2, %v1630_v26, %v1634_v9  ;;  %v2389_v9 = vld [vmem:[%s4164_s0 + $0x28] sm:$0xff] }
 0x556   :  { %v1722_v22 = vadd.f32 %v1704_v12, %v1674_v54  ;;  %v1666_v46 = vadd.f32 %v1661_v30, %v3966_v6 }
 0x558   :  { %v1632_v50 = vpop.permute.xlu1 %1631  ;;  %v2320_v1 = vpack.c.bf16 %v1722_v22, %v1716_v42  ;;  %v1650_v63 = vpop.permute.xlu0 %1649  ;;  %v1714_v6 = vadd.f32 %v1707_v24, %v1666_v46 }
 0x559   :  { %v1662_v38 = vsel %vm244_vm2, %v1632_v50, %v1636_v40  ;;  %v1663_v49 = vsel %vm244_vm2, %v1650_v63, %v1630_v26 }
 0x55a   :  { %v1672_v53 = vadd.f32 %v1662_v38, %v1540_v48  ;;  %2321 = vmatprep.subr.bf16.mxu1 %v2320_v1  ;;  %v1726_v48 = vld [vmem:[%s4173_s9 + $0x8] sm:$0xff]  ;;  %v1665_v61 = vadd.f32 %v1663_v49, %v3968_v19 }
 0x55b   :  { %2323 = vmatpush1.bf16.msra.mxu1 %v2322_v7 }
 0x55c   :  { %v1720_v58 = vadd.f32 %v1708_v62, %v1672_v53  ;;  %v1652_v39 = vpop.permute.xlu1 %1651  ;;  %2008 = vmatprep.subr.mxu1 %v2387_v2  ;;  %v1678_v10 = vpop.permute.xlu0 %1677 }
 0x55d   :  { %v1664_v15 = vsel %vm244_vm2, %v1652_v39, %v1632_v50  ;;  %v1709_v20 = vsel %vm269_vm3, %v1678_v10, %v1682_v8 }
 0x55e   :  { %v2316_v34 = vpack.c.bf16 %v1720_v58, %v1714_v6  ;;  %2294 = vmatmul.mubr.msk.f32.vlgmr.msra.gmra.mrb[12].mxu1 %vm1027_vm5, %v4038_v32  ;;  %v1671_v33 = vadd.f32 %v1664_v15, %v3983_v35  ;;  %v1713_v57 = vadd.f32 %v1709_v20, %v1665_v61 }
 0x55f   :  { %1892 = vmatprep.mubr.f32.mxu1 %v4297_v56  ;;  %2009 = vmatpush1.msra.mxu1 %v2388_v52 }
 0x560   :  { %v1680_v51 = vpop.permute.xlu1 %1679  ;;  %2317 = vmatprep.subr.bf16.mxu0 %v2316_v34  ;;  %2162 = vmatprep.subr.mxu1 %v2389_v9  ;;  %v1646_v29 = vpop.permute.xlu0 %1645 }
 0x561   :  { %v1710_v40 = vsel %vm269_vm3, %v1680_v51, %v1684_v18  ;;  %v1655_v35 = vsel %vm244_vm2, %v4001_v13, %v1646_v29  ;;  %v1653_v18 = vsel %vm244_vm2, %v1646_v29, %v1650_v63 }
 0x562   :  { %v1719_v8 = vadd.f32 %v1710_v40, %v1671_v33  ;;  %2295 = vmatmul.mubr.msk.f32.gmra.mrb[14].mxu1 %vm1027_vm5, %v1726_v48  ;;  %v1669_v45 = vadd.f32 %v1655_v35, %v3971_v5  ;;  %v1670_v21 = vadd.f32 %v1653_v18, %v3973_v36  ;;  %v1989_v5 = vld [vmem:[%s4175_s11 + $0x8] sm:$0xff] }
 0x563   :  { %2072 = vmatprep.mubr.f32.mxu1 %v4297_v56 }
 0x564   :  { %v2318_v19 = vpack.c.bf16 %v1719_v8, %v1713_v57  ;;  %v1648_v3 = vpop.permute.xlu1 %1647 }
 0x565   :  { %v1654_v47 = vsel %vm244_vm2, %v1648_v3, %v1652_v39  ;;  %v1656_v25 = vsel %vm244_vm2, %v4003_v43, %v1648_v3  ;;  %v1698_v4 = vpop.permute.xlu0 %1697  ;;  %v2390_v43 = vld [vmem:[%s4164_s0 + $0x20] sm:$0xff]  ;;  %s2456_s0 = smov [#allocation5]  }
 0x566   :  { %2319 = vmatpush1.bf16.msra.mxu0 %v2318_v19  ;;  %v1701_v13 = vsel %vm269_vm3, %v1694_v28, %v1698_v4  ;;  %v1711_v11 = vsel %vm269_vm3, %v1698_v4, %v1678_v10  ;;  %2298 = vmatmul.mubr.msk.f32.vlgmr.msra.gmra.mrb[16].mxu1 %vm296_vm4, %v1988_v16  ;;  %v1675_v23 = vadd.f32 %v1656_v25, %v3985_v0  ;;  %s2268_s22 = sshll.u32 %s2456_s0, 4  ;;  %s2269_s22 = int_to_ptr.vmem [resolvable:$true] %s2268_s22 }
 0x567   :  { %v1676_v44 = vadd.f32 %v1654_v47, %v3987_v59  ;;  %2078 = vmatprep.mubr.f32.mxu1 %v4297_v56  ;;  %2163 = vmatpush1.msra.mxu1 %v2390_v43  ;;  %v1717_v59 = vadd.f32 %v1701_v13, %v1669_v45  ;;  %v1718_v60 = vadd.f32 %v1711_v11, %v1670_v21  ;;  %s2415_s6 = scalar_lea.vmem %s2269_s22, 1536  ;;  %p2420_p9 = scmp.lt.s32.totalorder %s2269_s22, %s2269_s22 }
 0x568   :  { %v1700_v37 = vpop.permute.xlu1 %1699  ;;  %p2416_p8 = scmp.ne.s32.totalorder %s2269_s22, %s2415_s6  ;;  %p2421_p10 = scmp.lt.s32.totalorder %s2415_s6, %s2415_s6 }
 0x569   :  { %v1702_v36 = vsel %vm269_vm3, %v4021_v55, %v1700_v37  ;;  %v1712_v0 = vsel %vm269_vm3, %v1700_v37, %v1680_v51  ;;  %2292 = vmatmul.mubr.msk.f32.vlgmr.msra.gmra.mrb[12].mxu0 %vm1027_vm5, %v4038_v32 }
 0x56a   :  { %v1723_v28 = vadd.f32 %v1702_v36, %v1675_v23  ;;  %v1724_v27 = vadd.f32 %v1712_v0, %v1676_v44  ;;  %1815 = vmatprep.mubr.f32.mxu0 %v4297_v56  ;;  %2299 = vmatmul.mubr.msk.f32.gmra.mrb[18].mxu1 %vm296_vm4, %v1989_v5  ;;  %p2422_p11 = por %p2421_p10, %p2420_p9 }
 0x56b   :  { %2226 = vmatprep.mubr.f32.mxu1 %v4297_v56 }
 0x56c   :  { %v2326_v31 = vpack.c.bf16 %v1723_v28, %v1717_v59  ;;  %v2324_v17 = vpack.c.bf16 %v1724_v27, %v1718_v60  ;;  %p2423_p12 = pnand %p2422_p11, %p2416_p8 }
 0x56d   :  { %2293 = vmatmul.mubr.msk.f32.gmra.mrb[14].mxu0 %vm1027_vm5, %v1726_v48 }
 0x56e   :  { %2325 = vmatprep.subr.bf16.mxu0 %v2324_v17  ;;  %1963 = vmatprep.mubr.f32.mxu0 %v4297_v56 }
 0x56f   :  { %2327 = vmatpush1.bf16.msra.mxu0 %v2326_v31  ;;  %2302 = vmatmul.mubr.msk.f32.vlgmr.msra.gmra.mrb[20].mxu1 %vm296_vm4, %v1988_v16 }
 0x570   :  { %2085 = vmatprep.subr.mxu0 %v2391_v14  ;;  %2232 = vmatprep.mubr.f32.mxu1 %v4297_v56 }
 0x572   :  { %2296 = vmatmul.mubr.msk.f32.vlgmr.msra.gmra.mrb[16].mxu0 %vm1027_vm5, %v4038_v32 }
 0x573   :  { %1969 = vmatprep.mubr.f32.mxu0 %v4297_v56  ;;  %2086 = vmatpush1.msra.mxu0 %v2392_v41 }
 0x574   :  { %2303 = vmatmul.mubr.msk.f32.gmra.mrb[22].mxu1 %vm296_vm4, %v1989_v5 }
 0x576   :  { %2297 = vmatmul.mubr.msk.f32.gmra.mrb[18].mxu0 %vm1027_vm5, %v1726_v48  ;;  %v1732_v42 = vpop.permute.xlu0 %1731 }
 0x577   :  { %2149 = vmatprep.mubr.f32.mxu0 %v4297_v56 }
 0x579   :  { %v4125_v55 = vpop.permute.xlu1 %1736 }
 0x57a   :  { %2300 = vmatmul.mubr.msk.f32.vlgmr.msra.gmra.mrb[20].mxu0 %vm296_vm4, %v1988_v16  ;;  %v4133_v32 = vpop.permute.xlu0 %1999 }
 0x57b   :  { %2155 = vmatprep.mubr.f32.mxu0 %v4297_v56 }
 0x57d   :  { %v4129_v30 = vpop.permute.xlu1 %1994 }
 0x57e   :  { %2301 = vmatmul.mubr.msk.f32.gmra.mrb[22].mxu0 %vm296_vm4, %v1989_v5 }
 0x631   :  { %v1888_v54 = vpop.f32.mrb[12].mxu1 }
 0x632   :  { %v1890_v7 = vpop.f32.mrb[13].mxu1  ;;  %v1889_v21 = vadd.f32 %v1888_v54, %v1732_v42 }
 0x633   :  { %v1891_v5 = vadd.f32 %v1890_v7, %v1732_v42 }
 0x634   :  { %v1978_v28 = vmax.f32 %v1889_v21, 0.0 }
 0x635   :  { %v1894_v12 = vpop.f32.mrb[14].mxu1  ;;  %v1979_v41 = vmax.f32 %v1891_v5, 0.0 }
 0x636   :  { %v4127_v26 = vpop.f32.mrb[15].mxu1  ;;  %v1895_v60 = vadd.f32 %v1894_v12, %v4125_v55 }
 0x637   :  { %v1897_v14 = vadd.f32 %v4127_v26, %v4125_v55 }
 0x639   :  { %v2074_v22 = vpop.f32.mrb[16].mxu1 }
 0x63a   :  { %v2076_v46 = vpop.f32.mrb[17].mxu1  ;;  %v2075_v63 = vadd.f32 %v2074_v22, %v4129_v30 }
 0x63b   :  { %v2077_v24 = vadd.f32 %v2076_v46, %v4129_v30 }
 0x63c   :  { %v1811_v50 = vpop.f32.mrb[12].mxu0 }
 0x63d   :  { %v1813_v1 = vpop.f32.mrb[13].mxu0  ;;  %v1812_v38 = vadd.f32 %v1811_v50, %v1732_v42  ;;  %v2080_v62 = vpop.f32.mrb[18].mxu1  ;;  %v1984_v50 = vmax.f32 %v1895_v60, 0.0 }
 0x63e   :  { %v1814_v53 = vadd.f32 %v1813_v1, %v1732_v42  ;;  %v2082_v58 = vpop.f32.mrb[19].mxu1  ;;  %v2081_v34 = vadd.f32 %v2080_v62, %v4133_v32 }
 0x63f   :  { %v1976_v6 = vmax.f32 %v1812_v38, 0.0  ;;  %v2083_v48 = vadd.f32 %v2082_v58, %v4133_v32  ;;  %v1985_v38 = vmax.f32 %v1897_v14, 0.0 }
 0x640   :  { %v1977_v39 = vmax.f32 %v1814_v53, 0.0  ;;  %v1817_v2 = vpop.f32.mrb[14].mxu0 }
 0x641   :  { %v2239_v49 = vadd.f32 %v2075_v63, %v1976_v6  ;;  %v1818_v15 = vadd.f32 %v1817_v2, %v4125_v55  ;;  %v1819_v10 = vpop.f32.mrb[15].mxu0 }
 0x642   :  { %v2240_v20 = vadd.f32 %v2077_v24, %v1977_v39  ;;  %v1820_v56 = vadd.f32 %v1819_v10, %v4125_v55  ;;  %v2228_v52 = vpop.f32.mrb[20].mxu1 }
 0x643   :  { %2251 = vst [vmem:[#allocation5] sm:$0xff] %v2239_v49  ;;  %v1982_v61 = vmax.f32 %v1818_v15, 0.0  ;;  %v2230_v33 = vpop.f32.mrb[21].mxu1  ;;  %v2229_v19 = vadd.f32 %v2228_v52, %v4129_v30 }
 0x644   :  { %2252 = vst [vmem:[#allocation5 + $0x8] sm:$0xff] %v2240_v20  ;;  %v1983_v51 = vmax.f32 %v1820_v56, 0.0  ;;  %v2231_v3 = vadd.f32 %v2230_v33, %v4129_v30 }
 0x645   :  { %v2245_v9 = vadd.f32 %v2081_v34, %v1982_v61  ;;  %v1965_v40 = vpop.f32.mrb[16].mxu0 }
 0x646   :  { %v2246_v29 = vadd.f32 %v2083_v48, %v1983_v51  ;;  %v1966_v57 = vadd.f32 %v1965_v40, %v1732_v42  ;;  %v1967_v8 = vpop.f32.mrb[17].mxu0 }
 0x647   :  { %2257 = vst [vmem:[#allocation5 + $0x30] sm:$0xff] %v2245_v9  ;;  %v1968_v35 = vadd.f32 %v1967_v8, %v1732_v42  ;;  %v2234_v16 = vpop.f32.mrb[22].mxu1 }
 0x648   :  { %2258 = vst [vmem:[#allocation5 + $0x38] sm:$0xff] %v2246_v29  ;;  %v1980_v18 = vmax.f32 %v1966_v57, 0.0  ;;  %v2236_v47 = vpop.f32.mrb[23].mxu1  ;;  %v2235_v23 = vadd.f32 %v2234_v16, %v4133_v32 }
 0x649   :  { %v1981_v25 = vmax.f32 %v1968_v35, 0.0  ;;  %v1971_v4 = vpop.f32.mrb[18].mxu0  ;;  %v2237_v43 = vadd.f32 %v2236_v47, %v4133_v32 }
 0x64a   :  { %v1972_v45 = vadd.f32 %v1971_v4, %v4125_v55  ;;  %v2243_v13 = vadd.f32 %v2229_v19, %v1980_v18  ;;  %v1973_v11 = vpop.f32.mrb[19].mxu0 }
 0x64b   :  { %v1974_v44 = vadd.f32 %v1973_v11, %v4125_v55  ;;  %v2244_v37 = vadd.f32 %v2231_v3, %v1981_v25 }
 0x64c   :  { %v1986_v36 = vmax.f32 %v1972_v45, 0.0  ;;  %2255 = vst [vmem:[#allocation5 + $0x20] sm:$0xff] %v2243_v13 }
 0x64d   :  { %v1987_v0 = vmax.f32 %v1974_v44, 0.0  ;;  %2256 = vst [vmem:[#allocation5 + $0x28] sm:$0xff] %v2244_v37  ;;  %v2151_v59 = vpop.f32.mrb[20].mxu0 }
 0x64e   :  { %v2152_v27 = vadd.f32 %v2151_v59, %v4129_v30  ;;  %v2153_v31 = vpop.f32.mrb[21].mxu0  ;;  %v2249_v17 = vadd.f32 %v2235_v23, %v1986_v36 }
 0x64f   :  { %v2154_v54 = vadd.f32 %v2153_v31, %v4129_v30  ;;  %v2250_v7 = vadd.f32 %v2237_v43, %v1987_v0 }
 0x650   :  { %v2241_v42 = vadd.f32 %v2152_v27, %v1978_v28  ;;  %2261 = vst [vmem:[#allocation5 + $0x50] sm:$0xff] %v2249_v17 }
 0x651   :  { %v2242_v22 = vadd.f32 %v2154_v54, %v1979_v41  ;;  %2262 = vst [vmem:[#allocation5 + $0x58] sm:$0xff] %v2250_v7  ;;  %v2157_v46 = vpop.f32.mrb[22].mxu0 }
 0x652   :  { %2253 = vst [vmem:[#allocation5 + $0x10] sm:$0xff] %v2241_v42  ;;  %v2158_v12 = vadd.f32 %v2157_v46, %v4133_v32  ;;  %v2159_v1 = vpop.f32.mrb[23].mxu0 }
 0x653   :  { %2254 = vst [vmem:[#allocation5 + $0x18] sm:$0xff] %v2242_v22  ;;  %v2160_v55 = vadd.f32 %v2159_v1, %v4133_v32 }
 0x654   :  { %v2247_v26 = vadd.f32 %v2158_v12, %v1984_v50 }
 0x655   :  { %v2248_v63 = vadd.f32 %v2160_v55, %v1985_v38 }
 0x656   :  { %2259 = vst [vmem:[#allocation5 + $0x40] sm:$0xff] %v2247_v26 }
 0x657   :  { %2260 = vst [vmem:[#allocation5 + $0x48] sm:$0xff] %v2248_v63 }
 0x658   :  { %2426 = shalt.err (!%p2423_p12)
}
 0x659   :  { %s2427_s16 = scalar_lea.hbm %s4177_s13, 1536 }
 0x65a   :  { %p2428_p13 = scmp.ne.s32.totalorder %s4177_s13, %s2427_s16  ;;  %p2431_p0 = scmp.lt.u32.totalorder %s2427_s16, %s4177_s13 }
 0x65c   :  { %p2433_p1 = pnand %p2431_p0, %p2428_p13 }
 0x65e   :  { %2436 = shalt.err (!%p2433_p1)
}
 0x65f   :  { %s2457_s10 = smov 768   ;;  %s2458_s12 = smov 48  }
 0x660   :  { %2274 = dma.vmem_to_hbm [thread:$0]  %s2269_s22, 1536, %s4177_s13, [#allocation4], %s2457_s10, %s2457_s10, %s2458_s12  }
 0x661   :  { %2439 = dma.done.wait [#allocation4], 1536  }
 0x662   :  { %2440 = vsyncadd [#allocation4], 4294965760 }
 0x663   :  { %2278 = vsyncpa [#allocation3], 1 }
 0x664   :  { %2279 = vsyncpa [#allocation4], 1 }

// kernel: tpu_custom_call.1
= control target key start
LH: loop header
LB: loop body
LE: loop exit
PB: predicated region body
PF: predicated region fallthrough
CT: control target
= control target key end

     0   :  { %18 = vsyncpa [#allocation3], 0  ;;  %s4164_s0 = inlined_call_operand.vmem [shape: f32[1,8,768], index: 0, kind: input, shape index: {}]   ;;  %s4165_s1 = inlined_call_operand.vmem [shape: f32[1,768], index: 1, kind: input, shape index: {}]   ;;  %s4166_s2 = inlined_call_operand.hbm [shape: f32[8,9], index: 2, kind: input, shape index: {}]   ;;  %s4167_s3 = inlined_call_operand.vmem [shape: f32[16,8], index: 3, kind: input, shape index: {}]   ;;  %s4168_s4 = inlined_call_operand.vmem [shape: f32[16,1], index: 4, kind: input, shape index: {}]   ;;  %s4169_s5 = inlined_call_operand.vmem [shape: f32[16,9], index: 5, kind: input, shape index: {}]   ;;  %s4170_s6 = inlined_call_operand.vmem [shape: f32[16,16], index: 6, kind: input, shape index: {}]   ;;  %s4171_s7 = inlined_call_operand.vmem [shape: f32[16,1], index: 7, kind: input, shape index: {}]   ;;  %s4172_s8 = inlined_call_operand.vmem [shape: f32[16,9], index: 8, kind: input, shape index: {}]   ;;  %s4173_s9 = inlined_call_operand.vmem [shape: f32[16,16], index: 9, kind: input, shape index: {}]   ;;  %s4174_s10 = inlined_call_operand.vmem [shape: f32[16,1], index: 10, kind: input, shape index: {}]   ;;  %s4175_s11 = inlined_call_operand.vmem [shape: f32[16,8], index: 11, kind: input, shape index: {}]   ;;  %s4176_s12 = inlined_call_operand.vmem [shape: f32[16,1], index: 12, kind: input, shape index: {}]   ;;  %s4177_s13 = inlined_call_operand.hbm [shape: f32[1,16,768], index: 13, kind: output, shape index: {}]  }
   0x1   :  { %19 = vsyncpa [#allocation4], 0  ;;  %s2441_s25 = smov [#allocation2]   ;;  %s2393_s29 = scalar_lea.hbm %s4166_s2, 128 }
   0x2   :  { %s30_s26 = sshll.u32 %s2441_s25, 4  ;;  %p2394_p0 = scmp.ne.s32.totalorder %s4166_s2, %s2393_s29  ;;  %s31_s26 = int_to_ptr.vmem [resolvable:$true] %s30_s26 }
   0x3   :  { %p2397_p1 = scmp.lt.u32.totalorder %s2393_s29, %s4166_s2 }
   0x5   :  { %p2399_p2 = pnand %p2397_p1, %p2394_p0 }
   0x7   :  { %2402 = shalt.err (!%p2399_p2)
}
   0x8   :  { %s2403_s17 = scalar_lea.vmem %s31_s26, 128  ;;  %p2408_p4 = scmp.lt.s32.totalorder %s31_s26, %s31_s26 }
   0x9   :  { %p2404_p3 = scmp.ne.s32.totalorder %s31_s26, %s2403_s17  ;;  %p2409_p5 = scmp.lt.s32.totalorder %s2403_s17, %s2403_s17 }
   0xb   :  { %p2410_p6 = por %p2409_p5, %p2408_p4 }
   0xd   :  { %p2411_p7 = pnand %p2410_p6, %p2404_p3 }
   0xf   :  { %2414 = shalt.err (!%p2411_p7)
}
  0x10   :  { %33 = dma.hbm_to_vmem [thread:$0]  %s4166_s2, 128, %s31_s26, [#allocation3]  }
  0x11   :  { %2437 = dma.done.wait [#allocation3], 128  }
  0x12   :  { %2438 = vsyncadd [#allocation3], 4294967168  ;;  %v4190_v0 = vmov 2   ;;  %v4179_v1 = vmov 0   ;;  %v104_v2 = vld [vmem:[#allocation2] sm:$0xff]  ;;  %v4191_v3 = vmov 6   ;;  %v76_v22 = vlaneseq }
  0x13   :  { %2348 = vset.pattern.permute.xlu1 %v4190_v0  ;;  %2346 = vset.pattern.permute.xlu0 %v4179_v1  ;;  %v4193_v4 = vmov 1   ;;  %v4188_v5 = vmov 7   ;;  %v4185_v6 = vmov 8   ;;  %v2550_v7 = vld [vmem:[%s4164_s0 + $0x28] sm:$0xff]  ;;  %v2555_v8 = vld [vmem:[%s4164_s0] sm:$0xff]  ;;  %s2448_s23 = smov 1  }
  0x14   :  { %133 = vperm.xlu1 %2348, %v104_v2   ;;  %107 = vperm.xlu0 %2346, %v104_v2   ;;  %v2564_v9 = vld [vmem:[%s4164_s0 + $0x10] sm:$0xff]  ;;  %v2569_v10 = vld [vmem:[%s4164_s0 + $0x8] sm:$0xff]  ;;  %v4186_v11 = vmov 3   ;;  %v4181_v12 = vmov 4   ;;  %v2580_v13 = vld [vmem:[%s4164_s0 + $0x20] sm:$0xff]  ;;  %s2451_s30 = smov 127  }
  0x15   :  { %v2593_v14 = vld [vmem:[%s4164_s0 + $0x18] sm:$0xff]  ;;  %v4178_v15 = vmov 5   ;;  %v2617_v24 = vand.u32 127, %v76_v22  ;;  %s2453_s16 = smov 18   ;;  %s2455_s17 = smov 110   ;;  %vm296_vm4 = vcmask 64512  }
  0x16   :  { %vm1027_vm5 = vcmask 130048  }
  0x17   :  { %4231 = vst [vmem:[#allocation8_spill] sm:$0xff] %v2617_v24  ;;  %vm78_vm0 = vcmp.lt.s32.totalorder %v2617_v24, 1  ;;  %vm97_vm1 = vcmp.lt.s32.totalorder %v2617_v24, 127  ;;  %vm244_vm2 = vcmp.lt.s32.totalorder %v2617_v24, 18  ;;  %vm269_vm3 = vcmp.lt.s32.totalorder %v2617_v24, 110 }
  0x18   :  { %2349 = vset.pattern.permute.xlu1 %v4191_v3  ;;  %2347 = vset.pattern.permute.xlu0 %v4193_v4 }
  0x19   :  { %191 = vperm.xlu1 %2349, %v104_v2   ;;  %117 = vperm.xlu0 %2347, %v104_v2  }
  0x1d   :  { %2350 = vset.pattern.permute.xlu1 %v4188_v5  ;;  %2351 = vset.pattern.permute.xlu0 %v4185_v6 }
  0x1e   :  { %201 = vperm.xlu1 %2350, %v104_v2   ;;  %217 = vperm.xlu0 %2351, %v104_v2  }
  0x22   :  { %74 = vrot.lane.b32.xlu0 %v2550_v7, %s2448_s23  ;;  %64 = vrot.lane.b32.xlu1 %v2555_v8, %s2448_s23 }
  0x23   :  { %2352 = vset.pattern.permute.xlu0 %v4186_v11  ;;  %2353 = vset.pattern.permute.xlu1 %v4181_v12 }
  0x26   :  { %68 = vrot.lane.b32.xlu0 %v2564_v9, %s2448_s23  ;;  %66 = vrot.lane.b32.xlu1 %v2569_v10, %s2448_s23 }
  0x2a   :  { %87 = vrot.lane.b32.xlu0 %v2569_v10, %s2451_s30  ;;  %72 = vrot.lane.b32.xlu1 %v2580_v13, %s2448_s23 }
  0x2e   :  { %95 = vrot.lane.b32.xlu0 %v2550_v7, %s2451_s30  ;;  %85 = vrot.lane.b32.xlu1 %v2555_v8, %s2451_s30 }
  0x32   :  { %70 = vrot.lane.b32.xlu0 %v2593_v14, %s2448_s23  ;;  %89 = vrot.lane.b32.xlu1 %v2564_v9, %s2451_s30 }
  0x36   :  { %149 = vperm.xlu0 %2352, %v104_v2   ;;  %91 = vrot.lane.b32.xlu1 %v2593_v14, %s2451_s30 }
  0x3a   :  { %93 = vrot.lane.b32.xlu1 %v2580_v13, %s2451_s30  ;;  %2355 = vset.pattern.permute.xlu0 %v4179_v1 }
  0x3e   :  { %159 = vperm.xlu1 %2353, %v104_v2  }
  0x42   :  { %2354 = vset.pattern.permute.xlu1 %v4178_v15 }
  0x43   :  { %175 = vperm.xlu1 %2354, %v104_v2  }
  0x47   :  { %2356 = vset.pattern.permute.xlu1 %v4179_v1 }
  0x93   :  { %v2606_v16 = vpop.permute.xlu1 %133  ;;  %v2608_v17 = vpop.permute.xlu0 %107 }
  0x98   :  { %v2610_v18 = vpop.permute.xlu1 %191  ;;  %v118_v19 = vpop.permute.xlu0 %117 }
  0x99   :  { %v120_v36 = vmul.f32 %v118_v19, %v2555_v8  ;;  %v121_v44 = vmul.f32 %v118_v19, %v2569_v10  ;;  %v125_v49 = vmul.f32 %v118_v19, %v2550_v7  ;;  %v124_v50 = vmul.f32 %v118_v19, %v2580_v13 }
  0x9a   :  { %v123_v53 = vmul.f32 %v118_v19, %v2593_v14  ;;  %v122_v54 = vmul.f32 %v118_v19, %v2564_v9 }
  0x9d   :  { %v2612_v20 = vpop.permute.xlu1 %201  ;;  %v2614_v21 = vpop.permute.xlu0 %217 }
  0x9e   :  { %v205_v52 = vmul.f32 %v2612_v20, %v2569_v10  ;;  %v206_v58 = vmul.f32 %v2612_v20, %v2564_v9 }
  0xa1   :  { %v75_v23 = vpop.permute.xlu0 %74  ;;  %v65_v25 = vpop.permute.xlu1 %64 }
  0xa2   :  { %v2622_v28 = vsel %vm78_vm0, %v75_v23, %v65_v25 }
  0xa3   :  { %v110_v31 = vmul.f32 %v2608_v17, %v2622_v28  ;;  %v194_v62 = vmul.f32 %v2610_v18, %v2622_v28 }
  0xa5   :  { %v69_v26 = vpop.permute.xlu0 %68  ;;  %v67_v27 = vpop.permute.xlu1 %66  ;;  %v126_v41 = vadd.f32 %v120_v36, %v110_v31 }
  0xa6   :  { %v2633_v33 = vsel %vm78_vm0, %v65_v25, %v67_v27  ;;  %v2650_v42 = vsel %vm78_vm0, %v67_v27, %v69_v26  ;;  %v4183_v25 = vmov 0.0  }
  0xa7   :  { %v111_v43 = vmul.f32 %v2608_v17, %v2633_v33  ;;  %v195_v55 = vmul.f32 %v2610_v18, %v2633_v33  ;;  %v196_v56 = vmul.f32 %v2610_v18, %v2650_v42  ;;  %367 = vmatprep.mubr.f32.mxu0 %v4183_v25  ;;  %444 = vmatprep.mubr.f32.mxu1 %v4183_v25 }
  0xa9   :  { %v88_v29 = vpop.permute.xlu0 %87  ;;  %v73_v30 = vpop.permute.xlu1 %72  ;;  %v127_v61 = vadd.f32 %v121_v44, %v111_v43  ;;  %v211_v44 = vadd.f32 %v205_v52, %v195_v55  ;;  %v207_v55 = vmul.f32 %v2612_v20, %v2593_v14 }
  0xaa   :  { %v2629_v32 = vsel %vm78_vm0, %v73_v30, %v75_v23  ;;  %v204_v23 = vmul.f32 %v2612_v20, %v2555_v8 }
  0xab   :  { %v115_v39 = vmul.f32 %v2608_v17, %v2629_v32  ;;  %v199_v63 = vmul.f32 %v2610_v18, %v2629_v32 }
  0xad   :  { %v96_v34 = vpop.permute.xlu0 %95  ;;  %v86_v35 = vpop.permute.xlu1 %85  ;;  %v131_v57 = vadd.f32 %v125_v49, %v115_v39  ;;  %v212_v39 = vadd.f32 %v206_v58, %v196_v56  ;;  %v208_v49 = vmul.f32 %v2612_v20, %v2580_v13 }
  0xae   :  { %v2638_v37 = vsel %vm97_vm1, %v86_v35, %v88_v29  ;;  %v2642_v38 = vsel %vm97_vm1, %v96_v34, %v86_v35 }
  0xaf   :  { %v136_v40 = vmul.f32 %v2606_v16, %v2638_v37  ;;  %v141_v45 = vmul.f32 %v2606_v16, %v2642_v38  ;;  %v225_v43 = vmul.f32 %v2614_v21, %v2642_v38 }
  0xb1   :  { %v71_v46 = vpop.permute.xlu0 %70  ;;  %v90_v47 = vpop.permute.xlu1 %89  ;;  %v142_v48 = vadd.f32 %v136_v40, %v126_v41  ;;  %v147_v19 = vadd.f32 %v141_v45, %v131_v57  ;;  %v112_v40 = vmul.f32 %v2608_v17, %v2650_v42  ;;  %v220_v41 = vmul.f32 %v2614_v21, %v2638_v37 }
  0xb2   :  { %v2661_v51 = vsel %vm97_vm1, %v88_v29, %v90_v47  ;;  %v80_v59 = vsel %vm78_vm0, %v71_v46, %v73_v30  ;;  %v81_v27 = vsel %vm78_vm0, %v69_v26, %v71_v46  ;;  %v209_v26 = vmul.f32 %v2612_v20, %v2550_v7 }
  0xb3   :  { %232 = vrot.lane.b32.xlu0 %v142_v48, %s2453_s16  ;;  %v137_v60 = vmul.f32 %v2606_v16, %v2661_v51  ;;  %v221_v29 = vmul.f32 %v2614_v21, %v2661_v51  ;;  %v114_v35 = vmul.f32 %v2608_v17, %v80_v59  ;;  %v113_v45 = vmul.f32 %v2608_v17, %v81_v27 }
  0xb4   :  { %v210_v48 = vadd.f32 %v204_v23, %v194_v62  ;;  %v197_v62 = vmul.f32 %v2610_v18, %v81_v27  ;;  %v128_v23 = vadd.f32 %v122_v54, %v112_v40 }
  0xb5   :  { %v92_v2 = vpop.permute.xlu1 %91  ;;  %v143_v31 = vadd.f32 %v137_v60, %v127_v61  ;;  %v227_v58 = vadd.f32 %v221_v29, %v211_v44  ;;  %v215_v60 = vadd.f32 %v209_v26, %v199_v63  ;;  %v198_v61 = vmul.f32 %v2610_v18, %v80_v59 }
  0xb6   :  { %v2691_v30 = vsel %vm97_vm1, %v90_v47, %v92_v2  ;;  %v130_v17 = vadd.f32 %v124_v50, %v114_v35 }
  0xb7   :  { %v222_v36 = vmul.f32 %v2614_v21, %v2691_v30  ;;  %242 = vrot.lane.b32.xlu0 %v147_v19, %s2453_s16  ;;  %234 = vrot.lane.b32.xlu1 %v143_v31, %s2453_s16  ;;  %v150_v19 = vpop.permute.xlu0 %149  ;;  %v138_v26 = vmul.f32 %v2606_v16, %v2691_v30  ;;  %v214_v54 = vadd.f32 %v208_v49, %v198_v61 }
  0xb8   :  { %v153_v40 = vmul.f32 %v150_v19, %v2633_v33  ;;  %v155_v44 = vmul.f32 %v150_v19, %v81_v27 }
  0xb9   :  { %v94_v46 = vpop.permute.xlu1 %93  ;;  %v228_v47 = vadd.f32 %v222_v36, %v212_v39  ;;  %v129_v39 = vadd.f32 %v123_v53, %v113_v45  ;;  %v156_v53 = vmul.f32 %v150_v19, %v80_v59 }
  0xba   :  { %v98_v56 = vsel %vm97_vm1, %v94_v46, %v96_v34  ;;  %v99_v57 = vsel %vm97_vm1, %v92_v2, %v94_v46  ;;  %v226_v34 = vadd.f32 %v220_v41, %v210_v48  ;;  %v231_v2 = vadd.f32 %v225_v43, %v215_v60 }
  0xbb   :  { %v140_v52 = vmul.f32 %v2606_v16, %v98_v56  ;;  %261 = vrot.lane.b32.xlu0 %v228_v47, %s2455_s17  ;;  %259 = vrot.lane.b32.xlu1 %v227_v58, %s2455_s17  ;;  %v139_v63 = vmul.f32 %v2606_v16, %v99_v57  ;;  %v224_v29 = vmul.f32 %v2614_v21, %v98_v56 }
  0xbc   :  { %v157_v41 = vmul.f32 %v150_v19, %v2629_v32  ;;  %v154_v16 = vmul.f32 %v150_v19, %v2650_v42 }
  0xbd   :  { %v160_v31 = vpop.permute.xlu1 %159  ;;  %v146_v36 = vadd.f32 %v140_v52, %v130_v17  ;;  %v230_v43 = vadd.f32 %v224_v29, %v214_v54  ;;  %v223_v17 = vmul.f32 %v2614_v21, %v99_v57  ;;  %v2759_v21 = vld [vmem:[%s4169_s5 + $0x8] sm:$0xff] }
  0xbe   :  { %v163_v50 = vmul.f32 %v160_v31, %v2569_v10  ;;  %v167_v35 = vmul.f32 %v160_v31, %v2550_v7  ;;  %v166_v20 = vmul.f32 %v160_v31, %v2580_v13  ;;  %v162_v18 = vmul.f32 %v160_v31, %v2555_v8 }
  0xbf   :  { %240 = vrot.lane.b32.xlu0 %v146_v36, %s2453_s16  ;;  %257 = vrot.lane.b32.xlu1 %v226_v34, %s2455_s17  ;;  %v152_v10 = vmul.f32 %v150_v19, %v2622_v28  ;;  %v165_v7 = vmul.f32 %v160_v31, %v2593_v14  ;;  %v164_v13 = vmul.f32 %v160_v31, %v2564_v9 }
  0xc0   :  { %v145_v8 = vadd.f32 %v139_v63, %v129_v39  ;;  %v169_v46 = vadd.f32 %v163_v50, %v153_v40  ;;  %v173_v47 = vadd.f32 %v167_v35, %v157_v41  ;;  %v172_v33 = vadd.f32 %v166_v20, %v156_v53  ;;  %v282_v41 = vld [vmem:[%s4167_s3] sm:$0xff] }
  0xc1   :  { %v168_v48 = vadd.f32 %v162_v18, %v152_v10  ;;  %v171_v9 = vadd.f32 %v165_v7, %v155_v44  ;;  %v170_v49 = vadd.f32 %v164_v13, %v154_v16  ;;  %v283_v44 = vld [vmem:[%s4167_s3 + $0x8] sm:$0xff] }
  0xc2   :  { %v176_v45 = vpop.permute.xlu1 %175 }
  0xc3   :  { %267 = vrot.lane.b32.xlu0 %v231_v2, %s2455_s17  ;;  %v179_v32 = vmul.f32 %v176_v45, %v2661_v51  ;;  %v183_v28 = vmul.f32 %v176_v45, %v2642_v38  ;;  %v182_v59 = vmul.f32 %v176_v45, %v98_v56  ;;  %v178_v14 = vmul.f32 %v176_v45, %v2638_v37 }
  0xc4   :  { %238 = vrot.lane.b32.xlu1 %v145_v8, %s2453_s16  ;;  %v181_v27 = vmul.f32 %v176_v45, %v99_v57  ;;  %v180_v42 = vmul.f32 %v176_v45, %v2691_v30  ;;  %v144_v51 = vadd.f32 %v138_v26, %v128_v23  ;;  %v213_v37 = vadd.f32 %v207_v55, %v197_v62  ;;  %v284_v30 = vld [vmem:[%s4168_s4] sm:$0xff]  ;;  %v285_v57 = vld [vmem:[%s4168_s4 + $0x8] sm:$0xff] }
  0xc5   :  { %v185_v58 = vadd.f32 %v179_v32, %v169_v46  ;;  %v189_v60 = vadd.f32 %v183_v28, %v173_v47  ;;  %v2743_v61 = vadd.f32 %v182_v59, %v172_v33  ;;  %v184_v52 = vadd.f32 %v178_v14, %v168_v48  ;;  %v2768_v55 = vld [vmem:[%s4169_s5] sm:$0xff] }
  0xc6   :  { %v2746_v19 = vadd.f32 %v181_v27, %v171_v9  ;;  %v2748_v38 = vadd.f32 %v180_v42, %v170_v49  ;;  %v229_v56 = vadd.f32 %v223_v17, %v213_v37 }
  0xc7   :  { %265 = vrot.lane.b32.xlu0 %v230_v43, %s2455_s17 }
  0xc8   :  { %236 = vrot.lane.b32.xlu1 %v144_v51, %s2453_s16 }
  0xcb   :  { %288 = vperm.xlu0 %2355, %v284_v30  }
  0xcc   :  { %263 = vrot.lane.b32.xlu1 %v229_v56, %s2455_s17 }
  0xcf   :  { %670 = vperm.xlu0 %2355, %v2759_v21  }
  0xd0   :  { %293 = vperm.xlu1 %2356, %v285_v57  }
  0xd3   :  { %2358 = vset.pattern.permute.xlu0 %v4193_v4 }
  0xd4   :  { %665 = vperm.xlu1 %2356, %v2768_v55   ;;  %690 = vperm.xlu0 %2358, %v2759_v21  }
  0xd8   :  { %2357 = vset.pattern.permute.xlu1 %v4193_v4  ;;  %2360 = vset.pattern.permute.xlu0 %v4191_v3 }
  0xd9   :  { %686 = vperm.xlu1 %2357, %v2768_v55   ;;  %834 = vperm.xlu0 %2360, %v2768_v55  }
  0xdd   :  { %2359 = vset.pattern.permute.xlu1 %v4190_v0  ;;  %2363 = vset.pattern.permute.xlu0 %v4188_v5 }
  0xde   :  { %718 = vperm.xlu1 %2359, %v2768_v55   ;;  %858 = vperm.xlu0 %2363, %v2759_v21  }
  0xe2   :  { %722 = vperm.xlu1 %2359, %v2759_v21   ;;  %2365 = vset.pattern.permute.xlu0 %v4186_v11 }
  0xe6   :  { %2361 = vset.pattern.permute.xlu1 %v4191_v3 }
  0xe7   :  { %838 = vperm.xlu1 %2361, %v2759_v21  }
  0xeb   :  { %2362 = vset.pattern.permute.xlu1 %v4188_v5 }
  0xec   :  { %854 = vperm.xlu1 %2362, %v2768_v55  }
  0xf0   :  { %2364 = vset.pattern.permute.xlu1 %v4185_v6 }
  0xf1   :  { %886 = vperm.xlu1 %2364, %v2768_v55  }
  0xf5   :  { %890 = vperm.xlu1 %2364, %v2759_v21  }
  0xf9   :  { %2366 = vset.pattern.permute.xlu1 %v4186_v11 }
 0x125   :  { %v233_v62 = vpop.permute.xlu0 %232 }
 0x129   :  { %v243_v34 = vpop.permute.xlu0 %242  ;;  %v235_v2 = vpop.permute.xlu1 %234 }
 0x12a   :  { %v249_v23 = vsel %vm244_vm2, %v233_v62, %v235_v2  ;;  %v250_v36 = vsel %vm244_vm2, %v243_v34, %v233_v62 }
 0x12b   :  { %v252_v31 = vadd.f32 %v249_v23, %v185_v58  ;;  %v251_v26 = vadd.f32 %v250_v36, %v184_v52  ;;  %v536_v58 = vshrl.u32 %v76_v22, 7 }
 0x12d   :  { %v262_v63 = vpop.permute.xlu0 %261  ;;  %v260_v29 = vpop.permute.xlu1 %259  ;;  %v545_v23 = vsub.s32 2, %v536_v58 }
 0x12e   :  { %v273_v39 = vsel %vm269_vm3, %v260_v29, %v262_v63 }
 0x12f   :  { %v277_v50 = vadd.f32 %v273_v39, %v252_v31 }
 0x131   :  { %v241_v35 = vpop.permute.xlu0 %240  ;;  %v258_v20 = vpop.permute.xlu1 %257  ;;  %303 = vmatprep.subr.mxu0 %v277_v50 }
 0x132   :  { %v245_v18 = vsel %vm244_vm2, %v241_v35, %v243_v34  ;;  %v274_v54 = vsel %vm269_vm3, %v258_v20, %v260_v29 }
 0x133   :  { %v276_v40 = vadd.f32 %v274_v54, %v251_v26  ;;  %v256_v53 = vadd.f32 %v245_v18, %v189_v60  ;;  %v537_v60 = vsub.s32 0, %v536_v58  ;;  %v541_v54 = vsub.s32 1, %v536_v58 }
 0x135   :  { %v268_v10 = vpop.permute.xlu0 %267  ;;  %304 = vmatpush1.msra.mxu0 %v276_v40 }
 0x136   :  { %v239_v7 = vpop.permute.xlu1 %238  ;;  %v275_v13 = vsel %vm269_vm3, %v268_v10, %v258_v20  ;;  %2280 = vmatmul.mubr.msk.f32.vlgmr.msra.gmra.mrb[0].mxu0 %vm296_vm4, %v282_v41 }
 0x137   :  { %v246_v8 = vsel %vm244_vm2, %v239_v7, %v241_v35  ;;  %v281_v43 = vadd.f32 %v275_v13, %v256_v53  ;;  %373 = vmatprep.mubr.f32.mxu0 %v4183_v25 }
 0x138   :  { %v255_v16 = vadd.f32 %v246_v8, %v2743_v61  ;;  %v63_v61 = vld [vmem:[%s4165_s1] sm:$0x3f] }
 0x139   :  { %457 = vmatprep.subr.mxu0 %v281_v43  ;;  %v266_v45 = vpop.permute.xlu0 %265  ;;  %v2842_v52 = vrot.slane %v63_v61, %v537_v60  ;;  %v2854_v36 = vrot.slane %v63_v61, %v545_v23  ;;  %v2862_v13 = vrot.slane %v63_v61, %v541_v54 }
 0x13a   :  { %v237_v46 = vpop.permute.xlu1 %236  ;;  %v270_v47 = vsel %vm269_vm3, %v266_v45, %v268_v10  ;;  %2281 = vmatmul.mubr.msk.f32.gmra.mrb[2].mxu0 %vm296_vm4, %v283_v44 }
 0x13b   :  { %v248_v33 = vsel %vm244_vm2, %v235_v2, %v237_v46  ;;  %v280_v48 = vadd.f32 %v270_v47, %v255_v16  ;;  %v247_v32 = vsel %vm244_vm2, %v237_v46, %v239_v7  ;;  %521 = vmatprep.mubr.f32.mxu0 %v4183_v25  ;;  %4232 = vst [vmem:[#allocation9_spill] sm:$0xff] %v2842_v52  ;;  %4235 = vst [vmem:[#allocation12_spill] sm:$0xff] %v2854_v36 }
 0x13c   :  { %v254_v59 = vadd.f32 %v247_v32, %v2746_v19  ;;  %v253_v14 = vadd.f32 %v248_v33, %v2748_v38  ;;  %4236 = vst [vmem:[#allocation13_spill] sm:$0xff] %v2862_v13  ;;  %v549_v16 = vsub.s32 3, %v536_v58 }
 0x13d   :  { %458 = vmatpush1.msra.mxu0 %v280_v48 }
 0x13e   :  { %v264_v28 = vpop.permute.xlu1 %263  ;;  %2284 = vmatmul.mubr.msk.f32.vlgmr.msra.gmra.mrb[4].mxu0 %vm296_vm4, %v282_v41  ;;  %v2878_v48 = vrot.slane %v63_v61, %v549_v16 }
 0x13f   :  { %v271_v9 = vsel %vm269_vm3, %v264_v28, %v266_v45  ;;  %v272_v27 = vsel %vm269_vm3, %v262_v63, %v264_v28  ;;  %527 = vmatprep.mubr.f32.mxu0 %v4183_v25  ;;  %v553_v45 = vsub.s32 4, %v536_v58  ;;  %v557_v28 = vsub.s32 5, %v536_v58 }
 0x140   :  { %v279_v49 = vadd.f32 %v271_v9, %v254_v59  ;;  %v278_v42 = vadd.f32 %v272_v27, %v253_v14  ;;  %4238 = vst [vmem:[#allocation15_spill] sm:$0xff] %v2878_v48 }
 0x141   :  { %v2884_v32 = vrot.slane %v63_v61, %v553_v45 }
 0x142   :  { %380 = vmatprep.subr.mxu1 %v279_v49  ;;  %2285 = vmatmul.mubr.msk.f32.gmra.mrb[6].mxu0 %vm296_vm4, %v283_v44 }
 0x143   :  { %381 = vmatpush1.msra.mxu1 %v278_v42  ;;  %1175 = vmatprep.mubr.f32.mxu0 %v4183_v25  ;;  %4239 = vst [vmem:[#allocation16_spill] sm:$0xff] %v2884_v32  ;;  %v2893_v42 = vrot.slane %v63_v61, %v557_v28 }
 0x144   :  { %2282 = vmatmul.mubr.msk.f32.vlgmr.msra.gmra.mrb[0].mxu1 %vm296_vm4, %v282_v41 }
 0x145   :  { %450 = vmatprep.mubr.f32.mxu1 %v4183_v25  ;;  %4241 = vst [vmem:[#allocation18_spill] sm:$0xff] %v2893_v42 }
 0x148   :  { %2283 = vmatmul.mubr.msk.f32.gmra.mrb[2].mxu1 %vm296_vm4, %v283_v44 }
 0x149   :  { %1098 = vmatprep.mubr.f32.mxu1 %v4183_v25 }
 0x14a   :  { %v289_v17 = vpop.permute.xlu0 %288 }
 0x14f   :  { %v294_v30 = vpop.permute.xlu1 %293 }
 0x209   :  { %v369_v51 = vpop.f32.mrb[0].mxu0 }
 0x20a   :  { %v370_v19 = vadd.f32 %v369_v51, %v289_v17  ;;  %v371_v38 = vpop.f32.mrb[1].mxu0 }
 0x20b   :  { %v372_v7 = vadd.f32 %v371_v38, %v289_v17 }
 0x20c   :  { %v565_v37 = vmul.f32 %v2842_v52, %v370_v19 }
 0x20d   :  { %v375_v56 = vpop.f32.mrb[2].mxu0  ;;  %v566_v43 = vmul.f32 %v2862_v13, %v372_v7 }
 0x20e   :  { %v2845_v57 = vmax.f32 %v565_v37, 0.0  ;;  %v376_v62 = vadd.f32 %v375_v56, %v294_v30  ;;  %v377_v34 = vpop.f32.mrb[3].mxu0 }
 0x20f   :  { %v378_v44 = vadd.f32 %v377_v34, %v294_v30  ;;  %v2875_v46 = vmax.f32 %v566_v43, 0.0 }
 0x210   :  { %4233 = vst [vmem:[#allocation10_spill] sm:$0xff] %v2845_v57  ;;  %v571_v22 = vmul.f32 %v2842_v52, %v376_v62  ;;  %589 = vrot.lane.b32.xlu0 %v2845_v57, %s2448_s23 }
 0x211   :  { %v523_v2 = vpop.f32.mrb[4].mxu0  ;;  %4237 = vst [vmem:[#allocation14_spill] sm:$0xff] %v2875_v46  ;;  %v572_v47 = vmul.f32 %v2862_v13, %v378_v44 }
 0x212   :  { %v2850_v63 = vmax.f32 %v571_v22, 0.0  ;;  %v525_v29 = vpop.f32.mrb[5].mxu0  ;;  %v524_v14 = vadd.f32 %v523_v2, %v289_v17  ;;  %v2949_v2 = vpop.permute.xlu1 %665 }
 0x213   :  { %v2886_v59 = vmax.f32 %v572_v47, 0.0  ;;  %v526_v49 = vadd.f32 %v525_v29, %v289_v17 }
 0x214   :  { %4234 = vst [vmem:[#allocation11_spill] sm:$0xff] %v2850_v63  ;;  %591 = vrot.lane.b32.xlu1 %v2850_v63, %s2448_s23  ;;  %v569_v60 = vmul.f32 %v2884_v32, %v524_v14 }
 0x215   :  { %v529_v31 = vpop.f32.mrb[6].mxu0  ;;  %4240 = vst [vmem:[#allocation17_spill] sm:$0xff] %v2886_v59  ;;  %v570_v38 = vmul.f32 %v2893_v42, %v526_v49 }
 0x216   :  { %v531_v50 = vpop.f32.mrb[7].mxu0  ;;  %v530_v51 = vadd.f32 %v529_v31, %v294_v30  ;;  %v2904_v37 = vmax.f32 %v569_v60, 0.0  ;;  %v2951_v23 = vpop.permute.xlu1 %686 }
 0x217   :  { %v446_v39 = vpop.f32.mrb[0].mxu1  ;;  %v2913_v62 = vmax.f32 %v570_v38, 0.0  ;;  %v694_v49 = vmul.f32 %v2951_v23, %v2875_v46 }
 0x218   :  { %v447_v35 = vadd.f32 %v446_v39, %v289_v17  ;;  %v448_v20 = vpop.f32.mrb[1].mxu1  ;;  %v575_v61 = vmul.f32 %v2884_v32, %v530_v51  ;;  %v2957_v39 = vpop.permute.xlu0 %670 }
 0x219   :  { %v449_v33 = vadd.f32 %v448_v20, %v289_v17  ;;  %v532_v17 = vadd.f32 %v531_v50, %v294_v30 }
 0x21a   :  { %v567_v18 = vmul.f32 %v2854_v36, %v447_v35  ;;  %v2915_v34 = vmax.f32 %v575_v61, 0.0  ;;  %v2953_v29 = vpop.permute.xlu1 %718 }
 0x21b   :  { %v452_v26 = vpop.f32.mrb[2].mxu1  ;;  %v568_v9 = vmul.f32 %v2878_v48, %v449_v33  ;;  %v576_v22 = vmul.f32 %v2893_v42, %v532_v17 }
 0x21c   :  { %v2857_v40 = vmax.f32 %v567_v18, 0.0  ;;  %v453_v41 = vadd.f32 %v452_v26, %v294_v30  ;;  %v454_v53 = vpop.f32.mrb[3].mxu1  ;;  %v2961_v35 = vpop.permute.xlu0 %690 }
 0x21d   :  { %v455_v27 = vadd.f32 %v454_v53, %v294_v30  ;;  %v2896_v19 = vmax.f32 %v568_v9, 0.0  ;;  %v2922_v30 = vmax.f32 %v576_v22, 0.0 }
 0x21e   :  { %v573_v10 = vmul.f32 %v2854_v36, %v453_v41  ;;  %597 = vrot.lane.b32.xlu0 %v2857_v40, %s2448_s23  ;;  %v2955_v31 = vpop.permute.xlu1 %722 }
 0x21f   :  { %v574_v58 = vmul.f32 %v2878_v48, %v455_v27 }
 0x220   :  { %v2864_v8 = vmax.f32 %v573_v10, 0.0 }
 0x221   :  { %v2907_v56 = vmax.f32 %v574_v58, 0.0 }
 0x222   :  { %599 = vrot.lane.b32.xlu1 %v2864_v8, %s2448_s23  ;;  %625 = vrot.lane.b32.xlu0 %v2845_v57, %s2451_s30  ;;  %v2959_v50 = vpop.permute.xlu1 %838 }
 0x226   :  { %627 = vrot.lane.b32.xlu1 %v2850_v63, %s2451_s30  ;;  %633 = vrot.lane.b32.xlu0 %v2857_v40, %s2451_s30  ;;  %v2963_v20 = vpop.permute.xlu1 %854 }
 0x22a   :  { %635 = vrot.lane.b32.xlu1 %v2864_v8, %s2451_s30  ;;  %593 = vrot.lane.b32.xlu0 %v2875_v46, %s2448_s23 }
 0x22e   :  { %595 = vrot.lane.b32.xlu1 %v2886_v59, %s2448_s23  ;;  %629 = vrot.lane.b32.xlu0 %v2875_v46, %s2451_s30 }
 0x232   :  { %631 = vrot.lane.b32.xlu1 %v2886_v59, %s2451_s30  ;;  %637 = vrot.lane.b32.xlu0 %v2896_v19, %s2451_s30 }
 0x236   :  { %639 = vrot.lane.b32.xlu1 %v2907_v56, %s2451_s30  ;;  %605 = vrot.lane.b32.xlu0 %v2904_v37, %s2448_s23 }
 0x23a   :  { %607 = vrot.lane.b32.xlu1 %v2915_v34, %s2448_s23  ;;  %609 = vrot.lane.b32.xlu0 %v2913_v62, %s2448_s23 }
 0x23e   :  { %611 = vrot.lane.b32.xlu1 %v2922_v30, %s2448_s23  ;;  %645 = vrot.lane.b32.xlu0 %v2913_v62, %s2451_s30 }
 0x242   :  { %647 = vrot.lane.b32.xlu1 %v2922_v30, %s2451_s30  ;;  %601 = vrot.lane.b32.xlu0 %v2896_v19, %s2448_s23 }
 0x246   :  { %603 = vrot.lane.b32.xlu1 %v2907_v56, %s2448_s23  ;;  %641 = vrot.lane.b32.xlu0 %v2904_v37, %s2451_s30 }
 0x24a   :  { %643 = vrot.lane.b32.xlu1 %v2915_v34, %s2451_s30  ;;  %750 = vperm.xlu0 %2365, %v2768_v55  }
 0x24e   :  { %754 = vperm.xlu1 %2366, %v2759_v21   ;;  %2368 = vset.pattern.permute.xlu0 %v4181_v12 }
 0x24f   :  { %774 = vperm.xlu0 %2368, %v2759_v21  }
 0x252   :  { %2367 = vset.pattern.permute.xlu1 %v4181_v12 }
 0x253   :  { %770 = vperm.xlu1 %2367, %v2768_v55   ;;  %2370 = vset.pattern.permute.xlu0 %v4179_v1 }
 0x257   :  { %2369 = vset.pattern.permute.xlu1 %v4178_v15  ;;  %v700_v15 = vmul.f32 %v2961_v35, %v2886_v59 }
 0x258   :  { %802 = vperm.xlu1 %2369, %v2768_v55   ;;  %v2965_v55 = vpop.permute.xlu0 %834 }
 0x25c   :  { %806 = vperm.xlu1 %2369, %v2759_v21   ;;  %v2967_v21 = vpop.permute.xlu1 %886  ;;  %v2969_v18 = vpop.permute.xlu0 %858 }
 0x25d   :  { %v869_v13 = vmul.f32 %v2969_v18, %v2864_v8 }
 0x260   :  { %2371 = vset.pattern.permute.xlu1 %v4179_v1  ;;  %v2971_v26 = vpop.permute.xlu1 %890 }
 0x282   :  { %v2973_v54 = vpop.permute.xlu0 %589 }
 0x286   :  { %v2975_v41 = vpop.permute.xlu1 %591 }
 0x290   :  { %v2977_v53 = vpop.permute.xlu0 %597 }
 0x294   :  { %v2979_v10 = vpop.permute.xlu1 %599  ;;  %v2981_v7 = vpop.permute.xlu0 %625 }
 0x298   :  { %v2983_v43 = vpop.permute.xlu1 %627  ;;  %v634_v44 = vpop.permute.xlu0 %633 }
 0x29c   :  { %v636_v16 = vpop.permute.xlu1 %635  ;;  %v594_v45 = vpop.permute.xlu0 %593 }
 0x29d   :  { %v2988_v47 = vsel %vm78_vm0, %v2973_v54, %v594_v45  ;;  %v3015_v61 = vsel %vm78_vm0, %v594_v45, %v2977_v53 }
 0x29e   :  { %v674_v33 = vmul.f32 %v2949_v2, %v2988_v47  ;;  %v842_v51 = vmul.f32 %v2965_v55, %v2988_v47  ;;  %v843_v5 = vmul.f32 %v2965_v55, %v3015_v61 }
 0x2a0   :  { %v596_v28 = vpop.permute.xlu1 %595  ;;  %v2992_v14 = vpop.permute.xlu0 %629  ;;  %v706_v38 = vadd.f32 %v694_v49, %v674_v33  ;;  %v862_v49 = vmul.f32 %v2963_v20, %v2875_v46  ;;  %v870_v46 = vmul.f32 %v2969_v18, %v2907_v56 }
 0x2a1   :  { %v2997_v9 = vsel %vm78_vm0, %v2975_v41, %v596_v28  ;;  %v3002_v27 = vsel %vm97_vm1, %v2992_v14, %v634_v44 }
 0x2a2   :  { %4242 = vst [vmem:[#allocation19_spill] sm:$0xff] %v2997_v9  ;;  %4243 = vst [vmem:[#allocation20_spill] sm:$0xff] %v3002_v27  ;;  %v680_v60 = vmul.f32 %v2957_v39, %v2997_v9  ;;  %v726_v58 = vmul.f32 %v2953_v29, %v3002_v27  ;;  %v894_v1 = vmul.f32 %v2967_v21, %v3002_v27 }
 0x2a3   :  { %v848_v45 = vmul.f32 %v2959_v50, %v2997_v9  ;;  %v702_v27 = vmul.f32 %v2961_v35, %v2907_v56 }
 0x2a4   :  { %v3017_v17 = vpop.permute.xlu1 %631  ;;  %v638_v22 = vpop.permute.xlu0 %637  ;;  %v738_v33 = vadd.f32 %v726_v58, %v706_v38  ;;  %v712_v11 = vadd.f32 %v700_v15, %v680_v60  ;;  %v3043_v58 = vsel %vm78_vm0, %v596_v28, %v2979_v10  ;;  %v874_v38 = vadd.f32 %v862_v49, %v842_v51 }
 0x2a5   :  { %v3026_v12 = vsel %vm97_vm1, %v3017_v17, %v636_v16  ;;  %v3036_v6 = vsel %vm97_vm1, %v634_v44, %v638_v22  ;;  %v868_v15 = vmul.f32 %v2969_v18, %v2886_v59  ;;  %v849_v49 = vmul.f32 %v2959_v50, %v3043_v58 }
 0x2a6   :  { %4244 = vst [vmem:[#allocation21_spill] sm:$0xff] %v3026_v12  ;;  %v732_v25 = vmul.f32 %v2955_v31, %v3026_v12  ;;  %4245 = vst [vmem:[#allocation22_spill] sm:$0xff] %v3036_v6  ;;  %921 = vrot.lane.b32.xlu0 %v738_v33, %s2453_s16  ;;  %v900_v0 = vmul.f32 %v2971_v26, %v3026_v12  ;;  %v895_v60 = vmul.f32 %v2967_v21, %v3036_v6 }
 0x2a7   :  { %v906_v51 = vadd.f32 %v894_v1, %v874_v38  ;;  %v863_v33 = vmul.f32 %v2963_v20, %v2857_v40 }
 0x2a8   :  { %v3048_v3 = vpop.permute.xlu1 %639  ;;  %v3050_v4 = vpop.permute.xlu0 %605  ;;  %v744_v44 = vadd.f32 %v732_v25, %v712_v11  ;;  %v880_v11 = vadd.f32 %v868_v15, %v848_v45  ;;  %v675_v25 = vmul.f32 %v2949_v2, %v3015_v61  ;;  %v727_v45 = vmul.f32 %v2953_v29, %v3036_v6 }
 0x2a9   :  { %v3059_v28 = vsel %vm97_vm1, %v636_v16, %v3048_v3  ;;  %v875_v42 = vadd.f32 %v863_v33, %v843_v5  ;;  %v695_v15 = vmul.f32 %v2951_v23, %v2857_v40  ;;  %v681_v5 = vmul.f32 %v2957_v39, %v3043_v58 }
 0x2aa   :  { %4246 = vst [vmem:[#allocation23_spill] sm:$0xff] %v3059_v28  ;;  %923 = vrot.lane.b32.xlu1 %v744_v44, %s2453_s16  ;;  %969 = vrot.lane.b32.xlu0 %v906_v51, %s2455_s17  ;;  %v901_v16 = vmul.f32 %v2971_v26, %v3059_v28  ;;  %v912_v38 = vadd.f32 %v900_v0, %v880_v11 }
 0x2ab   :  { %v907_v44 = vadd.f32 %v895_v60, %v875_v42  ;;  %v881_v51 = vadd.f32 %v869_v13, %v849_v49  ;;  %v707_v33 = vadd.f32 %v695_v15, %v675_v25  ;;  %v733_v0 = vmul.f32 %v2955_v31, %v3059_v28 }
 0x2ac   :  { %v3071_v32 = vpop.permute.xlu1 %607  ;;  %v3073_v1 = vpop.permute.xlu0 %609  ;;  %v701_v60 = vmul.f32 %v2961_v35, %v2864_v8  ;;  %v693_v15 = vmul.f32 %v2951_v23, %v2845_v57  ;;  %v864_v6 = vmul.f32 %v2963_v20, %v2896_v19 }
 0x2ad   :  { %v913_v42 = vadd.f32 %v901_v16, %v881_v51  ;;  %v739_v48 = vadd.f32 %v727_v45, %v707_v33  ;;  %v3124_v51 = vmul.f32 %v2961_v35, %v2850_v63  ;;  %v3128_v33 = vmul.f32 %v2969_v18, %v2850_v63 }
 0x2ae   :  { %971 = vrot.lane.b32.xlu1 %v912_v38, %s2455_s17  ;;  %973 = vrot.lane.b32.xlu0 %v907_v44, %s2455_s17  ;;  %v713_v36 = vadd.f32 %v701_v60, %v681_v5  ;;  %v3120_v5 = vmul.f32 %v2963_v20, %v2845_v57  ;;  %v698_v63 = vmul.f32 %v2951_v23, %v2913_v62 }
 0x2b0   :  { %v3087_v11 = vpop.permute.xlu1 %611  ;;  %v3089_v52 = vpop.permute.xlu0 %645  ;;  %v745_v25 = vadd.f32 %v733_v0, %v713_v36 }
 0x2b2   :  { %975 = vrot.lane.b32.xlu1 %v913_v42, %s2455_s17  ;;  %925 = vrot.lane.b32.xlu0 %v739_v48, %s2453_s16 }
 0x2b4   :  { %v3095_v13 = vpop.permute.xlu1 %647  ;;  %v602_v49 = vpop.permute.xlu0 %601 }
 0x2b5   :  { %v3100_v38 = vsel %vm78_vm0, %v2977_v53, %v602_v49  ;;  %v696_v53 = vmul.f32 %v2951_v23, %v2896_v19  ;;  %v3145_v12 = vsel %vm78_vm0, %v602_v49, %v3050_v4 }
 0x2b6   :  { %927 = vrot.lane.b32.xlu1 %v745_v25, %s2453_s16  ;;  %v676_v16 = vmul.f32 %v2949_v2, %v3100_v38  ;;  %v844_v0 = vmul.f32 %v2965_v55, %v3100_v38  ;;  %v3140_v25 = vmul.f32 %v2963_v20, %v2904_v37 }
 0x2b8   :  { %v604_v45 = vpop.permute.xlu1 %603  ;;  %v642_v44 = vpop.permute.xlu0 %641  ;;  %v708_v60 = vadd.f32 %v696_v53, %v676_v16  ;;  %v3157_v16 = vsel %vm78_vm0, %v3073_v1, %v2973_v54 }
 0x2b9   :  { %v3110_v48 = vsel %vm78_vm0, %v2979_v10, %v604_v45  ;;  %v3114_v36 = vsel %vm97_vm1, %v638_v22, %v642_v44  ;;  %v697_v22 = vmul.f32 %v2951_v23, %v2904_v37  ;;  %v3171_v23 = vsel %vm97_vm1, %v642_v44, %v3089_v52 }
 0x2ba   :  { %4247 = vst [vmem:[#allocation24_spill] sm:$0xff] %v3114_v36  ;;  %v682_v10 = vmul.f32 %v2957_v39, %v3110_v48  ;;  %v728_v42 = vmul.f32 %v2953_v29, %v3114_v36  ;;  %v896_v49 = vmul.f32 %v2967_v21, %v3114_v36  ;;  %v850_v59 = vmul.f32 %v2959_v50, %v3110_v48 }
 0x2bb   :  { %v677_v36 = vmul.f32 %v2949_v2, %v3145_v12  ;;  %v673_v44 = vmul.f32 %v2949_v2, %v3157_v16 }
 0x2bc   :  { %v644_v28 = vpop.permute.xlu1 %643  ;;  %v740_v57 = vadd.f32 %v728_v42, %v708_v60  ;;  %v714_v9 = vadd.f32 %v702_v27, %v682_v10  ;;  %v876_v42 = vadd.f32 %v864_v6, %v844_v0  ;;  %v3185_v60 = vmul.f32 %v2963_v20, %v2913_v62 }
 0x2bd   :  { %v3164_v53 = vsel %vm97_vm1, %v3048_v3, %v644_v28  ;;  %v3180_v3 = vsel %vm78_vm0, %v604_v45, %v3071_v32  ;;  %v729_v6 = vmul.f32 %v2953_v29, %v3171_v23  ;;  %v3204_v20 = vsel %vm97_vm1, %v644_v28, %v3095_v13 }
 0x2be   :  { %v734_v54 = vmul.f32 %v2955_v31, %v3164_v53  ;;  %929 = vrot.lane.b32.xlu0 %v740_v57, %s2453_s16  ;;  %v902_v27 = vmul.f32 %v2971_v26, %v3164_v53  ;;  %v3197_v57 = vsel %vm78_vm0, %v3087_v11, %v2975_v41  ;;  %v908_v45 = vadd.f32 %v896_v49, %v876_v42 }
 0x2bf   :  { %v683_v0 = vmul.f32 %v2957_v39, %v3180_v3  ;;  %v703_v41 = vmul.f32 %v2961_v35, %v2915_v34  ;;  %v3221_v28 = vsel %vm97_vm1, %v2981_v7, %v2992_v14  ;;  %v704_v49 = vmul.f32 %v2961_v35, %v2922_v30 }
 0x2c0   :  { %v746_v10 = vadd.f32 %v734_v54, %v714_v9  ;;  %v3210_v9 = vsel %vm78_vm0, %v3050_v4, %v3073_v1  ;;  %v882_v54 = vadd.f32 %v870_v46, %v850_v59  ;;  %v871_v4 = vmul.f32 %v2969_v18, %v2915_v34 }
 0x2c1   :  { %v709_v1 = vadd.f32 %v697_v22, %v677_v36  ;;  %v3232_v46 = vsel %vm97_vm1, %v2983_v43, %v3017_v17  ;;  %v679_v59 = vmul.f32 %v2957_v39, %v3197_v57  ;;  %v735_v14 = vmul.f32 %v2955_v31, %v3204_v20 }
 0x2c2   :  { %931 = vrot.lane.b32.xlu1 %v746_v10, %s2453_s16  ;;  %977 = vrot.lane.b32.xlu0 %v908_v45, %s2455_s17  ;;  %v914_v42 = vadd.f32 %v902_v27, %v882_v54  ;;  %v678_v35 = vmul.f32 %v2949_v2, %v3210_v9  ;;  %v872_v10 = vmul.f32 %v2969_v18, %v2922_v30 }
 0x2c3   :  { %v741_v36 = vadd.f32 %v729_v6, %v709_v1  ;;  %v705_v22 = vadd.f32 %v693_v15, %v673_v44  ;;  %v841_v45 = vmul.f32 %v2965_v55, %v3157_v16  ;;  %v3248_v17 = vsel %vm78_vm0, %v3071_v32, %v3087_v11 }
 0x2c4   :  { %v3254_v27 = vsel %vm97_vm1, %v3089_v52, %v2981_v7  ;;  %v715_v2 = vadd.f32 %v703_v41, %v683_v0  ;;  %v725_v18 = vmul.f32 %v2953_v29, %v3221_v28  ;;  %v893_v15 = vmul.f32 %v2967_v21, %v3221_v28 }
 0x2c5   :  { %v731_v44 = vmul.f32 %v2955_v31, %v3232_v46  ;;  %v847_v32 = vmul.f32 %v2959_v50, %v3197_v57  ;;  %v846_v52 = vmul.f32 %v2965_v55, %v3210_v9  ;;  %v711_v7 = vadd.f32 %v3124_v51, %v679_v59 }
 0x2c6   :  { %979 = vrot.lane.b32.xlu1 %v914_v42, %s2455_s17  ;;  %933 = vrot.lane.b32.xlu0 %v741_v36, %s2453_s16  ;;  %v3273_v11 = vsel %vm97_vm1, %v3095_v13, %v2983_v43  ;;  %v747_v6 = vadd.f32 %v735_v14, %v715_v2  ;;  %v684_v0 = vmul.f32 %v2957_v39, %v3248_v17 }
 0x2c7   :  { %v852_v41 = vmul.f32 %v2959_v50, %v3248_v17  ;;  %v730_v54 = vmul.f32 %v2953_v29, %v3254_v27  ;;  %v737_v42 = vadd.f32 %v725_v18, %v705_v22  ;;  %v845_v51 = vmul.f32 %v2965_v55, %v3145_v12 }
 0x2c8   :  { %v851_v59 = vmul.f32 %v2959_v50, %v3180_v3  ;;  %v710_v43 = vadd.f32 %v698_v63, %v678_v35  ;;  %v873_v13 = vadd.f32 %v3120_v5, %v841_v45  ;;  %v879_v39 = vadd.f32 %v3128_v33, %v847_v32 }
 0x2c9   :  { %v751_v1 = vpop.permute.xlu0 %750  ;;  %v898_v14 = vmul.f32 %v2967_v21, %v3254_v27  ;;  %v736_v29 = vmul.f32 %v2955_v31, %v3273_v11  ;;  %v904_v36 = vmul.f32 %v2971_v26, %v3273_v11  ;;  %v899_v50 = vmul.f32 %v2971_v26, %v3232_v46 }
 0x2ca   :  { %935 = vrot.lane.b32.xlu1 %v747_v6, %s2453_s16  ;;  %917 = vrot.lane.b32.xlu0 %v737_v42, %s2453_s16  ;;  %v897_v63 = vmul.f32 %v2967_v21, %v3171_v23  ;;  %v903_v55 = vmul.f32 %v2971_v26, %v3204_v20  ;;  %v743_v5 = vadd.f32 %v731_v44, %v711_v7 }
 0x2cb   :  { %v716_v33 = vadd.f32 %v704_v49, %v684_v0  ;;  %v884_v35 = vadd.f32 %v872_v10, %v852_v41  ;;  %v742_v45 = vadd.f32 %v730_v54, %v710_v43  ;;  %v878_v31 = vadd.f32 %v3185_v60, %v846_v52  ;;  %v4251_v43 = vld [vmem:[#allocation10_spill] sm:$0xff] }
 0x2cc   :  { %v883_v2 = vadd.f32 %v871_v4, %v851_v59  ;;  %v905_v18 = vadd.f32 %v893_v15, %v873_v13  ;;  %v877_v32 = vadd.f32 %v3140_v25, %v845_v51  ;;  %v911_v42 = vadd.f32 %v899_v50, %v879_v39  ;;  %v4249_v51 = vld [vmem:[#allocation19_spill] sm:$0xff]  ;;  %v4250_v59 = vld [vmem:[#allocation17_spill] sm:$0xff] }
 0x2cd   :  { %v755_v22 = vpop.permute.xlu1 %754  ;;  %v748_v21 = vadd.f32 %v736_v29, %v716_v33  ;;  %v910_v24 = vadd.f32 %v898_v14, %v878_v31  ;;  %v3305_v26 = vadd.f32 %v904_v36, %v884_v35  ;;  %v759_v44 = vmul.f32 %v751_v1, %v3015_v61  ;;  %v4252_v14 = vld [vmem:[#allocation11_spill] sm:$0xff]  ;;  %v4255_v35 = vld [vmem:[#allocation20_spill] sm:$0xff] }
 0x2ce   :  { %919 = vrot.lane.b32.xlu1 %v743_v5, %s2453_s16  ;;  %937 = vrot.lane.b32.xlu0 %v742_v45, %s2453_s16  ;;  %v775_v6 = vpop.permute.xlu0 %774  ;;  %v909_v49 = vadd.f32 %v897_v63, %v877_v32  ;;  %v915_v10 = vadd.f32 %v903_v55, %v883_v2  ;;  %v760_v60 = vmul.f32 %v751_v1, %v3100_v38 }
 0x2cf   :  { %v761_v4 = vmul.f32 %v751_v1, %v3145_v12  ;;  %v758_v15 = vmul.f32 %v751_v1, %v2988_v47  ;;  %v757_v25 = vmul.f32 %v751_v1, %v3157_v16  ;;  %v762_v52 = vmul.f32 %v751_v1, %v3210_v9  ;;  %v4248_v16 = vld [vmem:[#allocation14_spill] sm:$0xff] }
 0x2d0   :  { %v765_v0 = vmul.f32 %v755_v22, %v3043_v58  ;;  %v785_v41 = vmul.f32 %v775_v6, %v2864_v8  ;;  %v766_v54 = vmul.f32 %v755_v22, %v3110_v48  ;;  %v786_v61 = vmul.f32 %v775_v6, %v2907_v56 }
 0x2d1   :  { %v767_v1 = vmul.f32 %v755_v22, %v3180_v3  ;;  %v787_v58 = vmul.f32 %v775_v6, %v2915_v34  ;;  %v764_v8 = vmul.f32 %v755_v22, %v4249_v51  ;;  %v784_v48 = vmul.f32 %v775_v6, %v4250_v59 }
 0x2d2   :  { %v771_v7 = vpop.permute.xlu1 %770  ;;  %939 = vrot.lane.b32.xlu1 %v748_v21, %s2453_s16  ;;  %965 = vrot.lane.b32.xlu0 %v905_v18, %s2455_s17  ;;  %v798_v39 = vadd.f32 %v786_v61, %v766_v54  ;;  %v783_v3 = vmul.f32 %v775_v6, %v4252_v14  ;;  %v788_v34 = vmul.f32 %v775_v6, %v2922_v30  ;;  %v4263_v51 = vmov 8   ;;  %v2391_v14 = vld [vmem:[%s4164_s0 + $0x18] sm:$0xff] }
 0x2d3   :  { %v779_v12 = vmul.f32 %v771_v7, %v2857_v40  ;;  %v780_v47 = vmul.f32 %v771_v7, %v2896_v19  ;;  %v781_v38 = vmul.f32 %v771_v7, %v2904_v37  ;;  %v778_v9 = vmul.f32 %v771_v7, %v4248_v16 }
 0x2d4   :  { %v777_v56 = vmul.f32 %v771_v7, %v4251_v43  ;;  %v782_v13 = vmul.f32 %v771_v7, %v2913_v62  ;;  %v763_v40 = vmul.f32 %v755_v22, %v3197_v57  ;;  %v768_v19 = vmul.f32 %v755_v22, %v3248_v17  ;;  %v4253_v62 = vld [vmem:[#allocation22_spill] sm:$0xff]  ;;  %v4254_v57 = vld [vmem:[#allocation24_spill] sm:$0xff] }
 0x2d5   :  { %v797_v37 = vadd.f32 %v785_v41, %v765_v0  ;;  %v791_v36 = vadd.f32 %v779_v12, %v759_v44  ;;  %v792_v50 = vadd.f32 %v780_v47, %v760_v60  ;;  %v793_v63 = vadd.f32 %v781_v38, %v761_v4  ;;  %v3385_v47 = vld [vmem:[%s4172_s8] sm:$0xff] }
 0x2d6   :  { %967 = vrot.lane.b32.xlu1 %v911_v42, %s2455_s17  ;;  %981 = vrot.lane.b32.xlu0 %v909_v49, %s2455_s17  ;;  %v790_v55 = vadd.f32 %v778_v9, %v758_v15  ;;  %v789_v45 = vadd.f32 %v777_v56, %v757_v25  ;;  %v794_v31 = vadd.f32 %v782_v13, %v762_v52  ;;  %v4257_v15 = vld [vmem:[#allocation21_spill] sm:$0xff]  ;;  %v4258_v38 = vmov 1  }
 0x2d7   :  { %v803_v29 = vpop.permute.xlu1 %802  ;;  %v799_v42 = vadd.f32 %v787_v58, %v767_v1  ;;  %v796_v49 = vadd.f32 %v784_v48, %v764_v8  ;;  %v800_v0 = vadd.f32 %v788_v34, %v768_v19  ;;  %v4259_v16 = vmov 6  }
 0x2d8   :  { %v811_v5 = vmul.f32 %v803_v29, %v4253_v62  ;;  %v812_v33 = vmul.f32 %v803_v29, %v4254_v57  ;;  %v813_v17 = vmul.f32 %v803_v29, %v3171_v23  ;;  %v810_v22 = vmul.f32 %v803_v29, %v4255_v35 }
 0x2d9   :  { %v809_v2 = vmul.f32 %v803_v29, %v3221_v28  ;;  %v814_v30 = vmul.f32 %v803_v29, %v3254_v27  ;;  %v4256_v27 = vld [vmem:[#allocation23_spill] sm:$0xff]  ;;  %v4260_v9 = vmov 2   ;;  %v4261_v1 = vmov 7  }
 0x2da   :  { %983 = vrot.lane.b32.xlu1 %v915_v10, %s2455_s17  ;;  %v3342_v18 = vadd.f32 %v811_v5, %v791_v36  ;;  %v3344_v32 = vadd.f32 %v812_v33, %v792_v50  ;;  %v3346_v6 = vadd.f32 %v813_v17, %v793_v63  ;;  %v3348_v21 = vadd.f32 %v810_v22, %v790_v55 }
 0x2db   :  { %985 = vrot.lane.b32.xlu0 %v910_v24, %s2455_s17  ;;  %v807_v23 = vpop.permute.xlu1 %806  ;;  %v3351_v44 = vadd.f32 %v809_v2, %v789_v45  ;;  %v3353_v28 = vadd.f32 %v814_v30, %v794_v31  ;;  %v795_v24 = vadd.f32 %v783_v3, %v763_v40  ;;  %v4262_v58 = vmov 3  }
 0x2dc   :  { %v817_v60 = vmul.f32 %v807_v23, %v4256_v27  ;;  %v818_v10 = vmul.f32 %v807_v23, %v3164_v53  ;;  %v819_v4 = vmul.f32 %v807_v23, %v3204_v20  ;;  %v816_v25 = vmul.f32 %v807_v23, %v4257_v15  ;;  %v1015_v53 = vld [vmem:[%s4171_s7] sm:$0xff] }
 0x2dd   :  { %v815_v52 = vmul.f32 %v807_v23, %v3232_v46  ;;  %v820_v7 = vmul.f32 %v807_v23, %v3273_v11  ;;  %v1016_v11 = vld [vmem:[%s4171_s7 + $0x8] sm:$0xff] }
 0x2de   :  { %987 = vrot.lane.b32.xlu1 %v3305_v26, %s2455_s17  ;;  %v829_v41 = vadd.f32 %v817_v60, %v797_v37  ;;  %v3363_v54 = vadd.f32 %v818_v10, %v798_v39  ;;  %v3365_v61 = vadd.f32 %v819_v4, %v799_v42  ;;  %v828_v12 = vadd.f32 %v816_v25, %v796_v49  ;;  %v3380_v26 = vld [vmem:[%s4172_s8 + $0x8] sm:$0xff] }
 0x2df   :  { %v3370_v20 = vadd.f32 %v815_v52, %v795_v24  ;;  %v3372_v46 = vadd.f32 %v820_v7, %v800_v0  ;;  %1019 = vperm.xlu0 %2370, %v1015_v53  }
 0x2e2   :  { %1024 = vperm.xlu1 %2371, %v1016_v11  }
 0x2e3   :  { %1382 = vperm.xlu0 %2370, %v3380_v26  }
 0x2e6   :  { %1377 = vperm.xlu1 %2371, %v3385_v47  }
 0x2e7   :  { %2373 = vset.pattern.permute.xlu0 %v4258_v38 }
 0x2e8   :  { %1402 = vperm.xlu0 %2373, %v3380_v26  }
 0x2ea   :  { %2372 = vset.pattern.permute.xlu1 %v4258_v38 }
 0x2eb   :  { %1398 = vperm.xlu1 %2372, %v3385_v47  }
 0x2ec   :  { %2375 = vset.pattern.permute.xlu0 %v4259_v16 }
 0x2ed   :  { %1546 = vperm.xlu0 %2375, %v3385_v47  }
 0x2ef   :  { %2374 = vset.pattern.permute.xlu1 %v4260_v9 }
 0x2f0   :  { %1430 = vperm.xlu1 %2374, %v3385_v47  }
 0x2f1   :  { %2378 = vset.pattern.permute.xlu0 %v4261_v1 }
 0x2f2   :  { %1570 = vperm.xlu0 %2378, %v3380_v26  }
 0x2f4   :  { %1434 = vperm.xlu1 %2374, %v3380_v26  }
 0x2f6   :  { %2380 = vset.pattern.permute.xlu0 %v4262_v58 }
 0x2f8   :  { %2376 = vset.pattern.permute.xlu1 %v4259_v16 }
 0x2f9   :  { %1550 = vperm.xlu1 %2376, %v3380_v26  }
 0x2fd   :  { %2377 = vset.pattern.permute.xlu1 %v4261_v1 }
 0x2fe   :  { %1566 = vperm.xlu1 %2377, %v3385_v47  }
 0x302   :  { %2379 = vset.pattern.permute.xlu1 %v4263_v51 }
 0x303   :  { %1598 = vperm.xlu1 %2379, %v3385_v47  }
 0x307   :  { %1602 = vperm.xlu1 %2379, %v3380_v26  }
 0x30b   :  { %2381 = vset.pattern.permute.xlu1 %v4262_v58 }
 0x318   :  { %v922_v8 = vpop.permute.xlu0 %921 }
 0x31c   :  { %v924_v59 = vpop.permute.xlu1 %923  ;;  %v970_v48 = vpop.permute.xlu0 %969 }
 0x320   :  { %v972_v43 = vpop.permute.xlu1 %971  ;;  %v974_v56 = vpop.permute.xlu0 %973 }
 0x321   :  { %v995_v42 = vsel %vm269_vm3, %v970_v48, %v974_v56 }
 0x324   :  { %v976_v13 = vpop.permute.xlu1 %975  ;;  %v926_v40 = vpop.permute.xlu0 %925 }
 0x325   :  { %v947_v3 = vsel %vm244_vm2, %v922_v8, %v926_v40  ;;  %v996_v49 = vsel %vm269_vm3, %v972_v43, %v976_v13 }
 0x326   :  { %v955_v50 = vadd.f32 %v947_v3, %v3342_v18 }
 0x328   :  { %v928_v19 = vpop.permute.xlu1 %927 }
 0x329   :  { %v948_v34 = vsel %vm244_vm2, %v924_v59, %v928_v19 }
 0x32a   :  { %v961_v63 = vadd.f32 %v948_v34, %v829_v41 }
 0x330   :  { %v930_v37 = vpop.permute.xlu0 %929 }
 0x331   :  { %v945_v41 = vsel %vm244_vm2, %v926_v40, %v930_v37  ;;  %v1013_v40 = vld [vmem:[%s4170_s6] sm:$0xff] }
 0x334   :  { %v932_v39 = vpop.permute.xlu1 %931  ;;  %v978_v29 = vpop.permute.xlu0 %977 }
 0x335   :  { %v993_v36 = vsel %vm269_vm3, %v974_v56, %v978_v29 }
 0x336   :  { %v3418_v57 = vadd.f32 %v993_v36, %v955_v50 }
 0x338   :  { %v980_v55 = vpop.permute.xlu1 %979  ;;  %v934_v5 = vpop.permute.xlu0 %933 }
 0x339   :  { %v994_v62 = vsel %vm269_vm3, %v976_v13, %v980_v55  ;;  %v943_v1 = vsel %vm244_vm2, %v930_v37, %v934_v5 }
 0x33a   :  { %v3420_v33 = vadd.f32 %v994_v62, %v961_v63 }
 0x33c   :  { %v2310_v17 = vpack.c.bf16 %v3420_v33, %v3418_v57  ;;  %v936_v35 = vpop.permute.xlu1 %935  ;;  %v918_v22 = vpop.permute.xlu0 %917 }
 0x33d   :  { %v949_v45 = vsel %vm244_vm2, %v918_v22, %v922_v8  ;;  %v944_v8 = vsel %vm244_vm2, %v932_v39, %v936_v35 }
 0x33e   :  { %v954_v31 = vadd.f32 %v949_v45, %v3348_v21 }
 0x340   :  { %v920_v2 = vpop.permute.xlu1 %919  ;;  %v938_v18 = vpop.permute.xlu0 %937  ;;  %v1002_v27 = vadd.f32 %v995_v42, %v954_v31 }
 0x341   :  { %v950_v30 = vsel %vm244_vm2, %v920_v2, %v924_v59  ;;  %v951_v4 = vsel %vm244_vm2, %v938_v18, %v918_v22  ;;  %v941_v59 = vsel %vm244_vm2, %v934_v5, %v938_v18 }
 0x342   :  { %v960_v23 = vadd.f32 %v950_v30, %v828_v12  ;;  %v953_v7 = vadd.f32 %v951_v4, %v3351_v44  ;;  %v946_v12 = vsel %vm244_vm2, %v928_v19, %v932_v39  ;;  %v956_v44 = vadd.f32 %v945_v41, %v3344_v32 }
 0x343   :  { %v957_v19 = vadd.f32 %v943_v1, %v3346_v6  ;;  %v963_v39 = vadd.f32 %v944_v8, %v3365_v61  ;;  %v958_v3 = vadd.f32 %v941_v59, %v3353_v28  ;;  %v4265_v61 = vmov 0.0   ;;  %v1014_v28 = vld [vmem:[%s4170_s6 + $0x8] sm:$0xff] }
 0x344   :  { %v1008_v60 = vadd.f32 %v996_v49, %v960_v23  ;;  %v940_v10 = vpop.permute.xlu1 %939  ;;  %v966_v15 = vpop.permute.xlu0 %965 }
 0x345   :  { %v952_v21 = vsel %vm244_vm2, %v940_v10, %v920_v2  ;;  %v997_v52 = vsel %vm269_vm3, %v966_v15, %v970_v48  ;;  %v942_v48 = vsel %vm244_vm2, %v936_v35, %v940_v10 }
 0x346   :  { %v2304_v25 = vpack.c.bf16 %v1008_v60, %v1002_v27  ;;  %v959_v24 = vadd.f32 %v952_v21, %v3370_v20  ;;  %v1001_v38 = vadd.f32 %v997_v52, %v953_v7  ;;  %v962_v20 = vadd.f32 %v946_v12, %v3363_v54  ;;  %v4266_v60 = vld [vmem:[#allocation12_spill] sm:$0xff] }
 0x347   :  { %v964_v34 = vadd.f32 %v942_v48, %v3372_v46 }
 0x348   :  { %v968_v0 = vpop.permute.xlu1 %967  ;;  %2305 = vmatprep.subr.bf16.mxu1 %v2304_v25  ;;  %v982_v11 = vpop.permute.xlu0 %981 }
 0x349   :  { %v998_v53 = vsel %vm269_vm3, %v968_v0, %v972_v43  ;;  %v991_v9 = vsel %vm269_vm3, %v978_v29, %v982_v11 }
 0x34a   :  { %v1007_v16 = vadd.f32 %v998_v53, %v959_v24  ;;  %v1004_v56 = vadd.f32 %v991_v9, %v956_v44 }
 0x34c   :  { %v2306_v58 = vpack.c.bf16 %v1007_v16, %v1001_v38  ;;  %v984_v51 = vpop.permute.xlu1 %983 }
 0x34d   :  { %v992_v43 = vsel %vm269_vm3, %v980_v55, %v984_v51  ;;  %v986_v32 = vpop.permute.xlu0 %985 }
 0x34e   :  { %v1010_v54 = vadd.f32 %v992_v43, %v962_v20  ;;  %v989_v13 = vsel %vm269_vm3, %v982_v11, %v986_v32  ;;  %2307 = vmatpush1.bf16.msra.mxu1 %v2306_v58  ;;  %v999_v37 = vsel %vm269_vm3, %v986_v32, %v966_v15  ;;  %v4267_v11 = vld [vmem:[#allocation15_spill] sm:$0xff] }
 0x34f   :  { %v1005_v50 = vadd.f32 %v989_v13, %v957_v19  ;;  %v1006_v6 = vadd.f32 %v999_v37, %v958_v3 }
 0x350   :  { %v988_v29 = vpop.permute.xlu1 %987  ;;  %v2308_v36 = vpack.c.bf16 %v1010_v54, %v1004_v56 }
 0x351   :  { %v990_v63 = vsel %vm269_vm3, %v984_v51, %v988_v29  ;;  %v1000_v55 = vsel %vm269_vm3, %v988_v29, %v968_v0  ;;  %2286 = vmatmul.mubr.msk.f32.vlgmr.msra.gmra.mrb[4].mxu1 %vm1027_vm5, %v1013_v40  ;;  %v4269_v51 = vld [vmem:[#allocation9_spill] sm:$0xff] }
 0x352   :  { %v1011_v62 = vadd.f32 %v990_v63, %v963_v39  ;;  %v1012_v5 = vadd.f32 %v1000_v55, %v964_v34  ;;  %2309 = vmatprep.subr.bf16.mxu0 %v2308_v36  ;;  %1104 = vmatprep.mubr.f32.mxu1 %v4265_v61  ;;  %v4274_v55 = vld [vmem:[#allocation16_spill] sm:$0xff] }
 0x353   :  { %2311 = vmatpush1.bf16.msra.mxu0 %v2310_v17 }
 0x354   :  { %v2314_v46 = vpack.c.bf16 %v1011_v62, %v1005_v50  ;;  %v2312_v57 = vpack.c.bf16 %v1012_v5, %v1006_v6 }
 0x355   :  { %2287 = vmatmul.mubr.msk.f32.gmra.mrb[6].mxu1 %vm1027_vm5, %v1014_v28 }
 0x356   :  { %2288 = vmatmul.mubr.msk.f32.vlgmr.msra.gmra.mrb[8].mxu0 %vm1027_vm5, %v1013_v40  ;;  %2313 = vmatprep.subr.bf16.mxu1 %v2312_v57 }
 0x357   :  { %2315 = vmatpush1.bf16.msra.mxu1 %v2314_v46  ;;  %1181 = vmatprep.mubr.f32.mxu0 %v4265_v61 }
 0x358   :  { %1252 = vmatprep.mubr.f32.mxu1 %v4265_v61 }
 0x35a   :  { %2289 = vmatmul.mubr.msk.f32.gmra.mrb[10].mxu0 %vm1027_vm5, %v1014_v28  ;;  %2290 = vmatmul.mubr.msk.f32.vlgmr.msra.gmra.mrb[8].mxu1 %vm1027_vm5, %v1013_v40  ;;  %v4271_v40 = vld [vmem:[#allocation13_spill] sm:$0xff] }
 0x35b   :  { %1258 = vmatprep.mubr.f32.mxu1 %v4265_v61  ;;  %1809 = vmatprep.mubr.f32.mxu0 %v4265_v61 }
 0x35e   :  { %2291 = vmatmul.mubr.msk.f32.gmra.mrb[10].mxu1 %vm1027_vm5, %v1014_v28  ;;  %v1020_v35 = vpop.permute.xlu0 %1019 }
 0x35f   :  { %1886 = vmatprep.mubr.f32.mxu1 %v4265_v61 }
 0x361   :  { %v1025_v18 = vpop.permute.xlu1 %1024 }
 0x424   :  { %v1100_v33 = vpop.f32.mrb[4].mxu1 }
 0x425   :  { %v1102_v17 = vpop.f32.mrb[5].mxu1  ;;  %v1101_v53 = vadd.f32 %v1100_v33, %v1020_v35 }
 0x426   :  { %v1103_v59 = vadd.f32 %v1102_v17, %v1020_v35  ;;  %v4275_v17 = vld [vmem:[#allocation18_spill] sm:$0xff] }
 0x427   :  { %v1265_v44 = vmax.f32 %v1101_v53, 0.0 }
 0x428   :  { %v1106_v22 = vpop.f32.mrb[6].mxu1  ;;  %v1266_v56 = vmax.f32 %v1103_v59, 0.0 }
 0x429   :  { %v1177_v45 = vpop.f32.mrb[8].mxu0  ;;  %v1108_v31 = vpop.f32.mrb[7].mxu1  ;;  %v1107_v1 = vadd.f32 %v1106_v22, %v1025_v18  ;;  %v1277_v8 = vmul.f32 %v1265_v44, %v4269_v51 }
 0x42a   :  { %v1178_v2 = vadd.f32 %v1177_v45, %v1020_v35  ;;  %v1179_v30 = vpop.f32.mrb[9].mxu0  ;;  %v1109_v13 = vadd.f32 %v1108_v31, %v1025_v18  ;;  %v1278_v19 = vmul.f32 %v1266_v56, %v4271_v40 }
 0x42b   :  { %v1180_v42 = vadd.f32 %v1179_v30, %v1020_v35  ;;  %v1271_v48 = vmax.f32 %v1107_v1, 0.0  ;;  %v3518_v32 = vmax.f32 %v1277_v8, 0.0 }
 0x42c   :  { %v1267_v23 = vmax.f32 %v1178_v2, 0.0  ;;  %v1272_v39 = vmax.f32 %v1109_v13, 0.0  ;;  %v3532_v34 = vmax.f32 %v1278_v19, 0.0 }
 0x42d   :  { %v1183_v49 = vpop.f32.mrb[10].mxu0  ;;  %v1254_v27 = vpop.f32.mrb[8].mxu1  ;;  %v1268_v52 = vmax.f32 %v1180_v42, 0.0  ;;  %4270 = vst [vmem:[#allocation19_spill] sm:$0xff] %v3518_v32  ;;  %v1283_v54 = vmul.f32 %v1271_v48, %v4269_v51  ;;  %v4278_v42 = vmov 5  }
 0x42e   :  { %v1279_v10 = vmul.f32 %v1267_v23, %v4266_v60  ;;  %v1184_v4 = vadd.f32 %v1183_v49, %v1025_v18  ;;  %v1185_v21 = vpop.f32.mrb[11].mxu0  ;;  %v1256_v15 = vpop.f32.mrb[9].mxu1  ;;  %v1255_v3 = vadd.f32 %v1254_v27, %v1020_v35  ;;  %4272 = vst [vmem:[#allocation17_spill] sm:$0xff] %v3532_v34  ;;  %v1284_v29 = vmul.f32 %v1272_v39, %v4271_v40 }
 0x42f   :  { %v1186_v24 = vadd.f32 %v1185_v21, %v1025_v18  ;;  %v1280_v38 = vmul.f32 %v1268_v52, %v4267_v11  ;;  %v3526_v37 = vmax.f32 %v1283_v54, 0.0  ;;  %v1257_v62 = vadd.f32 %v1256_v15, %v1020_v35  ;;  %v3586_v49 = vpop.permute.xlu1 %1377 }
 0x430   :  { %v3492_v25 = vmax.f32 %v1279_v10, 0.0  ;;  %v1273_v7 = vmax.f32 %v1184_v4, 0.0  ;;  %v1269_v36 = vmax.f32 %v1255_v3, 0.0  ;;  %v3539_v63 = vmax.f32 %v1284_v29, 0.0  ;;  %v3594_v4 = vpop.permute.xlu0 %1382 }
 0x431   :  { %v1260_v0 = vpop.f32.mrb[10].mxu1  ;;  %v1274_v9 = vmax.f32 %v1186_v24, 0.0  ;;  %v3504_v20 = vmax.f32 %v1280_v38, 0.0  ;;  %v1270_v46 = vmax.f32 %v1257_v62, 0.0  ;;  %v4277_v23 = vmov 0  }
 0x432   :  { %v1285_v41 = vmul.f32 %v1273_v7, %v4266_v60  ;;  %v1262_v12 = vpop.f32.mrb[11].mxu1  ;;  %1309 = vrot.lane.b32.xlu0 %v3492_v25, %s2448_s23  ;;  %v1261_v50 = vadd.f32 %v1260_v0, %v1025_v18  ;;  %4273 = vst [vmem:[#allocation10_spill] sm:$0xff] %v3539_v63  ;;  %v1281_v6 = vmul.f32 %v1269_v36, %v4274_v55 }
 0x433   :  { %4268 = vst [vmem:[#allocation14_spill] sm:$0xff] %v3504_v20  ;;  %v1286_v58 = vmul.f32 %v1274_v9, %v4267_v11  ;;  %v1263_v33 = vadd.f32 %v1262_v12, %v1025_v18  ;;  %v1282_v35 = vmul.f32 %v1270_v46, %v4275_v17  ;;  %v4276_v18 = vmov 4   ;;  %v3588_v27 = vpop.permute.xlu1 %1398 }
 0x434   :  { %v3498_v16 = vmax.f32 %v1285_v41, 0.0  ;;  %v1275_v5 = vmax.f32 %v1261_v50, 0.0  ;;  %v3546_v28 = vmax.f32 %v1281_v6, 0.0  ;;  %v3598_v15 = vpop.permute.xlu0 %1402  ;;  %v1406_v13 = vmul.f32 %v3588_v27, %v3532_v34 }
 0x435   :  { %v3512_v43 = vmax.f32 %v1286_v58, 0.0  ;;  %v1276_v45 = vmax.f32 %v1263_v33, 0.0  ;;  %v3560_v31 = vmax.f32 %v1282_v35, 0.0 }
 0x436   :  { %1311 = vrot.lane.b32.xlu1 %v3498_v16, %s2448_s23  ;;  %1345 = vrot.lane.b32.xlu0 %v3492_v25, %s2451_s30  ;;  %v1287_v57 = vmul.f32 %v1275_v5, %v4274_v55  ;;  %v1407_v55 = vmul.f32 %v3588_v27, %v3492_v25 }
 0x437   :  { %v1288_v2 = vmul.f32 %v1276_v45, %v4275_v17  ;;  %v3590_v60 = vpop.permute.xlu1 %1430 }
 0x438   :  { %v3554_v22 = vmax.f32 %v1287_v57, 0.0  ;;  %v1412_v57 = vmul.f32 %v3598_v15, %v3539_v63 }
 0x439   :  { %v3567_v30 = vmax.f32 %v1288_v2, 0.0 }
 0x43a   :  { %1347 = vrot.lane.b32.xlu1 %v3498_v16, %s2451_s30  ;;  %1313 = vrot.lane.b32.xlu0 %v3504_v20, %s2448_s23 }
 0x43b   :  { %v3592_v10 = vpop.permute.xlu1 %1434 }
 0x43e   :  { %1315 = vrot.lane.b32.xlu1 %v3512_v43, %s2448_s23  ;;  %1349 = vrot.lane.b32.xlu0 %v3504_v20, %s2451_s30 }
 0x43f   :  { %v3596_v21 = vpop.permute.xlu1 %1550 }
 0x442   :  { %1351 = vrot.lane.b32.xlu1 %v3512_v43, %s2451_s30  ;;  %1301 = vrot.lane.b32.xlu0 %v3518_v32, %s2448_s23 }
 0x443   :  { %v3600_v52 = vpop.permute.xlu1 %1566 }
 0x446   :  { %1303 = vrot.lane.b32.xlu1 %v3526_v37, %s2448_s23  ;;  %1337 = vrot.lane.b32.xlu0 %v3518_v32, %s2451_s30 }
 0x44a   :  { %1339 = vrot.lane.b32.xlu1 %v3526_v37, %s2451_s30  ;;  %1305 = vrot.lane.b32.xlu0 %v3532_v34, %s2448_s23 }
 0x44e   :  { %1307 = vrot.lane.b32.xlu1 %v3539_v63, %s2448_s23  ;;  %1341 = vrot.lane.b32.xlu0 %v3532_v34, %s2451_s30 }
 0x452   :  { %1343 = vrot.lane.b32.xlu1 %v3539_v63, %s2451_s30  ;;  %1317 = vrot.lane.b32.xlu0 %v3546_v28, %s2448_s23 }
 0x456   :  { %1319 = vrot.lane.b32.xlu1 %v3554_v22, %s2448_s23  ;;  %1353 = vrot.lane.b32.xlu0 %v3546_v28, %s2451_s30 }
 0x45a   :  { %1355 = vrot.lane.b32.xlu1 %v3554_v22, %s2451_s30  ;;  %1321 = vrot.lane.b32.xlu0 %v3560_v31, %s2448_s23 }
 0x45e   :  { %1323 = vrot.lane.b32.xlu1 %v3567_v30, %s2448_s23  ;;  %1357 = vrot.lane.b32.xlu0 %v3560_v31, %s2451_s30 }
 0x462   :  { %1359 = vrot.lane.b32.xlu1 %v3567_v30, %s2451_s30  ;;  %1462 = vperm.xlu0 %2380, %v3385_v47  }
 0x466   :  { %1466 = vperm.xlu1 %2381, %v3380_v26   ;;  %2383 = vset.pattern.permute.xlu0 %v4276_v18 }
 0x467   :  { %1486 = vperm.xlu0 %2383, %v3380_v26  }
 0x46a   :  { %2382 = vset.pattern.permute.xlu1 %v4276_v18  ;;  %v1413_v18 = vmul.f32 %v3598_v15, %v3498_v16 }
 0x46b   :  { %1482 = vperm.xlu1 %2382, %v3385_v47   ;;  %2385 = vset.pattern.permute.xlu0 %v4277_v23 }
 0x46f   :  { %2384 = vset.pattern.permute.xlu1 %v4278_v42 }
 0x470   :  { %1514 = vperm.xlu1 %2384, %v3385_v47   ;;  %v3602_v47 = vpop.permute.xlu0 %1546 }
 0x474   :  { %1518 = vperm.xlu1 %2384, %v3380_v26   ;;  %v3604_v26 = vpop.permute.xlu1 %1598  ;;  %v3606_v7 = vpop.permute.xlu0 %1570 }
 0x478   :  { %2386 = vset.pattern.permute.xlu1 %v4277_v23  ;;  %v3608_v24 = vpop.permute.xlu1 %1602 }
 0x4a4   :  { %v1310_v0 = vpop.permute.xlu0 %1309 }
 0x4a8   :  { %v3610_v41 = vpop.permute.xlu1 %1311  ;;  %v1346_v12 = vpop.permute.xlu0 %1345 }
 0x4ac   :  { %v1348_v53 = vpop.permute.xlu1 %1347  ;;  %v3612_v11 = vpop.permute.xlu0 %1313 }
 0x4b0   :  { %v3614_v38 = vpop.permute.xlu1 %1315  ;;  %v1350_v9 = vpop.permute.xlu0 %1349 }
 0x4b1   :  { %v3666_v5 = vsel %vm97_vm1, %v1346_v12, %v1350_v9 }
 0x4b2   :  { %4281 = vst [vmem:[#allocation24_spill] sm:$0xff] %v3666_v5 }
 0x4b4   :  { %v3616_v44 = vpop.permute.xlu1 %1351  ;;  %v3618_v1 = vpop.permute.xlu0 %1301 }
 0x4b8   :  { %v3620_v58 = vpop.permute.xlu1 %1303  ;;  %v3622_v51 = vpop.permute.xlu0 %1337 }
 0x4bc   :  { %v3624_v8 = vpop.permute.xlu1 %1339  ;;  %v1306_v59 = vpop.permute.xlu0 %1305 }
 0x4bd   :  { %v3629_v48 = vsel %vm78_vm0, %v3618_v1, %v1306_v59  ;;  %v3633_v56 = vsel %vm78_vm0, %v1306_v59, %v1310_v0  ;;  %v3690_v59 = vsel %vm97_vm1, %v1348_v53, %v3616_v44 }
 0x4be   :  { %v1386_v54 = vmul.f32 %v3586_v49, %v3629_v48  ;;  %v1387_v39 = vmul.f32 %v3586_v49, %v3633_v56  ;;  %4283 = vst [vmem:[#allocation23_spill] sm:$0xff] %v3690_v59 }
 0x4c0   :  { %v1308_v40 = vpop.permute.xlu1 %1307  ;;  %v3639_v19 = vpop.permute.xlu0 %1341  ;;  %v1418_v6 = vadd.f32 %v1406_v13, %v1386_v54  ;;  %v1419_v35 = vadd.f32 %v1407_v55, %v1387_v39  ;;  %v1554_v54 = vmul.f32 %v3602_v47, %v3629_v48  ;;  %v1574_v55 = vmul.f32 %v3600_v52, %v3532_v34 }
 0x4c1   :  { %v3646_v3 = vsel %vm78_vm0, %v1308_v40, %v3610_v41  ;;  %v3651_v29 = vsel %vm78_vm0, %v3620_v58, %v1308_v40  ;;  %v3656_v36 = vsel %vm97_vm1, %v3639_v19, %v1346_v12  ;;  %v1439_v12 = vmul.f32 %v3590_v60, %v3666_v5 }
 0x4c2   :  { %4279 = vst [vmem:[#allocation11_spill] sm:$0xff] %v3651_v29  ;;  %4280 = vst [vmem:[#allocation22_spill] sm:$0xff] %v3656_v36  ;;  %v1392_v50 = vmul.f32 %v3594_v4, %v3651_v29  ;;  %v1438_v62 = vmul.f32 %v3590_v60, %v3656_v36  ;;  %v1393_v46 = vmul.f32 %v3594_v4, %v3646_v3 }
 0x4c4   :  { %v3672_v33 = vpop.permute.xlu1 %1343  ;;  %v3674_v17 = vpop.permute.xlu0 %1317  ;;  %v1450_v45 = vadd.f32 %v1438_v62, %v1418_v6  ;;  %v1424_v23 = vadd.f32 %v1412_v57, %v1392_v50  ;;  %v1425_v13 = vadd.f32 %v1413_v18, %v1393_v46  ;;  %v1555_v6 = vmul.f32 %v3602_v47, %v3633_v56 }
 0x4c5   :  { %v3679_v2 = vsel %vm97_vm1, %v3672_v33, %v1348_v53  ;;  %v1606_v53 = vmul.f32 %v3604_v26, %v3656_v36  ;;  %v1451_v62 = vadd.f32 %v1439_v12, %v1419_v35  ;;  %v1445_v57 = vmul.f32 %v3592_v10, %v3690_v59 }
 0x4c6   :  { %4282 = vst [vmem:[#allocation20_spill] sm:$0xff] %v3679_v2  ;;  %v1444_v42 = vmul.f32 %v3592_v10, %v3679_v2  ;;  %1633 = vrot.lane.b32.xlu0 %v1450_v45, %s2453_s16  ;;  %v1560_v46 = vmul.f32 %v3596_v21, %v3651_v29  ;;  %v1575_v45 = vmul.f32 %v3600_v52, %v3492_v25 }
 0x4c7   :  { %v1586_v18 = vadd.f32 %v1574_v55, %v1554_v54  ;;  %v3716_v35 = vsel %vm78_vm0, %v1310_v0, %v3612_v11  ;;  %v1612_v12 = vmul.f32 %v3608_v24, %v3679_v2  ;;  %v1457_v61 = vadd.f32 %v1445_v57, %v1425_v13 }
 0x4c8   :  { %v1456_v40 = vadd.f32 %v1444_v42, %v1424_v23  ;;  %v3695_v39 = vpop.permute.xlu1 %1319  ;;  %v1354_v50 = vpop.permute.xlu0 %1353  ;;  %v1580_v23 = vmul.f32 %v3606_v7, %v3539_v63  ;;  %v1561_v42 = vmul.f32 %v3596_v21, %v3646_v3  ;;  %v1587_v36 = vadd.f32 %v1575_v45, %v1555_v6 }
 0x4c9   :  { %v1618_v54 = vadd.f32 %v1606_v53, %v1586_v18  ;;  %v3728_v0 = vsel %vm97_vm1, %v1350_v9, %v1354_v50  ;;  %v1388_v29 = vmul.f32 %v3586_v49, %v3716_v35  ;;  %v3737_v13 = vsel %vm78_vm0, %v3610_v41, %v3614_v38 }
 0x4ca   :  { %1635 = vrot.lane.b32.xlu1 %v1456_v40, %s2453_s16  ;;  %1637 = vrot.lane.b32.xlu0 %v1451_v62, %s2453_s16  ;;  %v1581_v62 = vmul.f32 %v3606_v7, %v3498_v16  ;;  %v1592_v63 = vadd.f32 %v1580_v23, %v1560_v46  ;;  %4284 = vst [vmem:[#allocation21_spill] sm:$0xff] %v3728_v0 }
 0x4cb   :  { %v1607_v6 = vmul.f32 %v3604_v26, %v3666_v5  ;;  %v1408_v9 = vmul.f32 %v3588_v27, %v3504_v20  ;;  %v1556_v45 = vmul.f32 %v3602_v47, %v3716_v35  ;;  %v1440_v41 = vmul.f32 %v3590_v60, %v3728_v0 }
 0x4cc   :  { %v1356_v40 = vpop.permute.xlu1 %1355  ;;  %v3722_v55 = vpop.permute.xlu0 %1321  ;;  %v1593_v53 = vadd.f32 %v1581_v62, %v1561_v42  ;;  %v1624_v57 = vadd.f32 %v1612_v12, %v1592_v63  ;;  %v1576_v63 = vmul.f32 %v3600_v52, %v3504_v20  ;;  %v1394_v42 = vmul.f32 %v3594_v4, %v3737_v13 }
 0x4cd   :  { %v3755_v18 = vsel %vm97_vm1, %v3616_v44, %v1356_v40  ;;  %v1619_v23 = vadd.f32 %v1607_v6, %v1587_v36  ;;  %v1613_v12 = vmul.f32 %v3608_v24, %v3690_v59  ;;  %v1420_v62 = vadd.f32 %v1408_v9, %v1388_v29 }
 0x4ce   :  { %1639 = vrot.lane.b32.xlu1 %v1457_v61, %s2453_s16  ;;  %1681 = vrot.lane.b32.xlu0 %v1618_v54, %s2455_s17  ;;  %v1405_v61 = vmul.f32 %v3588_v27, %v3518_v32  ;;  %4285 = vst [vmem:[#allocation8_spill] sm:$0xff] %v3755_v18  ;;  %v3765_v54 = vmul.f32 %v3600_v52, %v3518_v32 }
 0x4cf   :  { %v1414_v44 = vmul.f32 %v3598_v15, %v3512_v43  ;;  %v1582_v36 = vmul.f32 %v3606_v7, %v3512_v43  ;;  %v3774_v6 = vmul.f32 %v3588_v27, %v3546_v28  ;;  %v3781_v59 = vsel %vm78_vm0, %v3612_v11, %v3674_v17 }
 0x4d0   :  { %v3746_v46 = vpop.permute.xlu1 %1323  ;;  %v1358_v2 = vpop.permute.xlu0 %1357  ;;  %v1608_v29 = vmul.f32 %v3604_v26, %v3728_v0  ;;  %v1446_v9 = vmul.f32 %v3592_v10, %v3755_v18  ;;  %v1588_v5 = vadd.f32 %v1576_v63, %v1556_v45  ;;  %v1577_v32 = vmul.f32 %v3600_v52, %v3546_v28 }
 0x4d1   :  { %v1452_v34 = vadd.f32 %v1440_v41, %v1420_v62  ;;  %v1426_v20 = vadd.f32 %v1414_v44, %v1394_v42  ;;  %v1562_v11 = vmul.f32 %v3596_v21, %v3737_v13  ;;  %v3797_v0 = vsel %vm78_vm0, %v3722_v55, %v3618_v1 }
 0x4d2   :  { %1683 = vrot.lane.b32.xlu1 %v1624_v57, %s2455_s17  ;;  %1685 = vrot.lane.b32.xlu0 %v1619_v23, %s2455_s17  ;;  %v1625_v57 = vadd.f32 %v1613_v12, %v1593_v53  ;;  %v1410_v23 = vmul.f32 %v3588_v27, %v3560_v31  ;;  %v3801_v53 = vsel %vm97_vm1, %v1354_v50, %v1358_v2 }
 0x4d3   :  { %v1557_v27 = vmul.f32 %v3602_v47, %v3781_v59  ;;  %v3810_v41 = vsel %vm78_vm0, %v3614_v38, %v3695_v39  ;;  %v1415_v1 = vmul.f32 %v3598_v15, %v3554_v22  ;;  %v1578_v63 = vmul.f32 %v3600_v52, %v3560_v31 }
 0x4d4   :  { %v1360_v45 = vpop.permute.xlu1 %1359  ;;  %v1583_v50 = vmul.f32 %v3606_v7, %v3554_v22  ;;  %v1620_v42 = vadd.f32 %v1608_v29, %v1588_v5  ;;  %v1458_v12 = vadd.f32 %v1446_v9, %v1426_v20  ;;  %v1614_v62 = vmul.f32 %v3608_v24, %v3755_v18 }
 0x4d5   :  { %v1385_v38 = vmul.f32 %v3586_v49, %v3797_v0  ;;  %v3827_v44 = vsel %vm78_vm0, %v3746_v46, %v3620_v58  ;;  %v3833_v52 = vsel %vm97_vm1, %v1356_v40, %v1360_v45  ;;  %v1594_v20 = vadd.f32 %v1582_v36, %v1562_v11 }
 0x4d6   :  { %1687 = vrot.lane.b32.xlu1 %v1625_v57, %s2455_s17  ;;  %1641 = vrot.lane.b32.xlu0 %v1452_v34, %s2453_s16  ;;  %v1609_v34 = vmul.f32 %v3604_v26, %v3801_v53  ;;  %v3839_v5 = vsel %vm97_vm1, %v3622_v51, %v3639_v19  ;;  %v1563_v29 = vmul.f32 %v3596_v21, %v3810_v41 }
 0x4d7   :  { %v1411_v58 = vmul.f32 %v3598_v15, %v3526_v37  ;;  %v1589_v9 = vadd.f32 %v1577_v32, %v1557_v27  ;;  %v3850_v40 = vsel %vm78_vm0, %v3674_v17, %v3722_v55  ;;  %v1416_v36 = vmul.f32 %v3598_v15, %v3567_v30 }
 0x4d8   :  { %v1579_v19 = vmul.f32 %v3606_v7, %v3526_v37  ;;  %v1626_v57 = vadd.f32 %v1614_v62, %v1594_v20  ;;  %v1391_v11 = vmul.f32 %v3594_v4, %v3827_v44  ;;  %v1584_v32 = vmul.f32 %v3606_v7, %v3567_v30 }
 0x4d9   :  { %v1615_v27 = vmul.f32 %v3608_v24, %v3833_v52  ;;  %v1437_v17 = vmul.f32 %v3590_v60, %v3839_v5  ;;  %v1605_v15 = vmul.f32 %v3604_v26, %v3839_v5  ;;  %v1417_v55 = vadd.f32 %v1405_v61, %v1385_v38 }
 0x4da   :  { %1643 = vrot.lane.b32.xlu1 %v1458_v12, %s2453_s16  ;;  %1689 = vrot.lane.b32.xlu0 %v1620_v42, %s2455_s17  ;;  %v1621_v12 = vadd.f32 %v1609_v34, %v1589_v9  ;;  %v1595_v18 = vadd.f32 %v1583_v50, %v1563_v29  ;;  %v1390_v42 = vmul.f32 %v3586_v49, %v3850_v40 }
 0x4db   :  { %v3873_v7 = vsel %vm78_vm0, %v3695_v39, %v3746_v46  ;;  %v3878_v62 = vsel %vm97_vm1, %v1358_v2, %v3622_v51  ;;  %v3885_v61 = vsel %vm97_vm1, %v3624_v8, %v3672_v33  ;;  %v1389_v50 = vmul.f32 %v3586_v49, %v3781_v59 }
 0x4dc   :  { %v1395_v39 = vmul.f32 %v3594_v4, %v3810_v41  ;;  %v1553_v46 = vmul.f32 %v3602_v47, %v3797_v0  ;;  %v1423_v51 = vadd.f32 %v1411_v58, %v1391_v11  ;;  %v1559_v2 = vmul.f32 %v3596_v21, %v3827_v44 }
 0x4dd   :  { %v3899_v33 = vsel %vm97_vm1, %v1360_v45, %v3624_v8  ;;  %v1627_v38 = vadd.f32 %v1615_v27, %v1595_v18  ;;  %v1558_v49 = vmul.f32 %v3602_v47, %v3850_v40  ;;  %v1396_v34 = vmul.f32 %v3594_v4, %v3873_v7 }
 0x4de   :  { %1691 = vrot.lane.b32.xlu1 %v1626_v57, %s2455_s17  ;;  %1693 = vrot.lane.b32.xlu0 %v1621_v12, %s2455_s17  ;;  %v1442_v20 = vmul.f32 %v3590_v60, %v3878_v62  ;;  %v1449_v58 = vadd.f32 %v1437_v17, %v1417_v55  ;;  %v1443_v9 = vmul.f32 %v3592_v10, %v3885_v61 }
 0x4df   :  { %v1422_v57 = vadd.f32 %v1410_v23, %v1390_v42  ;;  %v1564_v8 = vmul.f32 %v3596_v21, %v3873_v7  ;;  %v1441_v18 = vmul.f32 %v3590_v60, %v3801_v53  ;;  %v1585_v47 = vadd.f32 %v3765_v54, %v1553_v46 }
 0x4e0   :  { %v1610_v4 = vmul.f32 %v3604_v26, %v3878_v62  ;;  %v1447_v45 = vmul.f32 %v3592_v10, %v3833_v52  ;;  %v1448_v11 = vmul.f32 %v3592_v10, %v3899_v33  ;;  %v1421_v21 = vadd.f32 %v3774_v6, %v1389_v50 }
 0x4e1   :  { %v1463_v29 = vpop.permute.xlu0 %1462  ;;  %v1591_v23 = vadd.f32 %v1579_v19, %v1559_v2  ;;  %v1616_v60 = vmul.f32 %v3608_v24, %v3899_v33  ;;  %v1455_v27 = vadd.f32 %v1443_v9, %v1423_v51  ;;  %v1427_v17 = vadd.f32 %v1415_v1, %v1395_v39 }
 0x4e2   :  { %1695 = vrot.lane.b32.xlu1 %v1627_v38, %s2455_s17  ;;  %1629 = vrot.lane.b32.xlu0 %v1449_v58, %s2453_s16  ;;  %v1590_v54 = vadd.f32 %v1578_v63, %v1558_v49  ;;  %v1428_v55 = vadd.f32 %v1416_v36, %v1396_v34  ;;  %v1454_v12 = vadd.f32 %v1442_v20, %v1422_v57  ;;  %v4289_v57 = vld [vmem:[#allocation11_spill] sm:$0xff] }
 0x4e3   :  { %v1611_v42 = vmul.f32 %v3608_v24, %v3885_v61  ;;  %v1596_v46 = vadd.f32 %v1584_v32, %v1564_v8  ;;  %v1453_v38 = vadd.f32 %v1441_v18, %v1421_v21  ;;  %v1459_v58 = vadd.f32 %v1447_v45, %v1427_v17  ;;  %v4290_v18 = vld [vmem:[#allocation10_spill] sm:$0xff] }
 0x4e4   :  { %v1622_v10 = vadd.f32 %v1610_v4, %v1590_v54  ;;  %v1460_v6 = vadd.f32 %v1448_v11, %v1428_v55  ;;  %v1617_v50 = vadd.f32 %v1605_v15, %v1585_v47  ;;  %v1471_v63 = vmul.f32 %v1463_v29, %v3633_v56 }
 0x4e5   :  { %v1467_v26 = vpop.permute.xlu1 %1466  ;;  %v3929_v51 = vadd.f32 %v1616_v60, %v1596_v46  ;;  %v1623_v1 = vadd.f32 %v1611_v42, %v1591_v23  ;;  %v1472_v36 = vmul.f32 %v1463_v29, %v3716_v35  ;;  %v1470_v24 = vmul.f32 %v1463_v29, %v3629_v48  ;;  %v4286_v35 = vld [vmem:[#allocation14_spill] sm:$0xff] }
 0x4e6   :  { %1631 = vrot.lane.b32.xlu1 %v1455_v27, %s2453_s16  ;;  %1649 = vrot.lane.b32.xlu0 %v1454_v12, %s2453_s16  ;;  %v1487_v19 = vpop.permute.xlu0 %1486  ;;  %v1469_v32 = vmul.f32 %v1463_v29, %v3797_v0  ;;  %v1473_v39 = vmul.f32 %v1463_v29, %v3781_v59  ;;  %v1474_v2 = vmul.f32 %v1463_v29, %v3850_v40  ;;  %v4287_v59 = vld [vmem:[#allocation17_spill] sm:$0xff]  ;;  %v4288_v40 = vld [vmem:[#allocation19_spill] sm:$0xff] }
 0x4e7   :  { %v1477_v15 = vmul.f32 %v1467_v26, %v3646_v3  ;;  %v1497_v34 = vmul.f32 %v1487_v19, %v3498_v16  ;;  %v1478_v20 = vmul.f32 %v1467_v26, %v3737_v13  ;;  %v1498_v56 = vmul.f32 %v1487_v19, %v3512_v43 }
 0x4e8   :  { %v1476_v8 = vmul.f32 %v1467_v26, %v4289_v57  ;;  %v1496_v3 = vmul.f32 %v1487_v19, %v4290_v18  ;;  %v1475_v16 = vmul.f32 %v1467_v26, %v3827_v44  ;;  %v1495_v13 = vmul.f32 %v1487_v19, %v3526_v37 }
 0x4e9   :  { %v1480_v4 = vmul.f32 %v1467_v26, %v3873_v7  ;;  %v1509_v45 = vadd.f32 %v1497_v34, %v1477_v15  ;;  %v1510_v11 = vadd.f32 %v1498_v56, %v1478_v20  ;;  %v1499_v21 = vmul.f32 %v1487_v19, %v3554_v22  ;;  %v4293_v7 = vld [vmem:[#allocation22_spill] sm:$0xff] }
 0x4ea   :  { %v1483_v49 = vpop.permute.xlu1 %1482  ;;  %1651 = vrot.lane.b32.xlu1 %v1460_v6, %s2453_s16  ;;  %1677 = vrot.lane.b32.xlu0 %v1617_v50, %s2455_s17  ;;  %v1500_v23 = vmul.f32 %v1487_v19, %v3567_v30 }
 0x4eb   :  { %v1491_v48 = vmul.f32 %v1483_v49, %v3492_v25  ;;  %v1492_v0 = vmul.f32 %v1483_v49, %v4286_v35  ;;  %v1490_v9 = vmul.f32 %v1483_v49, %v4287_v59  ;;  %v1489_v29 = vmul.f32 %v1483_v49, %v4288_v40 }
 0x4ec   :  { %v1493_v43 = vmul.f32 %v1483_v49, %v3546_v28  ;;  %v1494_v47 = vmul.f32 %v1483_v49, %v3560_v31  ;;  %v1479_v25 = vmul.f32 %v1467_v26, %v3810_v41  ;;  %v4291_v31 = vld [vmem:[#allocation24_spill] sm:$0xff]  ;;  %v4292_v41 = vld [vmem:[#allocation21_spill] sm:$0xff]  ;;  %v1512_v34 = vadd.f32 %v1500_v23, %v1480_v4 }
 0x4ed   :  { %v1503_v37 = vadd.f32 %v1491_v48, %v1471_v63  ;;  %v1504_v60 = vadd.f32 %v1492_v0, %v1472_v36  ;;  %v1502_v28 = vadd.f32 %v1490_v9, %v1470_v24  ;;  %v1501_v27 = vadd.f32 %v1489_v29, %v1469_v32 }
 0x4ee   :  { %1679 = vrot.lane.b32.xlu1 %v1623_v1, %s2455_s17  ;;  %1645 = vrot.lane.b32.xlu0 %v1453_v38, %s2453_s16  ;;  %v1505_v26 = vadd.f32 %v1493_v43, %v1473_v39  ;;  %v1506_v42 = vadd.f32 %v1494_v47, %v1474_v2  ;;  %v1508_v1 = vadd.f32 %v1496_v3, %v1476_v8 }
 0x4ef   :  { %v1515_v44 = vpop.permute.xlu1 %1514  ;;  %v1507_v63 = vadd.f32 %v1495_v13, %v1475_v16 }
 0x4f0   :  { %v1523_v17 = vmul.f32 %v1515_v44, %v4291_v31  ;;  %v1524_v54 = vmul.f32 %v1515_v44, %v4292_v41  ;;  %v1522_v55 = vmul.f32 %v1515_v44, %v4293_v7  ;;  %v1521_v12 = vmul.f32 %v1515_v44, %v3839_v5 }
 0x4f1   :  { %v1525_v22 = vmul.f32 %v1515_v44, %v3801_v53  ;;  %v1526_v30 = vmul.f32 %v1515_v44, %v3878_v62  ;;  %v4294_v53 = vld [vmem:[#allocation23_spill] sm:$0xff]  ;;  %v4295_v62 = vld [vmem:[#allocation8_spill] sm:$0xff] }
 0x4f2   :  { %1647 = vrot.lane.b32.xlu1 %v1459_v58, %s2453_s16  ;;  %v1535_v46 = vadd.f32 %v1523_v17, %v1503_v37  ;;  %v1536_v38 = vadd.f32 %v1524_v54, %v1504_v60  ;;  %v3966_v6 = vadd.f32 %v1522_v55, %v1502_v28  ;;  %v3968_v19 = vadd.f32 %v1521_v12, %v1501_v27  ;;  %v4296_v58 = vld [vmem:[#allocation20_spill] sm:$0xff] }
 0x4f3   :  { %1697 = vrot.lane.b32.xlu0 %v1622_v10, %s2455_s17  ;;  %v1519_v50 = vpop.permute.xlu1 %1518  ;;  %v3971_v5 = vadd.f32 %v1525_v22, %v1505_v26  ;;  %v3973_v36 = vadd.f32 %v1526_v30, %v1506_v42  ;;  %v1511_v10 = vadd.f32 %v1499_v21, %v1479_v25 }
 0x4f4   :  { %v1529_v24 = vmul.f32 %v1519_v50, %v4294_v53  ;;  %v1530_v32 = vmul.f32 %v1519_v50, %v4295_v62  ;;  %v1528_v39 = vmul.f32 %v1519_v50, %v4296_v58  ;;  %v1527_v2 = vmul.f32 %v1519_v50, %v3885_v61  ;;  %v1727_v61 = vld [vmem:[%s4174_s10] sm:$0xff] }
 0x4f5   :  { %v1531_v49 = vmul.f32 %v1519_v50, %v3833_v52  ;;  %v1532_v15 = vmul.f32 %v1519_v50, %v3899_v33  ;;  %v1728_v52 = vld [vmem:[%s4174_s10 + $0x8] sm:$0xff]  ;;  %v1990_v33 = vld [vmem:[%s4176_s12] sm:$0xff] }
 0x4f6   :  { %1699 = vrot.lane.b32.xlu1 %v3929_v51, %s2455_s17  ;;  %v1541_v20 = vadd.f32 %v1529_v24, %v1509_v45  ;;  %v1542_v56 = vadd.f32 %v1530_v32, %v1510_v11  ;;  %v1540_v48 = vadd.f32 %v1528_v39, %v1508_v1  ;;  %v3983_v35 = vadd.f32 %v1527_v2, %v1507_v63  ;;  %v1991_v51 = vld [vmem:[%s4176_s12 + $0x8] sm:$0xff]  ;;  %v4038_v32 = vld [vmem:[%s4173_s9] sm:$0xff] }
 0x4f7   :  { %v3985_v0 = vadd.f32 %v1531_v49, %v1511_v10  ;;  %v3987_v59 = vadd.f32 %v1532_v15, %v1512_v34  ;;  %1731 = vperm.xlu0 %2385, %v1727_v61   ;;  %v2387_v2 = vld [vmem:[%s4164_s0 + $0x8] sm:$0xff] }
 0x4fa   :  { %1736 = vperm.xlu1 %2386, %v1728_v52   ;;  %v2388_v52 = vld [vmem:[%s4164_s0] sm:$0xff] }
 0x4fb   :  { %1999 = vperm.xlu0 %2385, %v1991_v51  }
 0x4fe   :  { %1994 = vperm.xlu1 %2386, %v1990_v33  }
 0x538   :  { %v1634_v9 = vpop.permute.xlu0 %1633 }
 0x53c   :  { %v1636_v40 = vpop.permute.xlu1 %1635  ;;  %v1638_v29 = vpop.permute.xlu0 %1637 }
 0x53d   :  { %v1659_v47 = vsel %vm244_vm2, %v1634_v9, %v1638_v29 }
 0x53e   :  { %v1667_v11 = vadd.f32 %v1659_v47, %v1535_v46 }
 0x540   :  { %v1640_v57 = vpop.permute.xlu1 %1639  ;;  %v1682_v8 = vpop.permute.xlu0 %1681 }
 0x541   :  { %v1660_v25 = vsel %vm244_vm2, %v1636_v40, %v1640_v57 }
 0x542   :  { %v1673_v21 = vadd.f32 %v1660_v25, %v1541_v20 }
 0x544   :  { %v1684_v18 = vpop.permute.xlu1 %1683  ;;  %v1686_v3 = vpop.permute.xlu0 %1685 }
 0x545   :  { %v1707_v24 = vsel %vm269_vm3, %v1682_v8, %v1686_v3 }
 0x548   :  { %v1688_v16 = vpop.permute.xlu1 %1687  ;;  %v4001_v13 = vpop.permute.xlu0 %1641 }
 0x549   :  { %v1657_v44 = vsel %vm244_vm2, %v1638_v29, %v4001_v13  ;;  %v1708_v62 = vsel %vm269_vm3, %v1684_v18, %v1688_v16 }
 0x54a   :  { %v1668_v41 = vadd.f32 %v1657_v44, %v1536_v38 }
 0x54c   :  { %v4003_v43 = vpop.permute.xlu1 %1643  ;;  %v1690_v4 = vpop.permute.xlu0 %1689 }
 0x54d   :  { %v1705_v45 = vsel %vm269_vm3, %v1686_v3, %v1690_v4  ;;  %v1658_v37 = vsel %vm244_vm2, %v1640_v57, %v4003_v43 }
 0x54e   :  { %v1715_v27 = vadd.f32 %v1705_v45, %v1667_v11  ;;  %v1674_v54 = vadd.f32 %v1658_v37, %v1542_v56  ;;  %v4297_v56 = vmov 0.0  }
 0x550   :  { %v1692_v23 = vpop.permute.xlu1 %1691  ;;  %v1694_v28 = vpop.permute.xlu0 %1693 }
 0x551   :  { %v1706_v60 = vsel %vm269_vm3, %v1688_v16, %v1692_v23  ;;  %v1703_v17 = vsel %vm269_vm3, %v1690_v4, %v1694_v28  ;;  %v1988_v16 = vld [vmem:[%s4175_s11] sm:$0xff] }
 0x552   :  { %v1721_v31 = vadd.f32 %v1706_v60, %v1673_v21  ;;  %v1716_v42 = vadd.f32 %v1703_v17, %v1668_v41  ;;  %v2392_v41 = vld [vmem:[%s4164_s0 + $0x10] sm:$0xff] }
 0x554   :  { %v2322_v7 = vpack.c.bf16 %v1721_v31, %v1715_v27  ;;  %v4021_v55 = vpop.permute.xlu1 %1695  ;;  %v1630_v26 = vpop.permute.xlu0 %1629 }
 0x555   :  { %v1704_v12 = vsel %vm269_vm3, %v1692_v23, %v4021_v55  ;;  %v1661_v30 = vsel %vm244_vm2, %v1630_v26, %v1634_v9  ;;  %v2389_v9 = vld [vmem:[%s4164_s0 + $0x28] sm:$0xff] }
 0x556   :  { %v1722_v22 = vadd.f32 %v1704_v12, %v1674_v54  ;;  %v1666_v46 = vadd.f32 %v1661_v30, %v3966_v6 }
 0x558   :  { %v1632_v50 = vpop.permute.xlu1 %1631  ;;  %v2320_v1 = vpack.c.bf16 %v1722_v22, %v1716_v42  ;;  %v1650_v63 = vpop.permute.xlu0 %1649  ;;  %v1714_v6 = vadd.f32 %v1707_v24, %v1666_v46 }
 0x559   :  { %v1662_v38 = vsel %vm244_vm2, %v1632_v50, %v1636_v40  ;;  %v1663_v49 = vsel %vm244_vm2, %v1650_v63, %v1630_v26 }
 0x55a   :  { %v1672_v53 = vadd.f32 %v1662_v38, %v1540_v48  ;;  %2321 = vmatprep.subr.bf16.mxu1 %v2320_v1  ;;  %v1726_v48 = vld [vmem:[%s4173_s9 + $0x8] sm:$0xff]  ;;  %v1665_v61 = vadd.f32 %v1663_v49, %v3968_v19 }
 0x55b   :  { %2323 = vmatpush1.bf16.msra.mxu1 %v2322_v7 }
 0x55c   :  { %v1720_v58 = vadd.f32 %v1708_v62, %v1672_v53  ;;  %v1652_v39 = vpop.permute.xlu1 %1651  ;;  %2008 = vmatprep.subr.mxu1 %v2387_v2  ;;  %v1678_v10 = vpop.permute.xlu0 %1677 }
 0x55d   :  { %v1664_v15 = vsel %vm244_vm2, %v1652_v39, %v1632_v50  ;;  %v1709_v20 = vsel %vm269_vm3, %v1678_v10, %v1682_v8 }
 0x55e   :  { %v2316_v34 = vpack.c.bf16 %v1720_v58, %v1714_v6  ;;  %2294 = vmatmul.mubr.msk.f32.vlgmr.msra.gmra.mrb[12].mxu1 %vm1027_vm5, %v4038_v32  ;;  %v1671_v33 = vadd.f32 %v1664_v15, %v3983_v35  ;;  %v1713_v57 = vadd.f32 %v1709_v20, %v1665_v61 }
 0x55f   :  { %1892 = vmatprep.mubr.f32.mxu1 %v4297_v56  ;;  %2009 = vmatpush1.msra.mxu1 %v2388_v52 }
 0x560   :  { %v1680_v51 = vpop.permute.xlu1 %1679  ;;  %2317 = vmatprep.subr.bf16.mxu0 %v2316_v34  ;;  %2162 = vmatprep.subr.mxu1 %v2389_v9  ;;  %v1646_v29 = vpop.permute.xlu0 %1645 }
 0x561   :  { %v1710_v40 = vsel %vm269_vm3, %v1680_v51, %v1684_v18  ;;  %v1655_v35 = vsel %vm244_vm2, %v4001_v13, %v1646_v29  ;;  %v1653_v18 = vsel %vm244_vm2, %v1646_v29, %v1650_v63 }
 0x562   :  { %v1719_v8 = vadd.f32 %v1710_v40, %v1671_v33  ;;  %2295 = vmatmul.mubr.msk.f32.gmra.mrb[14].mxu1 %vm1027_vm5, %v1726_v48  ;;  %v1669_v45 = vadd.f32 %v1655_v35, %v3971_v5  ;;  %v1670_v21 = vadd.f32 %v1653_v18, %v3973_v36  ;;  %v1989_v5 = vld [vmem:[%s4175_s11 + $0x8] sm:$0xff] }
 0x563   :  { %2072 = vmatprep.mubr.f32.mxu1 %v4297_v56 }
 0x564   :  { %v2318_v19 = vpack.c.bf16 %v1719_v8, %v1713_v57  ;;  %v1648_v3 = vpop.permute.xlu1 %1647 }
 0x565   :  { %v1654_v47 = vsel %vm244_vm2, %v1648_v3, %v1652_v39  ;;  %v1656_v25 = vsel %vm244_vm2, %v4003_v43, %v1648_v3  ;;  %v1698_v4 = vpop.permute.xlu0 %1697  ;;  %v2390_v43 = vld [vmem:[%s4164_s0 + $0x20] sm:$0xff]  ;;  %s2456_s0 = smov [#allocation5]  }
 0x566   :  { %2319 = vmatpush1.bf16.msra.mxu0 %v2318_v19  ;;  %v1701_v13 = vsel %vm269_vm3, %v1694_v28, %v1698_v4  ;;  %v1711_v11 = vsel %vm269_vm3, %v1698_v4, %v1678_v10  ;;  %2298 = vmatmul.mubr.msk.f32.vlgmr.msra.gmra.mrb[16].mxu1 %vm296_vm4, %v1988_v16  ;;  %v1675_v23 = vadd.f32 %v1656_v25, %v3985_v0  ;;  %s2268_s22 = sshll.u32 %s2456_s0, 4  ;;  %s2269_s22 = int_to_ptr.vmem [resolvable:$true] %s2268_s22 }
 0x567   :  { %v1676_v44 = vadd.f32 %v1654_v47, %v3987_v59  ;;  %2078 = vmatprep.mubr.f32.mxu1 %v4297_v56  ;;  %2163 = vmatpush1.msra.mxu1 %v2390_v43  ;;  %v1717_v59 = vadd.f32 %v1701_v13, %v1669_v45  ;;  %v1718_v60 = vadd.f32 %v1711_v11, %v1670_v21  ;;  %s2415_s6 = scalar_lea.vmem %s2269_s22, 1536  ;;  %p2420_p9 = scmp.lt.s32.totalorder %s2269_s22, %s2269_s22 }
 0x568   :  { %v1700_v37 = vpop.permute.xlu1 %1699  ;;  %p2416_p8 = scmp.ne.s32.totalorder %s2269_s22, %s2415_s6  ;;  %p2421_p10 = scmp.lt.s32.totalorder %s2415_s6, %s2415_s6 }
 0x569   :  { %v1702_v36 = vsel %vm269_vm3, %v4021_v55, %v1700_v37  ;;  %v1712_v0 = vsel %vm269_vm3, %v1700_v37, %v1680_v51  ;;  %2292 = vmatmul.mubr.msk.f32.vlgmr.msra.gmra.mrb[12].mxu0 %vm1027_vm5, %v4038_v32 }
 0x56a   :  { %v1723_v28 = vadd.f32 %v1702_v36, %v1675_v23  ;;  %v1724_v27 = vadd.f32 %v1712_v0, %v1676_v44  ;;  %1815 = vmatprep.mubr.f32.mxu0 %v4297_v56  ;;  %2299 = vmatmul.mubr.msk.f32.gmra.mrb[18].mxu1 %vm296_vm4, %v1989_v5  ;;  %p2422_p11 = por %p2421_p10, %p2420_p9 }
 0x56b   :  { %2226 = vmatprep.mubr.f32.mxu1 %v4297_v56 }
 0x56c   :  { %v2326_v31 = vpack.c.bf16 %v1723_v28, %v1717_v59  ;;  %v2324_v17 = vpack.c.bf16 %v1724_v27, %v1718_v60  ;;  %p2423_p12 = pnand %p2422_p11, %p2416_p8 }
 0x56d   :  { %2293 = vmatmul.mubr.msk.f32.gmra.mrb[14].mxu0 %vm1027_vm5, %v1726_v48 }
 0x56e   :  { %2325 = vmatprep.subr.bf16.mxu0 %v2324_v17  ;;  %1963 = vmatprep.mubr.f32.mxu0 %v4297_v56 }
 0x56f   :  { %2327 = vmatpush1.bf16.msra.mxu0 %v2326_v31  ;;  %2302 = vmatmul.mubr.msk.f32.vlgmr.msra.gmra.mrb[20].mxu1 %vm296_vm4, %v1988_v16 }
 0x570   :  { %2085 = vmatprep.subr.mxu0 %v2391_v14  ;;  %2232 = vmatprep.mubr.f32.mxu1 %v4297_v56 }
 0x572   :  { %2296 = vmatmul.mubr.msk.f32.vlgmr.msra.gmra.mrb[16].mxu0 %vm1027_vm5, %v4038_v32 }
 0x573   :  { %1969 = vmatprep.mubr.f32.mxu0 %v4297_v56  ;;  %2086 = vmatpush1.msra.mxu0 %v2392_v41 }
 0x574   :  { %2303 = vmatmul.mubr.msk.f32.gmra.mrb[22].mxu1 %vm296_vm4, %v1989_v5 }
 0x576   :  { %2297 = vmatmul.mubr.msk.f32.gmra.mrb[18].mxu0 %vm1027_vm5, %v1726_v48  ;;  %v1732_v42 = vpop.permute.xlu0 %1731 }
 0x577   :  { %2149 = vmatprep.mubr.f32.mxu0 %v4297_v56 }
 0x579   :  { %v4125_v55 = vpop.permute.xlu1 %1736 }
 0x57a   :  { %2300 = vmatmul.mubr.msk.f32.vlgmr.msra.gmra.mrb[20].mxu0 %vm296_vm4, %v1988_v16  ;;  %v4133_v32 = vpop.permute.xlu0 %1999 }
 0x57b   :  { %2155 = vmatprep.mubr.f32.mxu0 %v4297_v56 }
 0x57d   :  { %v4129_v30 = vpop.permute.xlu1 %1994 }
 0x57e   :  { %2301 = vmatmul.mubr.msk.f32.gmra.mrb[22].mxu0 %vm296_vm4, %v1989_v5 }
 0x631   :  { %v1888_v54 = vpop.f32.mrb[12].mxu1 }
 0x632   :  { %v1890_v7 = vpop.f32.mrb[13].mxu1  ;;  %v1889_v21 = vadd.f32 %v1888_v54, %v1732_v42 }
 0x633   :  { %v1891_v5 = vadd.f32 %v1890_v7, %v1732_v42 }
 0x634   :  { %v1978_v28 = vmax.f32 %v1889_v21, 0.0 }
 0x635   :  { %v1894_v12 = vpop.f32.mrb[14].mxu1  ;;  %v1979_v41 = vmax.f32 %v1891_v5, 0.0 }
 0x636   :  { %v4127_v26 = vpop.f32.mrb[15].mxu1  ;;  %v1895_v60 = vadd.f32 %v1894_v12, %v4125_v55 }
 0x637   :  { %v1897_v14 = vadd.f32 %v4127_v26, %v4125_v55 }
 0x639   :  { %v2074_v22 = vpop.f32.mrb[16].mxu1 }
 0x63a   :  { %v2076_v46 = vpop.f32.mrb[17].mxu1  ;;  %v2075_v63 = vadd.f32 %v2074_v22, %v4129_v30 }
 0x63b   :  { %v2077_v24 = vadd.f32 %v2076_v46, %v4129_v30 }
 0x63c   :  { %v1811_v50 = vpop.f32.mrb[12].mxu0 }
 0x63d   :  { %v1813_v1 = vpop.f32.mrb[13].mxu0  ;;  %v1812_v38 = vadd.f32 %v1811_v50, %v1732_v42  ;;  %v2080_v62 = vpop.f32.mrb[18].mxu1  ;;  %v1984_v50 = vmax.f32 %v1895_v60, 0.0 }
 0x63e   :  { %v1814_v53 = vadd.f32 %v1813_v1, %v1732_v42  ;;  %v2082_v58 = vpop.f32.mrb[19].mxu1  ;;  %v2081_v34 = vadd.f32 %v2080_v62, %v4133_v32 }
 0x63f   :  { %v1976_v6 = vmax.f32 %v1812_v38, 0.0  ;;  %v2083_v48 = vadd.f32 %v2082_v58, %v4133_v32  ;;  %v1985_v38 = vmax.f32 %v1897_v14, 0.0 }
 0x640   :  { %v1977_v39 = vmax.f32 %v1814_v53, 0.0  ;;  %v1817_v2 = vpop.f32.mrb[14].mxu0 }
 0x641   :  { %v2239_v49 = vadd.f32 %v2075_v63, %v1976_v6  ;;  %v1818_v15 = vadd.f32 %v1817_v2, %v4125_v55  ;;  %v1819_v10 = vpop.f32.mrb[15].mxu0 }
 0x642   :  { %v2240_v20 = vadd.f32 %v2077_v24, %v1977_v39  ;;  %v1820_v56 = vadd.f32 %v1819_v10, %v4125_v55  ;;  %v2228_v52 = vpop.f32.mrb[20].mxu1 }
 0x643   :  { %2251 = vst [vmem:[#allocation5] sm:$0xff] %v2239_v49  ;;  %v1982_v61 = vmax.f32 %v1818_v15, 0.0  ;;  %v2230_v33 = vpop.f32.mrb[21].mxu1  ;;  %v2229_v19 = vadd.f32 %v2228_v52, %v4129_v30 }
 0x644   :  { %2252 = vst [vmem:[#allocation5 + $0x8] sm:$0xff] %v2240_v20  ;;  %v1983_v51 = vmax.f32 %v1820_v56, 0.0  ;;  %v2231_v3 = vadd.f32 %v2230_v33, %v4129_v30 }
 0x645   :  { %v2245_v9 = vadd.f32 %v2081_v34, %v1982_v61  ;;  %v1965_v40 = vpop.f32.mrb[16].mxu0 }
 0x646   :  { %v2246_v29 = vadd.f32 %v2083_v48, %v1983_v51  ;;  %v1966_v57 = vadd.f32 %v1965_v40, %v1732_v42  ;;  %v1967_v8 = vpop.f32.mrb[17].mxu0 }
 0x647   :  { %2257 = vst [vmem:[#allocation5 + $0x30] sm:$0xff] %v2245_v9  ;;  %v1968_v35 = vadd.f32 %v1967_v8, %v1732_v42  ;;  %v2234_v16 = vpop.f32.mrb[22].mxu1 }
 0x648   :  { %2258 = vst [vmem:[#allocation5 + $0x38] sm:$0xff] %v2246_v29  ;;  %v1980_v18 = vmax.f32 %v1966_v57, 0.0  ;;  %v2236_v47 = vpop.f32.mrb[23].mxu1  ;;  %v2235_v23 = vadd.f32 %v2234_v16, %v4133_v32 }
 0x649   :  { %v1981_v25 = vmax.f32 %v1968_v35, 0.0  ;;  %v1971_v4 = vpop.f32.mrb[18].mxu0  ;;  %v2237_v43 = vadd.f32 %v2236_v47, %v4133_v32 }
 0x64a   :  { %v1972_v45 = vadd.f32 %v1971_v4, %v4125_v55  ;;  %v2243_v13 = vadd.f32 %v2229_v19, %v1980_v18  ;;  %v1973_v11 = vpop.f32.mrb[19].mxu0 }
 0x64b   :  { %v1974_v44 = vadd.f32 %v1973_v11, %v4125_v55  ;;  %v2244_v37 = vadd.f32 %v2231_v3, %v1981_v25 }
 0x64c   :  { %v1986_v36 = vmax.f32 %v1972_v45, 0.0  ;;  %2255 = vst [vmem:[#allocation5 + $0x20] sm:$0xff] %v2243_v13 }
 0x64d   :  { %v1987_v0 = vmax.f32 %v1974_v44, 0.0  ;;  %2256 = vst [vmem:[#allocation5 + $0x28] sm:$0xff] %v2244_v37  ;;  %v2151_v59 = vpop.f32.mrb[20].mxu0 }
 0x64e   :  { %v2152_v27 = vadd.f32 %v2151_v59, %v4129_v30  ;;  %v2153_v31 = vpop.f32.mrb[21].mxu0  ;;  %v2249_v17 = vadd.f32 %v2235_v23, %v1986_v36 }
 0x64f   :  { %v2154_v54 = vadd.f32 %v2153_v31, %v4129_v30  ;;  %v2250_v7 = vadd.f32 %v2237_v43, %v1987_v0 }
 0x650   :  { %v2241_v42 = vadd.f32 %v2152_v27, %v1978_v28  ;;  %2261 = vst [vmem:[#allocation5 + $0x50] sm:$0xff] %v2249_v17 }
 0x651   :  { %v2242_v22 = vadd.f32 %v2154_v54, %v1979_v41  ;;  %2262 = vst [vmem:[#allocation5 + $0x58] sm:$0xff] %v2250_v7  ;;  %v2157_v46 = vpop.f32.mrb[22].mxu0 }
 0x652   :  { %2253 = vst [vmem:[#allocation5 + $0x10] sm:$0xff] %v2241_v42  ;;  %v2158_v12 = vadd.f32 %v2157_v46, %v4133_v32  ;;  %v2159_v1 = vpop.f32.mrb[23].mxu0 }
 0x653   :  { %2254 = vst [vmem:[#allocation5 + $0x18] sm:$0xff] %v2242_v22  ;;  %v2160_v55 = vadd.f32 %v2159_v1, %v4133_v32 }
 0x654   :  { %v2247_v26 = vadd.f32 %v2158_v12, %v1984_v50 }
 0x655   :  { %v2248_v63 = vadd.f32 %v2160_v55, %v1985_v38 }
 0x656   :  { %2259 = vst [vmem:[#allocation5 + $0x40] sm:$0xff] %v2247_v26 }
 0x657   :  { %2260 = vst [vmem:[#allocation5 + $0x48] sm:$0xff] %v2248_v63 }
 0x658   :  { %2426 = shalt.err (!%p2423_p12)
}
 0x659   :  { %s2427_s16 = scalar_lea.hbm %s4177_s13, 1536 }
 0x65a   :  { %p2428_p13 = scmp.ne.s32.totalorder %s4177_s13, %s2427_s16  ;;  %p2431_p0 = scmp.lt.u32.totalorder %s2427_s16, %s4177_s13 }
 0x65c   :  { %p2433_p1 = pnand %p2431_p0, %p2428_p13 }
 0x65e   :  { %2436 = shalt.err (!%p2433_p1)
}
 0x65f   :  { %s2457_s10 = smov 768   ;;  %s2458_s12 = smov 48  }
 0x660   :  { %2274 = dma.vmem_to_hbm [thread:$0]  %s2269_s22, 1536, %s4177_s13, [#allocation4], %s2457_s10, %s2457_s10, %s2458_s12  }
 0x661   :  { %2439 = dma.done.wait [#allocation4], 1536  }
 0x662   :  { %2440 = vsyncadd [#allocation4], 4294965760 }
 0x663   :  { %2278 = vsyncpa [#allocation3], 1 }
 0x664   :  { %2279 = vsyncpa [#allocation4], 1 }

</bundles_post_ra>
